<compile_context>
chip_gen: v7x
topology: tpu7x:2x2x1
jax: 0.10.0
libtpu: 0.0.40
codegen_flags: <defaults>
</compile_context>

<pallas_src>
import functools

import jax
import jax.numpy as jnp
from jax import lax
from jax.experimental import pallas as pl
from jax.experimental.pallas import tpu as pltpu


_FALLBACK_TOTAL_BYTES = 256 * 1024      # below this, plain XLA transpose wins
_PACKED_SLAB_PAD_BYTES = 64 * 1024      # padded per-slab cutoff for packed path
_VMEM_LIMIT_CAP = 64 * 1024 * 1024


def _round_up(x, m):
    return ((x + m - 1) // m) * m


def _sublane(itemsize):
    # 8 rows of 32-bit per vreg tile; sub-32-bit dtypes pack more rows.
    return max(8, 32 // max(1, itemsize))


@functools.lru_cache(maxsize=None)
def _vmem_limit_bytes():
    """Generation-aware VMEM limit: half of physical VMEM, capped at 64 MiB.

    v7x (64 MiB physical)  -> 32 MiB limit.
    v5e/v6e (128 MiB)      -> 64 MiB limit.
    """
    try:
        cap = int(pltpu.get_tpu_info().vmem_capacity_bytes)
    except Exception:  # conservative default if the query is unavailable
        cap = 64 * 1024 * 1024
    return int(min(cap // 2, _VMEM_LIMIT_CAP))


def _packed_kernel(x_ref, o_ref):
    # x_ref: (tb, M, N)   o_ref: (tb, N*M)  -- lane-dense output rows.
    tb, m, n = x_ref.shape
    xt = jnp.swapaxes(x_ref[...], 1, 2)          # (tb, N, M): XLU work
    o_ref[...] = xt.reshape(tb, n * m)           # dense full-lane stores


def _tiled_kernel(x_ref, o_ref):
    # x_ref: (tb, tm, tn)   o_ref: (tb, tn, tm)
    nb = x_ref.shape[0]
    if nb == 1:
        o_ref[0] = x_ref[0].T
    else:
        # fori_loop bounds vreg live ranges to one slab at a time.
        def body(b, carry):
            o_ref[b] = x_ref[b].T
            return carry

        lax.fori_loop(0, nb, body, 0, unroll=nb <= 4)


def transpose_last(x, deconstruct_idx=None):
    """Pallas equivalent of TransposeLast.forward."""
    if deconstruct_idx is not None:
        x = x[deconstruct_idx]
    x = jnp.asarray(x)
    if x.ndim < 2:
        raise ValueError("transpose_last requires >= 2 dims")

    lead = x.shape[:-2]
    M, N = x.shape[-2], x.shape[-1]
    B = 1
    for d in lead:
        B *= d

    itemsize = jnp.dtype(x.dtype).itemsize
    total_bytes = B * M * N * itemsize

    # Regime 1: tiny problems -> let XLA do the copy-transpose.
    if total_bytes < _FALLBACK_TOTAL_BYTES or B == 0 or M == 0 or N == 0:
        return jnp.swapaxes(x, -2, -1)

    x3 = x.reshape(B, M, N)
    sub = _sublane(itemsize)
    vmem_limit = _vmem_limit_bytes()
    budget = vmem_limit // 2            # headroom for compiler scratch / relayouts
    cost = pl.CostEstimate(
        flops=0, transcendentals=0, bytes_accessed=2 * total_bytes
    )

    in_slab_pad = _round_up(M, sub) * _round_up(N, 128) * itemsize
    out_row_pad = _round_up(N * M, 128) * itemsize

    if in_slab_pad + out_row_pad <= _PACKED_SLAB_PAD_BYTES:
        # -------- Regime 2: small slabs, batch-packed, lane-dense output -----
        per_slab = 2 * (in_slab_pad + out_row_pad)      # double-buffered in+out
        tb = max(1, min(B, budget // per_slab))
        if B > 1:
            tb = min(tb, pl.cdiv(B, 2))     # >= 2 grid steps: megacore/pipeline
        if tb < B and tb % sub != 0:
            # Keep the 2-D output block's sublane dim (8,128)-legal.
            tb = min(B, max(sub, (tb // sub) * sub))

        grid = (pl.cdiv(B, tb),)
        out2 = pl.pallas_call(
            _packed_kernel,
            out_shape=jax.ShapeDtypeStruct((B, N * M), x.dtype),
            grid_spec=pltpu.PrefetchScalarGridSpec(
                num_scalar_prefetch=0,
                grid=grid,
                in_specs=[pl.BlockSpec((tb, M, N), lambda b: (b, 0, 0))],
                out_specs=pl.BlockSpec((tb, N * M), lambda b: (b, 0)),
            ),
            compiler_params=pltpu.CompilerParams(
                dimension_semantics=("parallel",),
                vmem_limit_bytes=vmem_limit,
            ),
            cost_estimate=cost,
        )(x3)
        out3 = out2.reshape(B, N, M)
    else:
        # -------- Regime 3: tiled transpose over (B, M, N) -------------------
        tile = 128
        for t in (1024, 512, 256, 128):
            if 4 * t * t * itemsize <= budget:   # in+out tiles, double-buffered
                tile = t
                break
        tm = M if M <= tile else tile
        tn = N if N <= tile else tile

        in_blk = _round_up(tm, sub) * _round_up(tn, 128) * itemsize
        out_blk = _round_up(tn, sub) * _round_up(tm, 128) * itemsize
        tb = max(1, min(B, budget // (2 * (in_blk + out_blk))))

        # Guarantee >= 2 grid steps when possible so megacore sharding engages.
        if pl.cdiv(B, tb) * pl.cdiv(M, tm) * pl.cdiv(N, tn) < 2:
            if B > 1:
                tb = pl.cdiv(B, 2)
            elif N >= 256:
                tn = _round_up(pl.cdiv(N, 2), 128)
            elif M >= 256:
                tm = _round_up(pl.cdiv(M, 2), 128)
            # else: single small step; close to the fallback regime anyway.

        grid = (pl.cdiv(B, tb), pl.cdiv(M, tm), pl.cdiv(N, tn))
        out3 = pl.pallas_call(
            _tiled_kernel,
            out_shape=jax.ShapeDtypeStruct((B, N, M), x.dtype),
            grid_spec=pltpu.PrefetchScalarGridSpec(
                num_scalar_prefetch=0,
                grid=grid,
                in_specs=[pl.BlockSpec((tb, tm, tn), lambda b, i, j: (b, i, j))],
                out_specs=pl.BlockSpec((tb, tn, tm), lambda b, i, j: (b, j, i)),
            ),
            compiler_params=pltpu.CompilerParams(
                dimension_semantics=("parallel", "parallel", "parallel"),
                vmem_limit_bytes=vmem_limit,
            ),
            cost_estimate=cost,
        )(x3)

    return out3.reshape(*lead, N, M)


if __name__ == "__main__":
    key = jax.random.PRNGKey(0)
    k1, k2, k3 = jax.random.split(key, 3)

    # 1) Tiny shape typical of module usage -> XLA fallback path.
    x_small = jax.random.normal(k1, (2, 4, 16, 16), dtype=jnp.float32)
    y = jax.block_until_ready(transpose_last(x_small))
    assert y.shape == (2, 4, 16, 16)
    assert jnp.array_equal(y, jnp.swapaxes(x_small, -2, -1)), "tiny path mismatch"

    # deconstruct_idx path: module indexes the input container first.
    y_idx = jax.block_until_ready(
        transpose_last((x_small, x_small * 2.0), deconstruct_idx=1)
    )
    assert jnp.array_equal(
        y_idx, jnp.swapaxes(x_small * 2.0, -2, -1)
    ), "deconstruct mismatch"

    # 2) Small-slab Pallas path (batch-packed, lane-dense (B, N*M) output).
    x_packed = jax.random.normal(k2, (8, 8, 32, 64), dtype=jnp.float32)
    y_packed = jax.block_until_ready(transpose_last(x_packed))
    assert y_packed.shape == (8, 8, 64, 32)
    assert jnp.array_equal(
        y_packed, jnp.swapaxes(x_packed, -2, -1)
    ), "packed path mismatch"

    # 3) Tiled Pallas path (larger trailing dims, grid over M incl. partial block).
    x_tiled = jax.random.normal(k3, (1, 1536, 256), dtype=jnp.float32)
    y_tiled = jax.block_until_ready(transpose_last(x_tiled))
    assert y_tiled.shape == (1, 256, 1536)
    assert jnp.array_equal(
        y_tiled, jnp.swapaxes(x_tiled, -2, -1)
    ), "tiled path mismatch"

    print("KERNEL_OK")
</pallas_src>

<mosaic_0001>
module attributes {stable_mosaic.version = 11 : i64} {
  func.func @_packed_kernel(%arg0: i32, %arg1: memref<32x32x64xf32, #tpu.memory_space<vmem>>, %arg2: memref<32x2048xf32, #tpu.memory_space<vmem>>) attributes {dimension_semantics = [#tpu.dimension_semantics<parallel>], iteration_bounds = array<i64: 2>, scalar_prefetch = 0 : i64, scratch_operands = 0 : i64, tpu.core_type = #tpu.core_type<tc>, window_params = [{transform_indices = @transform_0, window_bounds = array<i64: 32, 32, 64>}, {transform_indices = @transform_1, window_bounds = array<i64: 32, 2048>}]} {
    %c0 = arith.constant 0 : index
    %c0_0 = arith.constant 0 : index
    %c0_1 = arith.constant 0 : index
    %0 = vector.load %arg1[%c0, %c0_0, %c0_1] : memref<32x32x64xf32, #tpu.memory_space<vmem>>, vector<32x32x64xf32>
    %1 = tpu.transpose %0, [0, 2, 1] : vector<32x32x64xf32> -> vector<32x64x32xf32>
    %2 = vector.shape_cast %1 : vector<32x64x32xf32> to vector<32x2048xf32>
    %c0_2 = arith.constant 0 : index
    %c0_3 = arith.constant 0 : index
    %3 = vector.load %arg2[%c0_2, %c0_3] : memref<32x2048xf32, #tpu.memory_space<vmem>>, vector<32x2048xf32>
    tpu.vector_store %arg2[%c0_2, %c0_3], %2 {strides = array<i32>} : memref<32x2048xf32, #tpu.memory_space<vmem>>, vector<32x2048xf32>,
    return
  }
  func.func @transform_0(%arg0: i32) -> (i32, i32, i32) {
    %c0_i32 = arith.constant 0 : i32
    %c0_i32_0 = arith.constant 0 : i32
    %c0_i32_1 = arith.constant 0 : i32
    return %arg0, %c0_i32, %c0_i32_0 : i32, i32, i32
  }
  func.func @transform_1(%arg0: i32) -> (i32, i32) {
    %c0_i32 = arith.constant 0 : i32
    %c0_i32_0 = arith.constant 0 : i32
    return %arg0, %c0_i32 : i32, i32
  }
}

</mosaic_0001>

<bundles_post_ra>
// kernel: tpu_custom_call.1
= control target key start
LH: loop header
LB: loop body
LE: loop exit
PB: predicated region body
PF: predicated region fallthrough
CT: control target
= control target key end

     0   :  { %6 = vsyncpa [#allocation3], 0  ;;  %s11214_s0 = inlined_call_operand.hbm [shape: f32[64,32,64], index: 0, kind: input, shape index: {}]   ;;  %s11215_s1 = inlined_call_operand.hbm [shape: f32[64,2048], index: 1, kind: output, shape index: {}]  }
   0x1   :  { %8 = vsyncpa [#allocation3 + $0x1], 0 }
   0x2   :  { %9 = vsyncpa [#allocation4], 0 }
   0x3   :  { %11 = vsyncpa [#allocation4 + $0x1], 0  ;;  %s6952_s6 = smov 0   ;;  %s6954_s7 = smov 0  }
   0x4   :  { %s6956_s8 = smov 0   ;;  %s6958_s9 = smov 0  }
   0x5 LB: > { %s6973_s10 = sadd.s32 4294967295, %s6929_s9   ;;  %s6757_s11 = sadd.s32 4294967294, %s6929_s9   ;;  %s6929_s9 = sphi %s6958_s9, %s12631_s9   ;;  %s6925_s8 = sphi %s6956_s8, %s12630_s8   ;;  %s6921_s7 = sphi %s6954_s7, %s12629_s7   ;;  %s6917_s6 = sphi %s6952_s6, %s12628_s6  }
   0x6   : > { %s6977_s12 = sadd.s32 1, %s6929_s9   ;;  %s24_s13 = sadd.s32 1, %s6925_s8 }
   0x7   : > { %s21_s14 = ssub.s32 %s6929_s9, %s6977_s12  ;;  %p31_p0 = scmp.ne.s32.totalorder %s6925_s8, %s6921_s7 }
   0x8   : > { %p22_p1 = scmp.eq.s32.totalorder %s21_s14, 0  ;;  %p32_p2 = scmp.eq.s32.totalorder %s6929_s9, 0 }
   0x9   : > { %p37_p3 = scmp.ne.s32.totalorder %s6921_s7, %s6917_s6  ;;  %p38_p4 = scmp.eq.s32.totalorder %s6973_s10, 0 }
   0xa   : > { %s6989_s15 = scalar_select %p22_p1, %s6925_s8, %s24_s13  }
   0xb   : > { %p6991_p5 = por %p32_p2, %p31_p0  ;;  %p6995_p6 = por %p38_p4, %p37_p3 }
   0xc   : > { %p61_p7 = scmp.eq.s32.totalorder %s6973_s10, 1  ;;  %p67_p8 = scmp.eq.s32.totalorder %s6757_s11, 1 }
   0xd   : > { %p6789_p10 = scmp.lt.s32.totalorder %s6929_s9, 2  ;;  %s87_s20 = sand.u32 1, %s6925_s8  }
   0xe   : > { %p7002_p11 = por %p61_p7, %p31_p0  ;;  %p7006_p12 = por %p67_p8, %p37_p3 }
   0xf   : > { %s6774_s21 = sshll.u32 %s6929_s9, 14  ;;  %s6760_s22 = sshll.u32 %s87_s20, 10 }
  0x10   : > { %s11695_s18 = scalar_select %p7002_p11, 1, 0 }
  0x11   : > { %s11696_s19 = scalar_select %p7006_p12, 1, 0 }
  0x12   : > { %s7015_s25 = scalar_lea.hbm %s11214_s0, %s6774_s21  ;;  %s91_s26 = scalar_lea.vmem [#allocation2], %s6760_s22 }
  0x13   : > { %s99_s27 = sshll.u32 %s91_s26, 4  ;;  %p7019_p13 = pnand %p6789_p10, %p6991_p5  ;;  %s7023_s27 = int_to_ptr.vmem [resolvable:$true] %s99_s27 }
  0x14   : > { %s7025_s29 = scalar_lea.sflag [#allocation3], %s87_s20  ;;  %s6833_s30 = scalar_lea.hbm %s7015_s25, 16384 }
  0x15   : > { %p6834_p0 = scmp.ne.s32.totalorder %s7015_s25, %s6833_s30  ;;  %p6835_p1 = pneg %p7019_p13 }
  0x16   : > { %s6838_s4 = scalar_lea.hbm %s11214_s0, 32768  ;;  %p6839_p4 = scmp.lt.u32.totalorder %s7015_s25, %s11214_s0 }
  0x17   : > { %p6836_p2 = pnand %p6835_p1, %p6834_p0  ;;  %p6840_p5 = scmp.lt.u32.totalorder %s6838_s4, %s6833_s30 }
  0x18   : > { %p6842_p8 = scmp.lt.u32.totalorder %s6833_s30, %s7015_s25 }
  0x19   : > { %p6837_p3 = pneg %p6836_p2  ;;  %p6841_p7 = por %p6840_p5, %p6839_p4 }
  0x1b   : > { %p6843_p10 = por %p6842_p8, %p6841_p7 }
  0x1d   : > { %p6844_p9 = pnand %p6843_p10, %p6837_p3 }
  0x1f   : > { %6847 = shalt.err (!%p6844_p9)
}
  0x20   : > { %s6848_s13 = scalar_lea.vmem %s7023_s27, 16384  ;;  %s6931_s14 = smov [#allocation2]  }
  0x21   : > { %p6849_p0 = scmp.ne.s32.totalorder %s7023_s27, %s6848_s13  ;;  %s6853_s16 = sshll.u32 %s6931_s14, 4  ;;  %s6854_s16 = int_to_ptr.vmem [resolvable:$false] %s6853_s16 }
  0x22   : > { %s6855_s20 = scalar_lea.vmem %s6854_s16, 32768  ;;  %p6856_p11 = scmp.lt.s32.totalorder %s7023_s27, %s6854_s16 }
  0x23   : > { %p6851_p2 = pnand %p6849_p0, %p6835_p1  ;;  %p6857_p4 = scmp.lt.s32.totalorder %s6855_s20, %s6848_s13 }
  0x25   : > { %p6852_p12 = pneg %p6851_p2  ;;  %p6858_p5 = por %p6857_p4, %p6856_p11 }
  0x27   : > { %p6859_p7 = pnand %p6858_p5, %p6852_p12 }
  0x29   : > { %6862 = shalt.err (!%p6859_p7)
}
  0x2a   : > { %s6932_s21 = smov 128   ;;  %s6933_s22 = smov 8  }
  0x2b   : > { %6784 = dma.hbm_to_vmem [thread:$0]  (!%p7019_p13), %s7015_s25, 16384, %s7023_s27, %s7025_s29, %s6932_s21, %s6932_s21, %s6933_s22  }
  0x2c   : > { %p6764_p9 = scmp.ge.s32.totalorder %s6929_s9, 1  ;;  %p107_p1 = scmp.lt.s32.totalorder %s6929_s9, 3 }
  0x2e   : > { %p108_p3 = pnand %p6764_p9, %p107_p1 }
  0x30   : > { %111 = sbr.rel (%p108_p3) target bundleno = 1196 (0x4ac), region = 24 }
  0x37   : > { %s7056_s23 = sand.u32 1, %s6921_s7  }
  0x38   : > { %s6765_s24 = sshll.u32 %s7056_s23, 10  ;;  %s114_s26 = scalar_lea.sflag [#allocation3], %s7056_s23 }
  0x39   : > { %s7060_s30 = scalar_lea.vmem [#allocation2], %s6765_s24 }
  0x3a   : > { %6908 = dma.done.wait (%p6995_p6), %s114_s26, 16384  }
  0x3b   : > { %6910 = vsyncadd (%p6995_p6), %s114_s26, 4294950912  ;;  %v142_v0 = vld [vmem:[%s7060_s30 + $0x20] sm:$0xff]  ;;  %v143_v2 = vld [vmem:[%s7060_s30 + $0x28] sm:$0xff]  ;;  %v6934_v58 = vmov 1983009808   ;;  %v1295_v60 = vlaneseq  ;;  %s6936_s17 = smov 32  }
  0x3c   : > { %v138_v1 = vld [vmem:[%s7060_s30] sm:$0xff]  ;;  %298 = vxpose.xlu1.b32.start [1/4] (short) (narrow) %v142_v0, 64  ;;  %v139_v3 = vld [vmem:[%s7060_s30 + $0x8] sm:$0xff]  ;;  %v144_v4 = vld [vmem:[%s7060_s30 + $0x30] sm:$0xff]  ;;  %v1293_v59 = vunpack.c.l.s4 %v6934_v58  ;;  %s6937_s25 = smov 64   ;;  %s6938_s27 = smov 96  }
  0x3d   : > { %266 = vxpose.xlu0.b32.start [1/4] (short) (narrow) %v138_v1, 64  ;;  %v140_v5 = vld [vmem:[%s7060_s30 + $0x10] sm:$0xff]  ;;  %v145_v6 = vld [vmem:[%s7060_s30 + $0x38] sm:$0xff]  ;;  %v150_v8 = vld [vmem:[%s7060_s30 + $0x60] sm:$0xff]  ;;  %vm6410_vm0 = vcmask 261120   ;;  %s6766_s28 = sshll.u32 %s7056_s23, 9 }
  0x3e   : > { %v141_v7 = vld [vmem:[%s7060_s30 + $0x18] sm:$0xff]  ;;  %v146_v9 = vld [vmem:[%s7060_s30 + $0x40] sm:$0xff]  ;;  %v151_v10 = vld [vmem:[%s7060_s30 + $0x68] sm:$0xff]  ;;  %v1294_v1 = vunpack.c.0.s8 %v1293_v59  ;;  %vm6415_vm1 = vcmask 523264   ;;  %vm6420_vm2 = vcmask 785408   ;;  %s10193_s29 = scalar_lea.vmem [#allocation5], %s6766_s28 }
  0x3f   : > { %v147_v11 = vld [vmem:[%s7060_s30 + $0x48] sm:$0xff]  ;;  %v152_v12 = vld [vmem:[%s7060_s30 + $0x70] sm:$0xff]  ;;  %v153_v14 = vld [vmem:[%s7060_s30 + $0x78] sm:$0xff]  ;;  %s6776_s2 = sshll.u32 %s6973_s10, 13  ;;  %s6684_s3 = sshll.u32 %s10193_s29, 4  ;;  %s11167_s3 = int_to_ptr.vmem [resolvable:$true] %s6684_s3 }
  0x40   : > { %299 = vxpose.xlu1.b32.cont [2/4] (short) (narrow) %v143_v2, 64  ;;  %v148_v13 = vld [vmem:[%s7060_s30 + $0x50] sm:$0xff]  ;;  %v149_v15 = vld [vmem:[%s7060_s30 + $0x58] sm:$0xff]  ;;  %v158_v16 = vld [vmem:[%s7060_s30 + $0xa0] sm:$0xff]  ;;  %v7134_v2 = vshrl.u32 %v1295_v60, 7  ;;  %s11165_s11 = scalar_lea.hbm %s11215_s1, %s6776_s2  ;;  %s6670_s10 = scalar_lea.sflag [#allocation4], %s7056_s23 }
  0x41   : > { %267 = vxpose.xlu0.b32.cont [2/4] (short) (narrow) %v139_v3, 64  ;;  %v154_v17 = vld [vmem:[%s7060_s30 + $0x80] sm:$0xff]  ;;  %v159_v18 = vld [vmem:[%s7060_s30 + $0xa8] sm:$0xff]  ;;  %v160_v20 = vld [vmem:[%s7060_s30 + $0xb0] sm:$0xff]  ;;  %s6863_s13 = scalar_lea.vmem %s11167_s3, 8192  ;;  %p12625_p11 = scmp.ne.s32.totalorder %s11695_s18, 0 }
  0x42   : > { %v155_v19 = vld [vmem:[%s7060_s30 + $0x88] sm:$0xff]  ;;  %v156_v21 = vld [vmem:[%s7060_s30 + $0x90] sm:$0xff]  ;;  %v161_v22 = vld [vmem:[%s7060_s30 + $0xb8] sm:$0xff]  ;;  %p6864_p6 = scmp.ne.s32.totalorder %s11167_s3, %s6863_s13  ;;  %s6939_s14 = smov [#allocation5]  }
  0x43   : > { %v157_v23 = vld [vmem:[%s7060_s30 + $0x98] sm:$0xff]  ;;  %v166_v24 = vld [vmem:[%s7060_s30 + $0xe0] sm:$0xff]  ;;  %v167_v26 = vld [vmem:[%s7060_s30 + $0xe8] sm:$0xff]  ;;  %s6867_s16 = sshll.u32 %s6939_s14, 4  ;;  %s6868_s16 = int_to_ptr.vmem [resolvable:$false] %s6867_s16 }
  0x44   : > { %300 = vxpose.xlu1.b32.cont [3/4] (short) (narrow) %v144_v4, 64  ;;  %v162_v25 = vld [vmem:[%s7060_s30 + $0xc0] sm:$0xff]  ;;  %v163_v27 = vld [vmem:[%s7060_s30 + $0xc8] sm:$0xff]  ;;  %v168_v28 = vld [vmem:[%s7060_s30 + $0xf0] sm:$0xff]  ;;  %p6865_p12 = pnand %p6864_p6, %p12625_p11  ;;  %s6869_s20 = scalar_lea.vmem %s6868_s16, 16384 }
  0x45   : > { %268 = vxpose.xlu0.b32.cont [3/4] (short) (narrow) %v140_v5, 64  ;;  %v164_v29 = vld [vmem:[%s7060_s30 + $0xd0] sm:$0xff]  ;;  %v169_v30 = vld [vmem:[%s7060_s30 + $0xf8] sm:$0xff]  ;;  %v174_v32 = vld [vmem:[%s7060_s30 + $0x120] sm:$0xff]  ;;  %v7141_v5 = vsub.s32 %v1294_v1, %v7134_v2  ;;  %p6870_p8 = scmp.lt.s32.totalorder %s11167_s3, %s6868_s16  ;;  %p6871_p10 = scmp.lt.s32.totalorder %s6869_s20, %s6863_s13 }
  0x46   : > { %v165_v31 = vld [vmem:[%s7060_s30 + $0xd8] sm:$0xff]  ;;  %v170_v33 = vld [vmem:[%s7060_s30 + $0x100] sm:$0xff]  ;;  %v175_v34 = vld [vmem:[%s7060_s30 + $0x128] sm:$0xff]  ;;  %p6866_p13 = pneg %p6865_p12 }
  0x47   : > { %v171_v35 = vld [vmem:[%s7060_s30 + $0x108] sm:$0xff]  ;;  %v176_v36 = vld [vmem:[%s7060_s30 + $0x130] sm:$0xff]  ;;  %v177_v38 = vld [vmem:[%s7060_s30 + $0x138] sm:$0xff]  ;;  %11698 = vst [vmem:[#allocation8_spill] sm:$0xff] %v7141_v5  ;;  %p6872_p0 = por %p6871_p10, %p6870_p8 }
  0x48   : > { %301 = vxpose.xlu1.b32.end [4/4] (short) (narrow) %v145_v6, 64  ;;  %v172_v37 = vld [vmem:[%s7060_s30 + $0x110] sm:$0xff]  ;;  %v173_v39 = vld [vmem:[%s7060_s30 + $0x118] sm:$0xff]  ;;  %v182_v48 = vld [vmem:[%s7060_s30 + $0x160] sm:$0xff] }
  0x49   : > { %269 = vxpose.xlu0.b32.end [4/4] (short) (narrow) %v141_v7, 64  ;;  %v178_v49 = vld [vmem:[%s7060_s30 + $0x140] sm:$0xff]  ;;  %v183_v52 = vld [vmem:[%s7060_s30 + $0x168] sm:$0xff]  ;;  %v184_v56 = vld [vmem:[%s7060_s30 + $0x170] sm:$0xff]  ;;  %p6873_p2 = pnand %p6872_p0, %p6866_p13 }
  0x4a   : > { %v179_v53 = vld [vmem:[%s7060_s30 + $0x148] sm:$0xff]  ;;  %v180_v57 = vld [vmem:[%s7060_s30 + $0x150] sm:$0xff]  ;;  %v185_v63 = vld [vmem:[%s7060_s30 + $0x178] sm:$0xff] }
  0x4b   : > { %v181_v0 = vld [vmem:[%s7060_s30 + $0x158] sm:$0xff] }
  0x59   : > { %362 = vxpose.xlu1.b32.start [1/4] (short) (narrow) %v150_v8, 64 }
  0x5a   : > { %330 = vxpose.xlu0.b32.start [1/4] (short) (narrow) %v146_v9, 64 }
  0x5d   : > { %363 = vxpose.xlu1.b32.cont [2/4] (short) (narrow) %v151_v10, 64 }
  0x5e   : > { %331 = vxpose.xlu0.b32.cont [2/4] (short) (narrow) %v147_v11, 64 }
  0x61   : > { %364 = vxpose.xlu1.b32.cont [3/4] (short) (narrow) %v152_v12, 64 }
  0x62   : > { %332 = vxpose.xlu0.b32.cont [3/4] (short) (narrow) %v148_v13, 64 }
  0x65   : > { %365 = vxpose.xlu1.b32.end [4/4] (short) (narrow) %v153_v14, 64 }
  0x66   : > { %333 = vxpose.xlu0.b32.end [4/4] (short) (narrow) %v149_v15, 64 }
  0x76   : > { %426 = vxpose.xlu1.b32.start [1/4] (short) (narrow) %v158_v16, 64 }
  0x77   : > { %394 = vxpose.xlu0.b32.start [1/4] (short) (narrow) %v154_v17, 64 }
  0x7a   : > { %427 = vxpose.xlu1.b32.cont [2/4] (short) (narrow) %v159_v18, 64 }
  0x7b   : > { %395 = vxpose.xlu0.b32.cont [2/4] (short) (narrow) %v155_v19, 64 }
  0x7e   : > { %428 = vxpose.xlu1.b32.cont [3/4] (short) (narrow) %v160_v20, 64 }
  0x7f   : > { %396 = vxpose.xlu0.b32.cont [3/4] (short) (narrow) %v156_v21, 64 }
  0x82   : > { %429 = vxpose.xlu1.b32.end [4/4] (short) (narrow) %v161_v22, 64 }
  0x83   : > { %397 = vxpose.xlu0.b32.end [4/4] (short) (narrow) %v157_v23, 64 }
  0x93   : > { %490 = vxpose.xlu1.b32.start [1/4] (short) (narrow) %v166_v24, 64 }
  0x94   : > { %458 = vxpose.xlu0.b32.start [1/4] (short) (narrow) %v162_v25, 64 }
  0x97   : > { %491 = vxpose.xlu1.b32.cont [2/4] (short) (narrow) %v167_v26, 64 }
  0x98   : > { %459 = vxpose.xlu0.b32.cont [2/4] (short) (narrow) %v163_v27, 64 }
  0x9b   : > { %492 = vxpose.xlu1.b32.cont [3/4] (short) (narrow) %v168_v28, 64 }
  0x9c   : > { %460 = vxpose.xlu0.b32.cont [3/4] (short) (narrow) %v164_v29, 64 }
  0x9f   : > { %493 = vxpose.xlu1.b32.end [4/4] (short) (narrow) %v169_v30, 64 }
  0xa0   : > { %461 = vxpose.xlu0.b32.end [4/4] (short) (narrow) %v165_v31, 64 }
  0xb0   : > { %554 = vxpose.xlu1.b32.start [1/4] (short) (narrow) %v174_v32, 64 }
  0xb1   : > { %522 = vxpose.xlu0.b32.start [1/4] (short) (narrow) %v170_v33, 64 }
  0xb4   : > { %555 = vxpose.xlu1.b32.cont [2/4] (short) (narrow) %v175_v34, 64 }
  0xb5   : > { %523 = vxpose.xlu0.b32.cont [2/4] (short) (narrow) %v171_v35, 64 }
  0xb8   : > { %556 = vxpose.xlu1.b32.cont [3/4] (short) (narrow) %v176_v36, 64 }
  0xb9   : > { %524 = vxpose.xlu0.b32.cont [3/4] (short) (narrow) %v172_v37, 64 }
  0xbc   : > { %v314_v40 = vpop.trf.xlu1  ;;  %557 = vxpose.xlu1.b32.end [4/4] (short) (narrow) %v177_v38, 64 }
  0xbd   : > { %v282_v41 = vpop.trf.xlu0  ;;  %525 = vxpose.xlu0.b32.end [4/4] (short) (narrow) %v173_v39, 64 }
  0xc0   : > { %v315_v42 = vpop.trf.xlu1 }
  0xc1   : > { %v283_v43 = vpop.trf.xlu0 }
  0xc4   : > { %v7106_v44 = vpop.trf.xlu1 }
  0xc5   : > { %v7108_v45 = vpop.trf.xlu0 }
  0xc8   : > { %v7110_v46 = vpop.trf.xlu1 }
  0xc9   : > { %v7112_v47 = vpop.trf.xlu0 }
  0xcc   : > { %v7116_v50 = vpop.trf.xlu1 }
  0xcd   : > { %v7118_v51 = vpop.trf.xlu0  ;;  %618 = vxpose.xlu1.b32.start [1/4] (short) (narrow) %v182_v48, 64 }
  0xce   : > { %586 = vxpose.xlu0.b32.start [1/4] (short) (narrow) %v178_v49, 64  ;;  %v186_v49 = vld [vmem:[%s7060_s30 + $0x180] sm:$0xff] }
  0xd0   : > { %v7122_v54 = vpop.trf.xlu1 }
  0xd1   : > { %v7124_v55 = vpop.trf.xlu0  ;;  %619 = vxpose.xlu1.b32.cont [2/4] (short) (narrow) %v183_v52, 64 }
  0xd2   : > { %587 = vxpose.xlu0.b32.cont [2/4] (short) (narrow) %v179_v53, 64  ;;  %v197_v53 = vld [vmem:[%s7060_s30 + $0x1d8] sm:$0xff] }
  0xd4   : > { %v7128_v61 = vpop.trf.xlu1 }
  0xd5   : > { %v7130_v62 = vpop.trf.xlu0  ;;  %620 = vxpose.xlu1.b32.cont [3/4] (short) (narrow) %v184_v56, 64 }
  0xd6   : > { %588 = vxpose.xlu0.b32.cont [3/4] (short) (narrow) %v180_v57, 64 }
  0xd8   : > { %v7136_v3 = vpop.trf.xlu1 }
  0xd9   : > { %v7138_v4 = vpop.trf.xlu0  ;;  %621 = vxpose.xlu1.b32.end [4/4] (short) (narrow) %v185_v63, 64 }
  0xda   : > { %589 = vxpose.xlu0.b32.end [4/4] (short) (narrow) %v181_v0, 64  ;;  %v191_v0 = vld [vmem:[%s7060_s30 + $0x1a8] sm:$0xff] }
  0xdc   : > { %v378_v6 = vpop.trf.xlu1 }
  0xdd   : > { %v346_v7 = vpop.trf.xlu0  ;;  %v1306_v8 = vcombine.low %v314_v40, %v378_v6  ;;  %v1307_v9 = vcombine.high %v314_v40, %v378_v6 }
  0xde   : > { %v1290_v10 = vcombine.low %v282_v41, %v346_v7  ;;  %v1291_v11 = vcombine.high %v282_v41, %v346_v7 }
  0xdf   : > { %v7144_v12 = vrot.slane %v1306_v8, %v7141_v5  ;;  %v7147_v13 = vrot.slane %v1307_v9, %v7141_v5 }
  0xe0   : > { %v7150_v14 = vrot.slane %v1290_v10, %v7141_v5  ;;  %v7153_v15 = vrot.slane %v1291_v11, %v7141_v5  ;;  %v379_v16 = vpop.trf.xlu1  ;;  %v187_v10 = vld [vmem:[%s7060_s30 + $0x188] sm:$0xff] }
  0xe1   : > { %v347_v17 = vpop.trf.xlu0  ;;  %v1850_v22 = vcombine.low %v315_v42, %v379_v16  ;;  %v1851_v23 = vcombine.high %v315_v42, %v379_v16 }
  0xe2   : > { %v1354_v18 = vcombine.low %v7150_v14, %v7144_v12  ;;  %v1355_v19 = vcombine.high %v7150_v14, %v7144_v12  ;;  %v1370_v20 = vcombine.low %v7153_v15, %v7147_v13  ;;  %v1371_v21 = vcombine.high %v7153_v15, %v7147_v13 }
  0xe3   : > { %v1834_v24 = vcombine.low %v283_v43, %v347_v17  ;;  %v1835_v25 = vcombine.high %v283_v43, %v347_v17  ;;  %v7164_v26 = vrot.slane %v1850_v22, %v7141_v5  ;;  %v7167_v27 = vrot.slane %v1851_v23, %v7141_v5  ;;  %v200_v23 = vld [vmem:[%s7060_s30 + $0x1f0] sm:$0xff] }
  0xe4   : > { %v380_v30 = vpop.trf.xlu1  ;;  %v196_v22 = vld [vmem:[%s7060_s30 + $0x1d0] sm:$0xff] }
  0xe5   : > { %v7170_v28 = vrot.slane %v1834_v24, %v7141_v5  ;;  %v7173_v29 = vrot.slane %v1835_v25, %v7141_v5  ;;  %v348_v31 = vpop.trf.xlu0  ;;  %v2394_v32 = vcombine.low %v7106_v44, %v380_v30  ;;  %v2395_v33 = vcombine.high %v7106_v44, %v380_v30  ;;  %v190_v44 = vld [vmem:[%s7060_s30 + $0x1a0] sm:$0xff] }
  0xe6   : > { %v2378_v34 = vcombine.low %v7108_v45, %v348_v31  ;;  %v2379_v35 = vcombine.high %v7108_v45, %v348_v31 }
  0xe7   : > { %v1898_v36 = vcombine.low %v7170_v28, %v7164_v26  ;;  %v1899_v37 = vcombine.high %v7170_v28, %v7164_v26  ;;  %v1914_v38 = vcombine.low %v7173_v29, %v7167_v27  ;;  %v1915_v39 = vcombine.high %v7173_v29, %v7167_v27 }
  0xe8   : > { %v7188_v40 = vrot.slane %v2394_v32, %v7141_v5  ;;  %v7191_v41 = vrot.slane %v2395_v33, %v7141_v5  ;;  %v7194_v42 = vrot.slane %v2378_v34, %v7141_v5  ;;  %v7197_v43 = vrot.slane %v2379_v35, %v7141_v5  ;;  %v381_v45 = vpop.trf.xlu1  ;;  %v192_v32 = vld [vmem:[%s7060_s30 + $0x1b0] sm:$0xff] }
  0xe9   : > { %v349_v48 = vpop.trf.xlu0  ;;  %v2938_v58 = vcombine.low %v7110_v46, %v381_v45  ;;  %v2939_v59 = vcombine.high %v7110_v46, %v381_v45  ;;  %v188_v35 = vld [vmem:[%s7060_s30 + $0x190] sm:$0xff]  ;;  %v6935_v45 = vmov 1934713408  }
  0xea   : > { %v2922_v60 = vcombine.low %v7112_v47, %v349_v48  ;;  %v2923_v63 = vcombine.high %v7112_v47, %v349_v48  ;;  %682 = vxpose.xlu1.b32.start [1/4] (short) (narrow) %v190_v44, 64  ;;  %v1357_v44 = vunpack.c.l.s4 %v6935_v45  ;;  %v11709_v26 = vcombine.high %v7194_v42, %v7188_v40 }
  0xeb   : > { %650 = vxpose.xlu0.b32.start [1/4] (short) (narrow) %v186_v49, 64  ;;  %v7215_v1 = vrot.slane %v2938_v58, %v7141_v5  ;;  %v7218_v6 = vrot.slane %v2939_v59, %v7141_v5  ;;  %v194_v49 = vld [vmem:[%s7060_s30 + $0x1c0] sm:$0xff]  ;;  %v11711_v27 = vcombine.low %v7197_v43, %v7191_v41 }
  0xec   : > { %v7221_v7 = vrot.slane %v2922_v60, %v7141_v5  ;;  %v7224_v8 = vrot.slane %v2923_v63, %v7141_v5  ;;  %v382_v46 = vpop.trf.xlu1 }
  0xed   : > { %v350_v9 = vpop.trf.xlu0  ;;  %v3482_v47 = vcombine.low %v7116_v50, %v382_v46  ;;  %v3483_v11 = vcombine.high %v7116_v50, %v382_v46 }
  0xee   : > { %v3466_v16 = vcombine.low %v7118_v51, %v350_v9  ;;  %v3467_v17 = vcombine.high %v7118_v51, %v350_v9  ;;  %683 = vxpose.xlu1.b32.cont [2/4] (short) (narrow) %v191_v0, 64  ;;  %v193_v0 = vld [vmem:[%s7060_s30 + $0x1b8] sm:$0xff] }
  0xef   : > { %v7240_v50 = vrot.slane %v3482_v47, %v7141_v5  ;;  %v7243_v30 = vrot.slane %v3483_v11, %v7141_v5  ;;  %651 = vxpose.xlu0.b32.cont [2/4] (short) (narrow) %v187_v10, 64 }
  0xf0   : > { %v7246_v51 = vrot.slane %v3466_v16, %v7141_v5  ;;  %v7249_v31 = vrot.slane %v3467_v17, %v7141_v5  ;;  %v383_v33 = vpop.trf.xlu1  ;;  %v189_v16 = vld [vmem:[%s7060_s30 + $0x198] sm:$0xff] }
  0xf1   : > { %v351_v34 = vpop.trf.xlu0  ;;  %v4026_v58 = vcombine.low %v7122_v54, %v383_v33  ;;  %v4027_v59 = vcombine.high %v7122_v54, %v383_v33 }
  0xf2   : > { %v4010_v60 = vcombine.low %v7124_v55, %v351_v34  ;;  %v4011_v63 = vcombine.high %v7124_v55, %v351_v34  ;;  %684 = vxpose.xlu1.b32.cont [3/4] (short) (narrow) %v192_v32, 64 }
  0xf3   : > { %652 = vxpose.xlu0.b32.cont [3/4] (short) (narrow) %v188_v35, 64  ;;  %v7267_v46 = vrot.slane %v4026_v58, %v7141_v5  ;;  %v7270_v9 = vrot.slane %v4027_v59, %v7141_v5 }
  0xf4   : > { %v7273_v10 = vrot.slane %v4010_v60, %v7141_v5  ;;  %v7276_v47 = vrot.slane %v4011_v63, %v7141_v5  ;;  %v384_v54 = vpop.trf.xlu1 }
  0xf5   : > { %v352_v11 = vpop.trf.xlu0  ;;  %v4570_v55 = vcombine.low %v7128_v61, %v384_v54  ;;  %v4571_v17 = vcombine.high %v7128_v61, %v384_v54 }
  0xf6   : > { %v4554_v32 = vcombine.low %v7130_v62, %v352_v11  ;;  %v4555_v33 = vcombine.high %v7130_v62, %v352_v11  ;;  %685 = vxpose.xlu1.b32.end [4/4] (short) (narrow) %v193_v0, 64 }
  0xf7   : > { %v7292_v60 = vrot.slane %v4570_v55, %v7141_v5  ;;  %v7295_v61 = vrot.slane %v4571_v17, %v7141_v5  ;;  %653 = vxpose.xlu0.b32.end [4/4] (short) (narrow) %v189_v16, 64 }
  0xf8   : > { %v7298_v62 = vrot.slane %v4554_v32, %v7141_v5  ;;  %v7301_v63 = vrot.slane %v4555_v33, %v7141_v5  ;;  %v385_v54 = vpop.trf.xlu1 }
  0xf9   : > { %v353_v11 = vpop.trf.xlu0  ;;  %v5114_v32 = vcombine.low %v7136_v3, %v385_v54  ;;  %v5115_v33 = vcombine.high %v7136_v3, %v385_v54 }
  0xfa   : > { %v5098_v16 = vcombine.low %v7138_v4, %v353_v11  ;;  %v5099_v59 = vcombine.high %v7138_v4, %v353_v11  ;;  %v198_v4 = vld [vmem:[%s7060_s30 + $0x1e0] sm:$0xff]  ;;  %v195_v11 = vld [vmem:[%s7060_s30 + $0x1c8] sm:$0xff] }
  0xfb   : > { %v7316_v58 = vrot.slane %v5114_v32, %v7141_v5  ;;  %v7319_v0 = vrot.slane %v5115_v33, %v7141_v5  ;;  %v199_v32 = vld [vmem:[%s7060_s30 + $0x1e8] sm:$0xff] }
  0xfc   : > { %v7322_v55 = vrot.slane %v5098_v16, %v7141_v5  ;;  %v7325_v17 = vrot.slane %v5099_v59, %v7141_v5  ;;  %v7327_v35 = vpop.trf.xlu1 }
  0xfd   : > { %v7329_v3 = vpop.trf.xlu0 }
 0x100   : > { %v7339_v59 = vpop.trf.xlu1 }
 0x101   : > { %v7341_v33 = vpop.trf.xlu0 }
 0x104   : > { %v7343_v16 = vpop.trf.xlu1 }
 0x105   : > { %v7345_v34 = vpop.trf.xlu0 }
 0x107   : > { %746 = vxpose.xlu1.b32.start [1/4] (short) (narrow) %v198_v4, 64  ;;  %v1358_v4 = vunpack.c.0.s8 %v1357_v44  ;;  %v11719_v44 = vcombine.low %v7224_v8, %v7218_v6 }
 0x108   : > { %v7349_v54 = vpop.trf.xlu1  ;;  %714 = vxpose.xlu0.b32.start [1/4] (short) (narrow) %v194_v49, 64  ;;  %v201_v49 = vld [vmem:[%s7060_s30 + $0x1f8] sm:$0xff] }
 0x109   : > { %v7351_v48 = vpop.trf.xlu0  ;;  %v7368_v52 = vsub.s32 %v1358_v4, %v7134_v2  ;;  %v11723_v4 = vcombine.low %v7246_v51, %v7240_v50 }
 0x10b   : > { %747 = vxpose.xlu1.b32.cont [2/4] (short) (narrow) %v199_v32, 64  ;;  %v7390_v2 = vrot.slane %v1370_v20, %v7368_v52  ;;  %v7408_v12 = vrot.slane %v1899_v37, %v7368_v52  ;;  %v7414_v14 = vrot.slane %v1914_v38, %v7368_v52  ;;  %v7420_v13 = vrot.slane %v1915_v39, %v7368_v52 }
 0x10c   : > { %v7355_v25 = vpop.trf.xlu1  ;;  %715 = vxpose.xlu0.b32.cont [2/4] (short) (narrow) %v195_v11, 64  ;;  %v11707_v20 = vcombine.low %v7194_v42, %v7188_v40  ;;  %v7436_v28 = vrot.slane %v11709_v26, %v7368_v52  ;;  %v7442_v29 = vrot.slane %v11711_v27, %v7368_v52  ;;  %v11715_v38 = vcombine.low %v7221_v7, %v7215_v1 }
 0x10d   : > { %v7357_v24 = vpop.trf.xlu0  ;;  %11701 = vst [vmem:[#allocation11_spill] sm:$0xff] %v7390_v2  ;;  %11704 = vst [vmem:[#allocation14_spill] sm:$0xff] %v7408_v12  ;;  %v11717_v40 = vcombine.high %v7221_v7, %v7215_v1  ;;  %v7466_v11 = vrot.slane %v11719_v44, %v7368_v52  ;;  %v11725_v1 = vcombine.high %v7246_v51, %v7240_v50 }
 0x10e   : > { %11705 = vst [vmem:[#allocation15_spill] sm:$0xff] %v7414_v14  ;;  %11706 = vst [vmem:[#allocation16_spill] sm:$0xff] %v7420_v13  ;;  %v7454_v39 = vrot.slane %v11715_v38, %v7368_v52  ;;  %v11731_v27 = vcombine.low %v7273_v10, %v7267_v46  ;;  %v11733_v50 = vcombine.high %v7273_v10, %v7267_v46  ;;  %v234_v13 = vld [vmem:[%s7060_s30 + $0x300] sm:$0xff] }
 0x10f   : > { %748 = vxpose.xlu1.b32.cont [3/4] (short) (narrow) %v200_v23, 64  ;;  %v7378_v23 = vrot.slane %v1354_v18, %v7368_v52  ;;  %v7402_v18 = vrot.slane %v1898_v36, %v7368_v52  ;;  %11710 = vst [vmem:[#allocation18_spill] sm:$0xff] %v7436_v28  ;;  %11712 = vst [vmem:[#allocation19_spill] sm:$0xff] %v7442_v29  ;;  %v11713_v36 = vcombine.high %v7197_v43, %v7191_v41  ;;  %v228_v29 = vld [vmem:[%s7060_s30 + $0x2d0] sm:$0xff] }
 0x110   : > { %v7361_v57 = vpop.trf.xlu1  ;;  %716 = vxpose.xlu0.b32.cont [3/4] (short) (narrow) %v196_v22, 64  ;;  %v7384_v22 = vrot.slane %v1355_v19, %v7368_v52  ;;  %11716 = vst [vmem:[#allocation21_spill] sm:$0xff] %v7454_v39  ;;  %v7460_v42 = vrot.slane %v11717_v40, %v7368_v52  ;;  %11720 = vst [vmem:[#allocation23_spill] sm:$0xff] %v7466_v11  ;;  %v11721_v41 = vcombine.high %v7224_v8, %v7218_v6 }
 0x111   : > { %v7363_v56 = vpop.trf.xlu0  ;;  %11699 = vst [vmem:[#allocation9_spill] sm:$0xff] %v7378_v23  ;;  %11703 = vst [vmem:[#allocation13_spill] sm:$0xff] %v7402_v18  ;;  %v7448_v37 = vrot.slane %v11713_v36, %v7368_v52  ;;  %v7484_v7 = vrot.slane %v11725_v1, %v7368_v52  ;;  %v11729_v6 = vcombine.high %v7249_v31, %v7243_v30 }
 0x112   : > { %11700 = vst [vmem:[#allocation10_spill] sm:$0xff] %v7384_v22  ;;  %11718 = vst [vmem:[#allocation22_spill] sm:$0xff] %v7460_v42  ;;  %v7472_v43 = vrot.slane %v11721_v41, %v7368_v52  ;;  %v7502_v36 = vrot.slane %v11731_v27, %v7368_v52  ;;  %v7508_v51 = vrot.slane %v11733_v50, %v7368_v52  ;;  %v210_v22 = vld [vmem:[%s7060_s30 + $0x240] sm:$0xff] }
 0x113   : > { %749 = vxpose.xlu1.b32.end [4/4] (short) (narrow) %v201_v49, 64  ;;  %11714 = vst [vmem:[#allocation20_spill] sm:$0xff] %v7448_v37  ;;  %v7478_v49 = vrot.slane %v11723_v4, %v7368_v52  ;;  %11726 = vst [vmem:[#allocation26_spill] sm:$0xff] %v7484_v7  ;;  %v7496_v8 = vrot.slane %v11729_v6, %v7368_v52  ;;  %v11735_v38 = vcombine.low %v7276_v47, %v7270_v9 }
 0x114   : > { %v7370_v45 = vpop.trf.xlu1  ;;  %717 = vxpose.xlu0.b32.end [4/4] (short) (narrow) %v197_v53, 64  ;;  %v7396_v53 = vrot.slane %v1371_v21, %v7368_v52  ;;  %v7430_v21 = vrot.slane %v11707_v20, %v7368_v52  ;;  %11722 = vst [vmem:[#allocation24_spill] sm:$0xff] %v7472_v43  ;;  %v11727_v20 = vcombine.low %v7249_v31, %v7243_v30  ;;  %11732 = vst [vmem:[#allocation29_spill] sm:$0xff] %v7502_v36 }
 0x115   : > { %v7372_v32 = vpop.trf.xlu0  ;;  %11724 = vst [vmem:[#allocation25_spill] sm:$0xff] %v7478_v49  ;;  %11730 = vst [vmem:[#allocation28_spill] sm:$0xff] %v7496_v8  ;;  %v7514_v40 = vrot.slane %v11735_v38, %v7368_v52  ;;  %v11737_v30 = vcombine.high %v7276_v47, %v7270_v9  ;;  %v11741_v9 = vcombine.high %v7298_v62, %v7292_v60 }
 0x116   : > { %11702 = vst [vmem:[#allocation12_spill] sm:$0xff] %v7396_v53  ;;  %11708 = vst [vmem:[#allocation17_spill] sm:$0xff] %v7430_v21  ;;  %v7490_v26 = vrot.slane %v11727_v20, %v7368_v52  ;;  %v11739_v20 = vcombine.low %v7298_v62, %v7292_v60 }
 0x117   : > { %11734 = vst [vmem:[#allocation30_spill] sm:$0xff] %v7508_v51  ;;  %11736 = vst [vmem:[#allocation31_spill] sm:$0xff] %v7514_v40  ;;  %v7520_v31 = vrot.slane %v11737_v30, %v7368_v52  ;;  %v7536_v47 = vrot.slane %v11741_v9, %v7368_v52 }
 0x118   : > { %v7422_v15 = vpop.trf.xlu1  ;;  %11728 = vst [vmem:[#allocation27_spill] sm:$0xff] %v7490_v26  ;;  %v7530_v6 = vrot.slane %v11739_v20, %v7368_v52 }
 0x119   : > { %v7424_v19 = vpop.trf.xlu0  ;;  %11738 = vst [vmem:[#allocation32_spill] sm:$0xff] %v7520_v31  ;;  %11742 = vst [vmem:[#allocation34_spill] sm:$0xff] %v7536_v47 }
 0x11a   : > { %11740 = vst [vmem:[#allocation33_spill] sm:$0xff] %v7530_v6 }
 0x11c   : > { %v506_v44 = vpop.trf.xlu1 }
 0x11d   : > { %v474_v41 = vpop.trf.xlu0  ;;  %v1338_v4 = vcombine.low %v7327_v35, %v506_v44  ;;  %v1339_v46 = vcombine.high %v7327_v35, %v506_v44  ;;  %v11743_v35 = vcombine.low %v7301_v63, %v7295_v61  ;;  %v11747_v44 = vcombine.low %v7322_v55, %v7316_v58 }
 0x11e   : > { %v1322_v10 = vcombine.low %v7329_v3, %v474_v41  ;;  %v1323_v1 = vcombine.high %v7329_v3, %v474_v41  ;;  %v11745_v3 = vcombine.high %v7301_v63, %v7295_v61  ;;  %v11749_v61 = vcombine.high %v7322_v55, %v7316_v58  ;;  %v206_v55 = vld [vmem:[%s7060_s30 + $0x220] sm:$0xff] }
 0x11f   : > { %v7542_v27 = vrot.slane %v11743_v35, %v7368_v52  ;;  %v1346_v38 = vrot.slane %v1338_v4, %v7141_v5  ;;  %v1353_v30 = vrot.slane %v1339_v46, %v7141_v5  ;;  %v7558_v41 = vrot.slane %v11747_v44, %v7368_v52 }
 0x120   : > { %v7548_v50 = vrot.slane %v11745_v3, %v7368_v52  ;;  %v1330_v60 = vrot.slane %v1322_v10, %v7141_v5  ;;  %v1337_v62 = vrot.slane %v1323_v1, %v7141_v5  ;;  %v7564_v63 = vrot.slane %v11749_v61, %v7368_v52  ;;  %v507_v20 = vpop.trf.xlu1 }
 0x121   : > { %11744 = vst [vmem:[#allocation35_spill] sm:$0xff] %v7542_v27  ;;  %11748 = vst [vmem:[#allocation37_spill] sm:$0xff] %v7558_v41  ;;  %v11751_v4 = vcombine.low %v7325_v17, %v7319_v0  ;;  %v11753_v10 = vcombine.high %v7325_v17, %v7319_v0  ;;  %v475_v9 = vpop.trf.xlu0  ;;  %v1882_v61 = vcombine.low %v7339_v59, %v507_v20  ;;  %v202_v27 = vld [vmem:[%s7060_s30 + $0x200] sm:$0xff] }
 0x122   : > { %11746 = vst [vmem:[#allocation36_spill] sm:$0xff] %v7548_v50  ;;  %11750 = vst [vmem:[#allocation38_spill] sm:$0xff] %v7564_v63  ;;  %v1386_v35 = vcombine.low %v1330_v60, %v1346_v38  ;;  %v1387_v3 = vcombine.high %v1330_v60, %v1346_v38  ;;  %v1402_v44 = vcombine.low %v1337_v62, %v1353_v30 }
 0x123   : > { %v7570_v46 = vrot.slane %v11751_v4, %v7368_v52  ;;  %v7576_v1 = vrot.slane %v11753_v10, %v7368_v52  ;;  %v1403_v58 = vcombine.high %v1337_v62, %v1353_v30  ;;  %v1883_v63 = vcombine.high %v7339_v59, %v507_v20 }
 0x124   : > { %v1866_v4 = vcombine.low %v7341_v33, %v475_v9  ;;  %v1867_v50 = vcombine.high %v7341_v33, %v475_v9  ;;  %v7585_v0 = vrot.slane %v1386_v35, %v7368_v52  ;;  %v7588_v17 = vrot.slane %v1387_v3, %v7368_v52  ;;  %v508_v10 = vpop.trf.xlu1  ;;  %810 = vxpose.xlu1.b32.start [1/4] (short) (narrow) %v206_v55, 64 }
 0x125   : > { %11752 = vst [vmem:[#allocation39_spill] sm:$0xff] %v7570_v46  ;;  %11754 = vst [vmem:[#allocation40_spill] sm:$0xff] %v7576_v1  ;;  %v7591_v38 = vrot.slane %v1402_v44, %v7368_v52  ;;  %v7594_v30 = vrot.slane %v1403_v58, %v7368_v52  ;;  %v1890_v59 = vrot.slane %v1882_v61, %v7141_v5  ;;  %v476_v20 = vpop.trf.xlu0  ;;  %778 = vxpose.xlu0.b32.start [1/4] (short) (narrow) %v202_v27, 64  ;;  %v207_v58 = vld [vmem:[%s7060_s30 + $0x228] sm:$0xff]  ;;  %v204_v46 = vld [vmem:[%s7060_s30 + $0x210] sm:$0xff] }
 0x126   : > { %11755 = vst [vmem:[#allocation41_spill] sm:$0xff] %v7585_v0  ;;  %11756 = vst [vmem:[#allocation42_spill] sm:$0xff] %v7588_v17  ;;  %v1897_v60 = vrot.slane %v1883_v63, %v7141_v5  ;;  %v1874_v33 = vrot.slane %v1866_v4, %v7141_v5  ;;  %v1881_v62 = vrot.slane %v1867_v50, %v7141_v5  ;;  %v203_v4 = vld [vmem:[%s7060_s30 + $0x208] sm:$0xff]  ;;  %v214_v17 = vld [vmem:[%s7060_s30 + $0x260] sm:$0xff] }
 0x127   : > { %11757 = vst [vmem:[#allocation43_spill] sm:$0xff] %v7591_v38  ;;  %11758 = vst [vmem:[#allocation44_spill] sm:$0xff] %v7594_v30  ;;  %v2426_v9 = vcombine.low %v7343_v16, %v508_v10  ;;  %v2427_v35 = vcombine.high %v7343_v16, %v508_v10  ;;  %v2410_v3 = vcombine.low %v7345_v34, %v476_v20  ;;  %v236_v0 = vld [vmem:[%s7060_s30 + $0x310] sm:$0xff] }
 0x128   : > { %v2411_v44 = vcombine.high %v7345_v34, %v476_v20  ;;  %v1930_v61 = vcombine.low %v1874_v33, %v1890_v59  ;;  %v1931_v63 = vcombine.high %v1874_v33, %v1890_v59  ;;  %v1946_v1 = vcombine.low %v1881_v62, %v1897_v60  ;;  %811 = vxpose.xlu1.b32.cont [2/4] (short) (narrow) %v207_v58, 64 }
 0x129   : > { %v1947_v47 = vcombine.high %v1881_v62, %v1897_v60  ;;  %v2434_v50 = vrot.slane %v2426_v9, %v7141_v5  ;;  %v2441_v55 = vrot.slane %v2427_v35, %v7141_v5  ;;  %v2418_v6 = vrot.slane %v2410_v3, %v7141_v5  ;;  %v509_v60 = vpop.trf.xlu1  ;;  %v477_v33 = vpop.trf.xlu0  ;;  %779 = vxpose.xlu0.b32.cont [2/4] (short) (narrow) %v203_v4, 64  ;;  %v208_v3 = vld [vmem:[%s7060_s30 + $0x230] sm:$0xff] }
 0x12a   : > { %v2425_v16 = vrot.slane %v2411_v44, %v7141_v5  ;;  %v7611_v10 = vrot.slane %v1930_v61, %v7368_v52  ;;  %v7614_v34 = vrot.slane %v1931_v63, %v7368_v52  ;;  %v7617_v27 = vrot.slane %v1946_v1, %v7368_v52 }
 0x12b   : > { %v7620_v59 = vrot.slane %v1947_v47, %v7368_v52  ;;  %v2474_v62 = vcombine.low %v2418_v6, %v2434_v50  ;;  %v2475_v20 = vcombine.high %v2418_v6, %v2434_v50  ;;  %v2970_v44 = vcombine.low %v7349_v54, %v509_v60 }
 0x12c   : > { %11759 = vst [vmem:[#allocation45_spill] sm:$0xff] %v7611_v10  ;;  %11760 = vst [vmem:[#allocation46_spill] sm:$0xff] %v7614_v34  ;;  %v2490_v9 = vcombine.low %v2425_v16, %v2441_v55  ;;  %v2491_v35 = vcombine.high %v2425_v16, %v2441_v55  ;;  %v2971_v61 = vcombine.high %v7349_v54, %v509_v60  ;;  %812 = vxpose.xlu1.b32.cont [3/4] (short) (narrow) %v208_v3, 64 }
 0x12d   : > { %11761 = vst [vmem:[#allocation47_spill] sm:$0xff] %v7617_v27  ;;  %11762 = vst [vmem:[#allocation48_spill] sm:$0xff] %v7620_v59  ;;  %v2954_v63 = vcombine.low %v7351_v48, %v477_v33  ;;  %v2955_v1 = vcombine.high %v7351_v48, %v477_v33  ;;  %v7629_v47 = vrot.slane %v2474_v62, %v7368_v52  ;;  %v510_v16 = vpop.trf.xlu1  ;;  %v478_v60 = vpop.trf.xlu0  ;;  %780 = vxpose.xlu0.b32.cont [3/4] (short) (narrow) %v204_v46, 64 }
 0x12e   : > { %v7632_v58 = vrot.slane %v2475_v20, %v7368_v52  ;;  %v7635_v6 = vrot.slane %v2490_v9, %v7368_v52  ;;  %v7638_v4 = vrot.slane %v2491_v35, %v7368_v52  ;;  %v2978_v54 = vrot.slane %v2970_v44, %v7141_v5  ;;  %v209_v35 = vld [vmem:[%s7060_s30 + $0x238] sm:$0xff] }
 0x12f   : > { %11763 = vst [vmem:[#allocation49_spill] sm:$0xff] %v7629_v47  ;;  %v2985_v50 = vrot.slane %v2971_v61, %v7141_v5  ;;  %v2962_v48 = vrot.slane %v2954_v63, %v7141_v5  ;;  %v2969_v55 = vrot.slane %v2955_v1, %v7141_v5  ;;  %v3514_v33 = vcombine.low %v7355_v25, %v510_v16  ;;  %v205_v63 = vld [vmem:[%s7060_s30 + $0x218] sm:$0xff] }
 0x130   : > { %11764 = vst [vmem:[#allocation50_spill] sm:$0xff] %v7632_v58  ;;  %11765 = vst [vmem:[#allocation51_spill] sm:$0xff] %v7635_v6  ;;  %v3515_v62 = vcombine.high %v7355_v25, %v510_v16  ;;  %v3498_v20 = vcombine.low %v7357_v24, %v478_v60  ;;  %v3499_v9 = vcombine.high %v7357_v24, %v478_v60  ;;  %813 = vxpose.xlu1.b32.end [4/4] (short) (narrow) %v209_v35, 64  ;;  %v232_v6 = vld [vmem:[%s7060_s30 + $0x2f0] sm:$0xff]  ;;  %v229_v58 = vld [vmem:[%s7060_s30 + $0x2d8] sm:$0xff] }
 0x131   : > { %11766 = vst [vmem:[#allocation52_spill] sm:$0xff] %v7638_v4  ;;  %v3018_v44 = vcombine.low %v2962_v48, %v2978_v54  ;;  %v3019_v61 = vcombine.high %v2962_v48, %v2978_v54  ;;  %v3034_v41 = vcombine.low %v2969_v55, %v2985_v50  ;;  %v3035_v31 = vcombine.high %v2969_v55, %v2985_v50  ;;  %v511_v50 = vpop.trf.xlu1  ;;  %v479_v48 = vpop.trf.xlu0 }
 0x132   : > { %v3522_v1 = vrot.slane %v3514_v33, %v7141_v5  ;;  %v3529_v40 = vrot.slane %v3515_v62, %v7141_v5  ;;  %v3506_v3 = vrot.slane %v3498_v20, %v7141_v5  ;;  %v3513_v51 = vrot.slane %v3499_v9, %v7141_v5  ;;  %781 = vxpose.xlu0.b32.end [4/4] (short) (narrow) %v205_v63, 64 }
 0x133   : > { %v7655_v25 = vrot.slane %v3018_v44, %v7368_v52  ;;  %v7658_v24 = vrot.slane %v3019_v61, %v7368_v52  ;;  %v7661_v46 = vrot.slane %v3034_v41, %v7368_v52  ;;  %v7664_v54 = vrot.slane %v3035_v31, %v7368_v52 }
 0x134   : > { %v3562_v55 = vcombine.low %v3506_v3, %v3522_v1  ;;  %v3563_v16 = vcombine.high %v3506_v3, %v3522_v1  ;;  %v3578_v60 = vcombine.low %v3513_v51, %v3529_v40  ;;  %v3579_v33 = vcombine.high %v3513_v51, %v3529_v40 }
 0x135   : > { %11767 = vst [vmem:[#allocation53_spill] sm:$0xff] %v7655_v25  ;;  %11768 = vst [vmem:[#allocation54_spill] sm:$0xff] %v7658_v24  ;;  %v4058_v62 = vcombine.low %v7361_v57, %v511_v50  ;;  %v4059_v20 = vcombine.high %v7361_v57, %v511_v50  ;;  %v4042_v9 = vcombine.low %v7363_v56, %v479_v48  ;;  %v512_v63 = vpop.trf.xlu1  ;;  %v480_v1 = vpop.trf.xlu0 }
 0x136   : > { %11769 = vst [vmem:[#allocation55_spill] sm:$0xff] %v7661_v46  ;;  %11770 = vst [vmem:[#allocation56_spill] sm:$0xff] %v7664_v54  ;;  %v4043_v41 = vcombine.high %v7363_v56, %v479_v48  ;;  %v7671_v44 = vrot.slane %v3562_v55, %v7368_v52  ;;  %v7674_v31 = vrot.slane %v3563_v16, %v7368_v52 }
 0x137   : > { %v7677_v35 = vrot.slane %v3578_v60, %v7368_v52  ;;  %v7680_v51 = vrot.slane %v3579_v33, %v7368_v52  ;;  %v4066_v40 = vrot.slane %v4058_v62, %v7141_v5  ;;  %v4073_v57 = vrot.slane %v4059_v20, %v7141_v5 }
 0x138   : > { %11771 = vst [vmem:[#allocation57_spill] sm:$0xff] %v7671_v44  ;;  %11772 = vst [vmem:[#allocation58_spill] sm:$0xff] %v7674_v31  ;;  %v4050_v61 = vrot.slane %v4042_v9, %v7141_v5  ;;  %v4057_v56 = vrot.slane %v4043_v41, %v7141_v5  ;;  %v4602_v3 = vcombine.low %v7370_v45, %v512_v63  ;;  %v213_v44 = vld [vmem:[%s7060_s30 + $0x258] sm:$0xff] }
 0x139   : > { %11773 = vst [vmem:[#allocation59_spill] sm:$0xff] %v7677_v35  ;;  %11774 = vst [vmem:[#allocation60_spill] sm:$0xff] %v7680_v51  ;;  %v4603_v50 = vcombine.high %v7370_v45, %v512_v63  ;;  %v4586_v48 = vcombine.low %v7372_v32, %v480_v1  ;;  %v4587_v55 = vcombine.high %v7372_v32, %v480_v1 }
 0x13a   : > { %v4106_v16 = vcombine.low %v4050_v61, %v4066_v40  ;;  %v4107_v60 = vcombine.high %v4050_v61, %v4066_v40  ;;  %v4122_v33 = vcombine.low %v4057_v56, %v4073_v57  ;;  %v4123_v62 = vcombine.high %v4057_v56, %v4073_v57  ;;  %v513_v61 = vpop.trf.xlu1  ;;  %v481_v56 = vpop.trf.xlu0 }
 0x13b   : > { %v7691_v20 = vrot.slane %v4602_v3, %v7141_v5  ;;  %v7694_v9 = vrot.slane %v4603_v50, %v7141_v5  ;;  %v7697_v41 = vrot.slane %v4586_v48, %v7141_v5  ;;  %v7700_v36 = vrot.slane %v4587_v55, %v7141_v5 }
 0x13c   : > { %v7703_v45 = vrot.slane %v4106_v16, %v7368_v52  ;;  %v7706_v32 = vrot.slane %v4107_v60, %v7368_v52  ;;  %v7709_v40 = vrot.slane %v4122_v33, %v7368_v52  ;;  %v7712_v57 = vrot.slane %v4123_v62, %v7368_v52 }
 0x13d   : > { %v5146_v48 = vcombine.low %v7422_v15, %v513_v61  ;;  %v5147_v55 = vcombine.high %v7422_v15, %v513_v61  ;;  %v5130_v16 = vcombine.low %v7424_v19, %v481_v56  ;;  %v5131_v60 = vcombine.high %v7424_v19, %v481_v56 }
 0x13e   : > { %11775 = vst [vmem:[#allocation61_spill] sm:$0xff] %v7703_v45  ;;  %11776 = vst [vmem:[#allocation62_spill] sm:$0xff] %v7706_v32  ;;  %v7738_v33 = vpop.trf.xlu1  ;;  %v7740_v1 = vpop.trf.xlu0  ;;  %v11789_v51 = vcombine.high %v7697_v41, %v7691_v20 }
 0x13f   : > { %11777 = vst [vmem:[#allocation63_spill] sm:$0xff] %v7709_v40  ;;  %11778 = vst [vmem:[#allocation64_spill] sm:$0xff] %v7712_v57  ;;  %v5154_v15 = vrot.slane %v5146_v48, %v7141_v5  ;;  %v5161_v61 = vrot.slane %v5147_v55, %v7141_v5  ;;  %v5138_v19 = vrot.slane %v5130_v16, %v7141_v5 }
 0x140   : > { %v5145_v56 = vrot.slane %v5131_v60, %v7141_v5  ;;  %v211_v5 = vld [vmem:[%s7060_s30 + $0x248] sm:$0xff] }
 0x141   : > { %v5194_v55 = vcombine.low %v5138_v19, %v5154_v15  ;;  %v5195_v16 = vcombine.high %v5138_v19, %v5154_v15  ;;  %874 = vxpose.xlu1.b32.start [1/4] (short) (narrow) %v214_v17, 64  ;;  %v212_v17 = vld [vmem:[%s7060_s30 + $0x250] sm:$0xff] }
 0x142   : > { %v5210_v63 = vcombine.low %v5145_v56, %v5161_v61  ;;  %v5211_v60 = vcombine.high %v5145_v56, %v5161_v61  ;;  %v7772_v56 = vpop.trf.xlu1  ;;  %v7774_v3 = vpop.trf.xlu0 }
 0x143   : > { %v7761_v48 = vrot.slane %v5194_v55, %v7368_v52  ;;  %v7764_v15 = vrot.slane %v5195_v16, %v7368_v52  ;;  %842 = vxpose.xlu0.b32.start [1/4] (short) (narrow) %v210_v22, 64  ;;  %v216_v16 = vld [vmem:[%s7060_s30 + $0x270] sm:$0xff]  ;;  %v7862_v55 = vrot.slane %v11789_v51, %v7368_v52  ;;  %v11791_v22 = vcombine.low %v7700_v36, %v7694_v9 }
 0x144   : > { %v7767_v61 = vrot.slane %v5210_v63, %v7368_v52  ;;  %v7770_v19 = vrot.slane %v5211_v60, %v7368_v52  ;;  %v215_v60 = vld [vmem:[%s7060_s30 + $0x268] sm:$0xff] }
 0x145   : > { %11779 = vst [vmem:[#allocation65_spill] sm:$0xff] %v7761_v48  ;;  %11780 = vst [vmem:[#allocation66_spill] sm:$0xff] %v7764_v15  ;;  %875 = vxpose.xlu1.b32.cont [2/4] (short) (narrow) %v215_v60, 64  ;;  %v11787_v60 = vcombine.low %v7697_v41, %v7691_v20  ;;  %v11794_v20 = vcombine.high %v7700_v36, %v7694_v9  ;;  %v218_v15 = vld [vmem:[%s7060_s30 + $0x280] sm:$0xff] }
 0x146   : > { %11781 = vst [vmem:[#allocation67_spill] sm:$0xff] %v7767_v61  ;;  %11782 = vst [vmem:[#allocation68_spill] sm:$0xff] %v7770_v19  ;;  %v7802_v63 = vpop.trf.xlu1  ;;  %v7804_v50 = vpop.trf.xlu0  ;;  %v11803_v61 = vld [vmem:[#allocation8_spill] sm:$0xff] }
 0x147   : > { %843 = vxpose.xlu0.b32.cont [2/4] (short) (narrow) %v211_v5, 64  ;;  %v7856_v32 = vrot.slane %v11787_v60, %v7368_v52  ;;  %11790 = vst [vmem:[#allocation70_spill] sm:$0xff] %v7862_v55  ;;  %v217_v5 = vld [vmem:[%s7060_s30 + $0x278] sm:$0xff]  ;;  %v7879_v51 = vrot.slane %v11794_v20, %v7368_v52  ;;  %v219_v55 = vld [vmem:[%s7060_s30 + $0x288] sm:$0xff] }
 0x149   : > { %876 = vxpose.xlu1.b32.cont [3/4] (short) (narrow) %v216_v16, 64  ;;  %11788 = vst [vmem:[#allocation69_spill] sm:$0xff] %v7856_v32  ;;  %v7870_v16 = vrot.slane %v11791_v22, %v7368_v52  ;;  %11795 = vst [vmem:[#allocation72_spill] sm:$0xff] %v7879_v51  ;;  %v220_v32 = vld [vmem:[%s7060_s30 + $0x290] sm:$0xff]  ;;  %v221_v22 = vld [vmem:[%s7060_s30 + $0x298] sm:$0xff] }
 0x14a   : > { %v7840_v7 = vpop.trf.xlu1  ;;  %v7842_v62 = vpop.trf.xlu0 }
 0x14b   : > { %11792 = vst [vmem:[#allocation71_spill] sm:$0xff] %v7870_v16  ;;  %844 = vxpose.xlu0.b32.cont [3/4] (short) (narrow) %v212_v17, 64 }
 0x14d   : > { %877 = vxpose.xlu1.b32.end [4/4] (short) (narrow) %v217_v5, 64  ;;  %v222_v5 = vld [vmem:[%s7060_s30 + $0x2a0] sm:$0xff] }
 0x14e   : > { %v7894_v20 = vpop.trf.xlu1  ;;  %v7896_v43 = vpop.trf.xlu0 }
 0x14f   : > { %845 = vxpose.xlu0.b32.end [4/4] (short) (narrow) %v213_v44, 64 }
 0x152   : > { %v7922_v9 = vpop.trf.xlu1  ;;  %v7924_v31 = vpop.trf.xlu0 }
 0x156   : > { %v7926_v19 = vpop.trf.xlu1  ;;  %v7928_v26 = vpop.trf.xlu0 }
 0x15a   : > { %v7930_v44 = vpop.trf.xlu1  ;;  %v7932_v46 = vpop.trf.xlu0 }
 0x15e   : > { %v634_v17 = vpop.trf.xlu1  ;;  %v602_v54 = vpop.trf.xlu0  ;;  %938 = vxpose.xlu1.b32.start [1/4] (short) (narrow) %v222_v5, 64 }
 0x15f   : > { %v1442_v57 = vcombine.low %v7738_v33, %v634_v17  ;;  %v1443_v35 = vcombine.high %v7738_v33, %v634_v17  ;;  %v1426_v51 = vcombine.low %v7740_v1, %v602_v54  ;;  %v1427_v8 = vcombine.high %v7740_v1, %v602_v54  ;;  %v223_v33 = vld [vmem:[%s7060_s30 + $0x2a8] sm:$0xff]  ;;  %v224_v54 = vld [vmem:[%s7060_s30 + $0x2b0] sm:$0xff] }
 0x160   : > { %906 = vxpose.xlu0.b32.start [1/4] (short) (narrow) %v218_v15, 64 }
 0x161   : > { %v7941_v41 = vrot.slane %v1442_v57, %v11803_v61  ;;  %v7944_v16 = vrot.slane %v1443_v35, %v11803_v61  ;;  %v7947_v36 = vrot.slane %v1426_v51, %v11803_v61  ;;  %v7950_v48 = vrot.slane %v1427_v8, %v11803_v61 }
 0x162   : > { %v635_v17 = vpop.trf.xlu1  ;;  %v603_v60 = vpop.trf.xlu0  ;;  %939 = vxpose.xlu1.b32.cont [2/4] (short) (narrow) %v223_v33, 64 }
 0x163   : > { %v1986_v1 = vcombine.low %v7772_v56, %v635_v17  ;;  %v1987_v15 = vcombine.high %v7772_v56, %v635_v17  ;;  %v1970_v51 = vcombine.low %v7774_v3, %v603_v60  ;;  %v1971_v5 = vcombine.high %v7774_v3, %v603_v60 }
 0x164   : > { %907 = vxpose.xlu0.b32.cont [2/4] (short) (narrow) %v219_v55, 64  ;;  %v11808_v34 = vcombine.low %v7950_v48, %v7944_v16  ;;  %v11810_v10 = vcombine.high %v7950_v48, %v7944_v16 }
 0x165   : > { %v7968_v57 = vrot.slane %v1986_v1, %v11803_v61  ;;  %v7971_v49 = vrot.slane %v1987_v15, %v11803_v61  ;;  %v7974_v35 = vrot.slane %v1970_v51, %v11803_v61  ;;  %v7977_v8 = vrot.slane %v1971_v5, %v11803_v61  ;;  %v225_v15 = vld [vmem:[%s7060_s30 + $0x2b8] sm:$0xff] }
 0x166   : > { %v636_v56 = vpop.trf.xlu1  ;;  %v604_v17 = vpop.trf.xlu0  ;;  %940 = vxpose.xlu1.b32.cont [3/4] (short) (narrow) %v224_v54, 64  ;;  %v8188_v12 = vrot.slane %v11808_v34, %v7368_v52  ;;  %v8194_v18 = vrot.slane %v11810_v10, %v7368_v52 }
 0x167   : > { %v2530_v3 = vcombine.low %v7802_v63, %v636_v56  ;;  %v2531_v55 = vcombine.high %v7802_v63, %v636_v56  ;;  %v2514_v60 = vcombine.low %v7804_v50, %v604_v17  ;;  %v2515_v33 = vcombine.high %v7804_v50, %v604_v17 }
 0x168   : > { %908 = vxpose.xlu0.b32.cont [3/4] (short) (narrow) %v220_v32, 64  ;;  %11809 = vst [vmem:[#allocation74_spill] sm:$0xff] %v8188_v12  ;;  %11811 = vst [vmem:[#allocation75_spill] sm:$0xff] %v8194_v18  ;;  %v11816_v34 = vcombine.low %v7977_v8, %v7971_v49  ;;  %v11818_v10 = vcombine.high %v7977_v8, %v7971_v49 }
 0x169   : > { %v7993_v63 = vrot.slane %v2530_v3, %v11803_v61  ;;  %v7996_v56 = vrot.slane %v2531_v55, %v11803_v61  ;;  %v7999_v50 = vrot.slane %v2514_v60, %v11803_v61  ;;  %v8002_v17 = vrot.slane %v2515_v33, %v11803_v61 }
 0x16a   : > { %v637_v1 = vpop.trf.xlu1  ;;  %v605_v51 = vpop.trf.xlu0  ;;  %941 = vxpose.xlu1.b32.end [4/4] (short) (narrow) %v225_v15, 64  ;;  %v8212_v48 = vrot.slane %v11816_v34, %v7368_v52  ;;  %v8218_v16 = vrot.slane %v11818_v10, %v7368_v52 }
 0x16b   : > { %v3074_v33 = vcombine.low %v7840_v7, %v637_v1  ;;  %v3075_v32 = vcombine.high %v7840_v7, %v637_v1  ;;  %v3058_v5 = vcombine.low %v7842_v62, %v605_v51  ;;  %v3059_v40 = vcombine.high %v7842_v62, %v605_v51 }
 0x16c   : > { %909 = vxpose.xlu0.b32.end [4/4] (short) (narrow) %v221_v22, 64  ;;  %11817 = vst [vmem:[#allocation78_spill] sm:$0xff] %v8212_v48  ;;  %11819 = vst [vmem:[#allocation79_spill] sm:$0xff] %v8218_v16  ;;  %v11824_v49 = vcombine.low %v8002_v17, %v7996_v56 }
 0x16d   : > { %v8019_v54 = vrot.slane %v3074_v33, %v11803_v61  ;;  %v8022_v3 = vrot.slane %v3075_v32, %v11803_v61  ;;  %v8025_v55 = vrot.slane %v3058_v5, %v11803_v61  ;;  %v8028_v60 = vrot.slane %v3059_v40, %v11803_v61 }
 0x16e   : > { %v638_v24 = vpop.trf.xlu1  ;;  %v606_v7 = vpop.trf.xlu0  ;;  %v8240_v8 = vrot.slane %v11824_v49, %v7368_v52 }
 0x16f   : > { %v3618_v1 = vcombine.low %v7894_v20, %v638_v24  ;;  %v3619_v62 = vcombine.high %v7894_v20, %v638_v24  ;;  %v3602_v22 = vcombine.low %v7896_v43, %v606_v7  ;;  %v3603_v15 = vcombine.high %v7896_v43, %v606_v7 }
 0x170   : > { %11825 = vst [vmem:[#allocation82_spill] sm:$0xff] %v8240_v8 }
 0x171   : > { %v8043_v32 = vrot.slane %v3618_v1, %v11803_v61  ;;  %v8046_v24 = vrot.slane %v3619_v62, %v11803_v61  ;;  %v8049_v43 = vrot.slane %v3602_v22, %v11803_v61  ;;  %v8052_v20 = vrot.slane %v3603_v15, %v11803_v61 }
 0x172   : > { %v639_v7 = vpop.trf.xlu1  ;;  %v607_v5 = vpop.trf.xlu0 }
 0x173   : > { %v4162_v22 = vcombine.low %v7922_v9, %v639_v7  ;;  %v4163_v51 = vcombine.high %v7922_v9, %v639_v7  ;;  %v4146_v15 = vcombine.low %v7924_v31, %v607_v5  ;;  %v4147_v45 = vcombine.high %v7924_v31, %v607_v5 }
 0x174   : > { %v11836_v53 = vcombine.low %v8049_v43, %v8043_v32 }
 0x175   : > { %v8067_v42 = vrot.slane %v4162_v22, %v11803_v61  ;;  %v8070_v40 = vrot.slane %v4163_v51, %v11803_v61  ;;  %v8073_v33 = vrot.slane %v4146_v15, %v11803_v61  ;;  %v8076_v1 = vrot.slane %v4147_v45, %v11803_v61  ;;  %v230_v51 = vld [vmem:[%s7060_s30 + $0x2e0] sm:$0xff] }
 0x176   : > { %v640_v62 = vpop.trf.xlu1  ;;  %v608_v11 = vpop.trf.xlu0 }
 0x177   : > { %v4706_v9 = vcombine.low %v7926_v19, %v640_v62  ;;  %v4707_v7 = vcombine.high %v7926_v19, %v640_v62  ;;  %v4690_v31 = vcombine.low %v7928_v26, %v608_v11  ;;  %v4691_v5 = vcombine.high %v7928_v26, %v608_v11 }
 0x179   : > { %v8091_v25 = vrot.slane %v4706_v9, %v11803_v61  ;;  %v8094_v19 = vrot.slane %v4707_v7, %v11803_v61  ;;  %v8097_v11 = vrot.slane %v4690_v31, %v11803_v61  ;;  %v8100_v26 = vrot.slane %v4691_v5, %v11803_v61  ;;  %v226_v31 = vld [vmem:[%s7060_s30 + $0x2c0] sm:$0xff] }
 0x17a   : > { %v641_v62 = vpop.trf.xlu1  ;;  %v609_v22 = vpop.trf.xlu0 }
 0x17b   : > { %v5250_v5 = vcombine.low %v7930_v44, %v641_v62  ;;  %v5251_v39 = vcombine.high %v7930_v44, %v641_v62  ;;  %v5234_v4 = vcombine.low %v7932_v46, %v609_v22  ;;  %v5235_v45 = vcombine.high %v7932_v46, %v609_v22  ;;  %1002 = vxpose.xlu1.b32.start [1/4] (short) (narrow) %v230_v51, 64  ;;  %v231_v46 = vld [vmem:[%s7060_s30 + $0x2e8] sm:$0xff]  ;;  %v233_v22 = vld [vmem:[%s7060_s30 + $0x2f8] sm:$0xff] }
 0x17c   : > { %v227_v51 = vld [vmem:[%s7060_s30 + $0x2c8] sm:$0xff] }
 0x17d   : > { %v8117_v15 = vrot.slane %v5250_v5, %v11803_v61  ;;  %v8120_v37 = vrot.slane %v5251_v39, %v11803_v61  ;;  %v8123_v9 = vrot.slane %v5234_v4, %v11803_v61  ;;  %v8126_v7 = vrot.slane %v5235_v45, %v11803_v61  ;;  %970 = vxpose.xlu0.b32.start [1/4] (short) (narrow) %v226_v31, 64 }
 0x17e   : > { %v8128_v44 = vpop.trf.xlu1  ;;  %v8130_v62 = vpop.trf.xlu0 }
 0x17f   : > { %1003 = vxpose.xlu1.b32.cont [2/4] (short) (narrow) %v231_v46, 64 }
 0x181   : > { %971 = vxpose.xlu0.b32.cont [2/4] (short) (narrow) %v227_v51, 64 }
 0x182   : > { %v8142_v5 = vpop.trf.xlu1  ;;  %v8144_v31 = vpop.trf.xlu0 }
 0x183   : > { %1004 = vxpose.xlu1.b32.cont [3/4] (short) (narrow) %v232_v6, 64 }
 0x185   : > { %972 = vxpose.xlu0.b32.cont [3/4] (short) (narrow) %v228_v29, 64  ;;  %v238_v29 = vld [vmem:[%s7060_s30 + $0x320] sm:$0xff] }
 0x186   : > { %v8148_v39 = vpop.trf.xlu1  ;;  %v8150_v4 = vpop.trf.xlu0 }
 0x187   : > { %1005 = vxpose.xlu1.b32.end [4/4] (short) (narrow) %v233_v22, 64  ;;  %v11804_v22 = vcombine.low %v7947_v36, %v7941_v41 }
 0x189   : > { %973 = vxpose.xlu0.b32.end [4/4] (short) (narrow) %v229_v58, 64  ;;  %v8176_v27 = vrot.slane %v11804_v22, %v7368_v52  ;;  %v11806_v58 = vcombine.high %v7947_v36, %v7941_v41  ;;  %v11812_v22 = vcombine.low %v7974_v35, %v7968_v57  ;;  %v11814_v36 = vcombine.high %v7974_v35, %v7968_v57 }
 0x18a   : > { %v8154_v45 = vpop.trf.xlu1  ;;  %v8156_v46 = vpop.trf.xlu0  ;;  %v11820_v57 = vcombine.low %v7999_v50, %v7993_v63 }
 0x18b   : > { %11805 = vst [vmem:[#allocation8_spill] sm:$0xff] %v8176_v27  ;;  %v8182_v14 = vrot.slane %v11806_v58, %v7368_v52  ;;  %v8200_v41 = vrot.slane %v11812_v22, %v7368_v52  ;;  %v8206_v58 = vrot.slane %v11814_v36, %v7368_v52  ;;  %v11822_v36 = vcombine.high %v7999_v50, %v7993_v63 }
 0x18c   : > { %v8228_v35 = vrot.slane %v11820_v57, %v7368_v52  ;;  %v239_v57 = vld [vmem:[%s7060_s30 + $0x328] sm:$0xff]  ;;  %v11828_v63 = vcombine.low %v8025_v55, %v8019_v54 }
 0x18d   : > { %11807 = vst [vmem:[#allocation73_spill] sm:$0xff] %v8182_v14  ;;  %11813 = vst [vmem:[#allocation76_spill] sm:$0xff] %v8200_v41  ;;  %v8234_v34 = vrot.slane %v11822_v36, %v7368_v52  ;;  %v11830_v36 = vcombine.high %v8025_v55, %v8019_v54  ;;  %v8278_v54 = vrot.slane %v11836_v53, %v7368_v52  ;;  %v245_v14 = vld [vmem:[%s7060_s30 + $0x358] sm:$0xff] }
 0x18e   : > { %v8158_v28 = vpop.trf.xlu1  ;;  %v8160_v51 = vpop.trf.xlu0  ;;  %11815 = vst [vmem:[#allocation77_spill] sm:$0xff] %v8206_v58  ;;  %11821 = vst [vmem:[#allocation80_spill] sm:$0xff] %v8228_v35  ;;  %v8253_v50 = vrot.slane %v11828_v63, %v7368_v52  ;;  %v235_v63 = vld [vmem:[%s7060_s30 + $0x308] sm:$0xff]  ;;  %v11838_v55 = vcombine.high %v8049_v43, %v8043_v32  ;;  %v11844_v32 = vcombine.low %v8073_v33, %v8067_v42 }
 0x18f   : > { %11823 = vst [vmem:[#allocation81_spill] sm:$0xff] %v8234_v34  ;;  %v8259_v49 = vrot.slane %v11830_v36, %v7368_v52  ;;  %11837 = vst [vmem:[#allocation88_spill] sm:$0xff] %v8278_v54 }
 0x190   : > { %11829 = vst [vmem:[#allocation84_spill] sm:$0xff] %v8253_v50  ;;  %v8284_v36 = vrot.slane %v11838_v55, %v7368_v52  ;;  %v8302_v43 = vrot.slane %v11844_v32, %v7368_v52 }
 0x191   : > { %11831 = vst [vmem:[#allocation85_spill] sm:$0xff] %v8259_v49 }
 0x192   : > { %v8162_v6 = vpop.trf.xlu1  ;;  %v8164_v47 = vpop.trf.xlu0  ;;  %11839 = vst [vmem:[#allocation89_spill] sm:$0xff] %v8284_v36  ;;  %11845 = vst [vmem:[#allocation92_spill] sm:$0xff] %v8302_v43 }
 0x196   : > { %v8166_v21 = vpop.trf.xlu1  ;;  %v8168_v59 = vpop.trf.xlu0 }
 0x198   : > { %1066 = vxpose.xlu1.b32.start [1/4] (short) (narrow) %v238_v29, 64  ;;  %v11826_v29 = vcombine.high %v8002_v17, %v7996_v56  ;;  %v11832_v56 = vcombine.low %v8028_v60, %v8022_v3 }
 0x19a   : > { %v8220_v22 = vpop.trf.xlu1  ;;  %v8222_v30 = vpop.trf.xlu0  ;;  %v8246_v10 = vrot.slane %v11826_v29, %v7368_v52  ;;  %1034 = vxpose.xlu0.b32.start [1/4] (short) (narrow) %v234_v13, 64  ;;  %v8265_v17 = vrot.slane %v11832_v56, %v7368_v52  ;;  %v11834_v13 = vcombine.high %v8028_v60, %v8022_v3  ;;  %v11840_v3 = vcombine.low %v8052_v20, %v8046_v24 }
 0x19b   : > { %v11842_v56 = vcombine.high %v8052_v20, %v8046_v24  ;;  %v11850_v24 = vcombine.high %v8076_v1, %v8070_v40 }
 0x19c   : > { %11827 = vst [vmem:[#allocation83_spill] sm:$0xff] %v8246_v10  ;;  %11833 = vst [vmem:[#allocation86_spill] sm:$0xff] %v8265_v17  ;;  %v8271_v29 = vrot.slane %v11834_v13, %v7368_v52  ;;  %v8290_v60 = vrot.slane %v11840_v3, %v7368_v52  ;;  %v11846_v13 = vcombine.high %v8073_v33, %v8067_v42  ;;  %1067 = vxpose.xlu1.b32.cont [2/4] (short) (narrow) %v239_v57, 64  ;;  %v260_v10 = vld [vmem:[%s7060_s30 + $0x3d0] sm:$0xff] }
 0x19d   : > { %v8296_v53 = vrot.slane %v11842_v56, %v7368_v52  ;;  %v11848_v3 = vcombine.low %v8076_v1, %v8070_v40  ;;  %v8320_v20 = vrot.slane %v11850_v24, %v7368_v52  ;;  %v11852_v40 = vcombine.low %v8097_v11, %v8091_v25 }
 0x19e   : > { %11835 = vst [vmem:[#allocation87_spill] sm:$0xff] %v8271_v29  ;;  %11841 = vst [vmem:[#allocation90_spill] sm:$0xff] %v8290_v60  ;;  %v8308_v55 = vrot.slane %v11846_v13, %v7368_v52  ;;  %v762_v56 = vpop.trf.xlu1  ;;  %v730_v32 = vpop.trf.xlu0  ;;  %1035 = vxpose.xlu0.b32.cont [2/4] (short) (narrow) %v235_v63, 64  ;;  %v11854_v57 = vcombine.high %v8097_v11, %v8091_v25  ;;  %v11858_v63 = vcombine.high %v8100_v26, %v8094_v19 }
 0x19f   : > { %11843 = vst [vmem:[#allocation91_spill] sm:$0xff] %v8296_v53  ;;  %v8314_v38 = vrot.slane %v11848_v3, %v7368_v52  ;;  %11851 = vst [vmem:[#allocation95_spill] sm:$0xff] %v8320_v20  ;;  %v1474_v2 = vcombine.low %v8128_v44, %v762_v56  ;;  %v1475_v42 = vcombine.high %v8128_v44, %v762_v56  ;;  %v240_v3 = vld [vmem:[%s7060_s30 + $0x330] sm:$0xff] }
 0x1a0   : > { %11847 = vst [vmem:[#allocation93_spill] sm:$0xff] %v8308_v55  ;;  %v1458_v33 = vcombine.low %v8130_v62, %v730_v32  ;;  %v1459_v13 = vcombine.high %v8130_v62, %v730_v32  ;;  %v8332_v1 = vrot.slane %v11852_v40, %v7368_v52  ;;  %v8338_v24 = vrot.slane %v11854_v57, %v7368_v52 }
 0x1a1   : > { %11849 = vst [vmem:[#allocation94_spill] sm:$0xff] %v8314_v38  ;;  %v11856_v44 = vcombine.low %v8100_v26, %v8094_v19  ;;  %v8350_v56 = vrot.slane %v11858_v63, %v7368_v52  ;;  %v1482_v32 = vrot.slane %v1474_v2, %v11803_v61  ;;  %v1489_v40 = vrot.slane %v1475_v42, %v11803_v61 }
 0x1a2   : > { %11853 = vst [vmem:[#allocation96_spill] sm:$0xff] %v8332_v1  ;;  %11855 = vst [vmem:[#allocation97_spill] sm:$0xff] %v8338_v24  ;;  %v1466_v25 = vrot.slane %v1458_v33, %v11803_v61  ;;  %v1473_v11 = vrot.slane %v1459_v13, %v11803_v61  ;;  %v11860_v57 = vcombine.low %v8123_v9, %v8117_v15  ;;  %v763_v63 = vpop.trf.xlu1  ;;  %1068 = vxpose.xlu1.b32.cont [3/4] (short) (narrow) %v240_v3, 64 }
 0x1a3   : > { %v8344_v62 = vrot.slane %v11856_v44, %v7368_v52  ;;  %11859 = vst [vmem:[#allocation99_spill] sm:$0xff] %v8350_v56  ;;  %v11862_v19 = vcombine.high %v8123_v9, %v8117_v15  ;;  %v11864_v2 = vcombine.low %v8126_v7, %v8120_v37  ;;  %v11866_v33 = vcombine.high %v8126_v7, %v8120_v37  ;;  %v237_v37 = vld [vmem:[%s7060_s30 + $0x318] sm:$0xff] }
 0x1a4   : > { %v8360_v44 = vrot.slane %v11860_v57, %v7368_v52  ;;  %v731_v57 = vpop.trf.xlu0  ;;  %v1522_v23 = vcombine.low %v1466_v25, %v1482_v32  ;;  %v1523_v15 = vcombine.high %v1466_v25, %v1482_v32  ;;  %v1538_v9 = vcombine.low %v1473_v11, %v1489_v40  ;;  %1036 = vxpose.xlu0.b32.cont [3/4] (short) (narrow) %v236_v0, 64 }
 0x1a5   : > { %11857 = vst [vmem:[#allocation98_spill] sm:$0xff] %v8344_v62  ;;  %v8366_v26 = vrot.slane %v11862_v19, %v7368_v52  ;;  %v8372_v42 = vrot.slane %v11864_v2, %v7368_v52  ;;  %v8378_v13 = vrot.slane %v11866_v33, %v7368_v52  ;;  %v1539_v19 = vcombine.high %v1473_v11, %v1489_v40 }
 0x1a6   : > { %11861 = vst [vmem:[#allocation100_spill] sm:$0xff] %v8360_v44  ;;  %v2018_v56 = vcombine.low %v8142_v5, %v763_v63  ;;  %v2019_v2 = vcombine.high %v8142_v5, %v763_v63  ;;  %v2002_v62 = vcombine.low %v8144_v31, %v731_v57  ;;  %v2003_v24 = vcombine.high %v8144_v31, %v731_v57  ;;  %v764_v11 = vpop.trf.xlu1 }
 0x1a7   : > { %11863 = vst [vmem:[#allocation101_spill] sm:$0xff] %v8366_v26  ;;  %11865 = vst [vmem:[#allocation102_spill] sm:$0xff] %v8372_v42  ;;  %v241_v26 = vld [vmem:[%s7060_s30 + $0x338] sm:$0xff]  ;;  %v8387_v7 = vrot.slane %v1522_v23, %v7368_v52  ;;  %v8390_v3 = vrot.slane %v1523_v15, %v7368_v52  ;;  %v8393_v32 = vrot.slane %v1538_v9, %v7368_v52 }
 0x1a8   : > { %11867 = vst [vmem:[#allocation103_spill] sm:$0xff] %v8378_v13  ;;  %v8396_v0 = vrot.slane %v1539_v19, %v7368_v52  ;;  %v2026_v40 = vrot.slane %v2018_v56, %v11803_v61  ;;  %v2033_v5 = vrot.slane %v2019_v2, %v11803_v61  ;;  %v2010_v25 = vrot.slane %v2002_v62, %v11803_v61  ;;  %v732_v23 = vpop.trf.xlu0 }
 0x1a9   : > { %11868 = vst [vmem:[#allocation104_spill] sm:$0xff] %v8387_v7  ;;  %11869 = vst [vmem:[#allocation105_spill] sm:$0xff] %v8390_v3  ;;  %v2017_v31 = vrot.slane %v2003_v24, %v11803_v61  ;;  %1069 = vxpose.xlu1.b32.end [4/4] (short) (narrow) %v241_v26, 64  ;;  %v2562_v33 = vcombine.low %v8148_v39, %v764_v11  ;;  %v2563_v63 = vcombine.high %v8148_v39, %v764_v11  ;;  %v249_v3 = vld [vmem:[%s7060_s30 + $0x378] sm:$0xff] }
 0x1aa   : > { %11870 = vst [vmem:[#allocation106_spill] sm:$0xff] %v8393_v32  ;;  %11871 = vst [vmem:[#allocation107_spill] sm:$0xff] %v8396_v0  ;;  %v2546_v57 = vcombine.low %v8150_v4, %v732_v23  ;;  %v2547_v15 = vcombine.high %v8150_v4, %v732_v23  ;;  %1037 = vxpose.xlu0.b32.end [4/4] (short) (narrow) %v237_v37, 64  ;;  %v2066_v9 = vcombine.low %v2010_v25, %v2026_v40 }
 0x1ab   : > { %v2067_v56 = vcombine.high %v2010_v25, %v2026_v40  ;;  %v2082_v19 = vcombine.low %v2017_v31, %v2033_v5  ;;  %v2083_v2 = vcombine.high %v2017_v31, %v2033_v5  ;;  %v2570_v62 = vrot.slane %v2562_v33, %v11803_v61  ;;  %v765_v40 = vpop.trf.xlu1 }
 0x1ac   : > { %v2577_v24 = vrot.slane %v2563_v63, %v11803_v61  ;;  %v2554_v13 = vrot.slane %v2546_v57, %v11803_v61  ;;  %v2561_v26 = vrot.slane %v2547_v15, %v11803_v61  ;;  %v8411_v1 = vrot.slane %v2066_v9, %v7368_v52  ;;  %v733_v5 = vpop.trf.xlu0 }
 0x1ad   : > { %v8414_v39 = vrot.slane %v2067_v56, %v7368_v52  ;;  %v8417_v4 = vrot.slane %v2082_v19, %v7368_v52  ;;  %v8420_v37 = vrot.slane %v2083_v2, %v7368_v52  ;;  %v3106_v33 = vcombine.low %v8154_v45, %v765_v40 }
 0x1ae   : > { %11872 = vst [vmem:[#allocation108_spill] sm:$0xff] %v8411_v1  ;;  %v2610_v25 = vcombine.low %v2554_v13, %v2570_v62  ;;  %v2611_v31 = vcombine.high %v2554_v13, %v2570_v62  ;;  %v2626_v11 = vcombine.low %v2561_v26, %v2577_v24  ;;  %v2627_v23 = vcombine.high %v2561_v26, %v2577_v24 }
 0x1af   : > { %11873 = vst [vmem:[#allocation109_spill] sm:$0xff] %v8414_v39  ;;  %11874 = vst [vmem:[#allocation110_spill] sm:$0xff] %v8417_v4  ;;  %v3107_v63 = vcombine.high %v8154_v45, %v765_v40  ;;  %v3090_v57 = vcombine.low %v8156_v46, %v733_v5  ;;  %v3091_v15 = vcombine.high %v8156_v46, %v733_v5  ;;  %v766_v24 = vpop.trf.xlu1 }
 0x1b0   : > { %11875 = vst [vmem:[#allocation111_spill] sm:$0xff] %v8420_v37  ;;  %v8427_v9 = vrot.slane %v2610_v25, %v7368_v52  ;;  %v8430_v56 = vrot.slane %v2611_v31, %v7368_v52  ;;  %v8433_v19 = vrot.slane %v2626_v11, %v7368_v52  ;;  %v8436_v13 = vrot.slane %v2627_v23, %v7368_v52  ;;  %v734_v26 = vpop.trf.xlu0 }
 0x1b1   : > { %v3114_v2 = vrot.slane %v3106_v33, %v11803_v61  ;;  %v3121_v45 = vrot.slane %v3107_v63, %v11803_v61  ;;  %v3098_v62 = vrot.slane %v3090_v57, %v11803_v61  ;;  %v3105_v46 = vrot.slane %v3091_v15, %v11803_v61 }
 0x1b2   : > { %11876 = vst [vmem:[#allocation112_spill] sm:$0xff] %v8427_v9  ;;  %11877 = vst [vmem:[#allocation113_spill] sm:$0xff] %v8430_v56  ;;  %v3650_v40 = vcombine.low %v8158_v28, %v766_v24  ;;  %v3651_v5 = vcombine.high %v8158_v28, %v766_v24  ;;  %v3634_v25 = vcombine.low %v8160_v51, %v734_v26 }
 0x1b3   : > { %11878 = vst [vmem:[#allocation114_spill] sm:$0xff] %v8433_v19  ;;  %11879 = vst [vmem:[#allocation115_spill] sm:$0xff] %v8436_v13  ;;  %v3635_v31 = vcombine.high %v8160_v51, %v734_v26  ;;  %v3154_v11 = vcombine.low %v3098_v62, %v3114_v2  ;;  %v3155_v23 = vcombine.high %v3098_v62, %v3114_v2  ;;  %v265_v19 = vld [vmem:[%s7060_s30 + $0x3f8] sm:$0xff] }
 0x1b4   : > { %v3170_v42 = vcombine.low %v3105_v46, %v3121_v45  ;;  %v3171_v33 = vcombine.high %v3105_v46, %v3121_v45  ;;  %v3658_v63 = vrot.slane %v3650_v40, %v11803_v61  ;;  %v3665_v57 = vrot.slane %v3651_v5, %v11803_v61  ;;  %v767_v45 = vpop.trf.xlu1  ;;  %v735_v62 = vpop.trf.xlu0 }
 0x1b5   : > { %v3642_v15 = vrot.slane %v3634_v25, %v11803_v61  ;;  %v3649_v44 = vrot.slane %v3635_v31, %v11803_v61  ;;  %v8451_v20 = vrot.slane %v3154_v11, %v7368_v52  ;;  %v8454_v28 = vrot.slane %v3155_v23, %v7368_v52 }
 0x1b6   : > { %v8457_v51 = vrot.slane %v3170_v42, %v7368_v52  ;;  %v8460_v2 = vrot.slane %v3171_v33, %v7368_v52  ;;  %v4194_v5 = vcombine.low %v8162_v6, %v767_v45  ;;  %v4195_v25 = vcombine.high %v8162_v6, %v767_v45  ;;  %v246_v42 = vld [vmem:[%s7060_s30 + $0x360] sm:$0xff] }
 0x1b7   : > { %11880 = vst [vmem:[#allocation116_spill] sm:$0xff] %v8451_v20  ;;  %11881 = vst [vmem:[#allocation117_spill] sm:$0xff] %v8454_v28  ;;  %v3698_v46 = vcombine.low %v3642_v15, %v3658_v63  ;;  %v3699_v24 = vcombine.high %v3642_v15, %v3658_v63  ;;  %v3714_v26 = vcombine.low %v3649_v44, %v3665_v57  ;;  %v242_v63 = vld [vmem:[%s7060_s30 + $0x340] sm:$0xff] }
 0x1b8   : > { %11882 = vst [vmem:[#allocation118_spill] sm:$0xff] %v8457_v51  ;;  %11883 = vst [vmem:[#allocation119_spill] sm:$0xff] %v8460_v2  ;;  %v3715_v40 = vcombine.high %v3649_v44, %v3665_v57  ;;  %v4178_v31 = vcombine.low %v8164_v47, %v735_v62  ;;  %v4179_v11 = vcombine.high %v8164_v47, %v735_v62  ;;  %v768_v45 = vpop.trf.xlu1  ;;  %v736_v62 = vpop.trf.xlu0 }
 0x1b9   : > { %v8468_v23 = vrot.slane %v3698_v46, %v7368_v52  ;;  %v8471_v33 = vrot.slane %v3699_v24, %v7368_v52  ;;  %v8474_v38 = vrot.slane %v3714_v26, %v7368_v52  ;;  %v4202_v6 = vrot.slane %v4194_v5, %v11803_v61 }
 0x1ba   : > { %v8477_v44 = vrot.slane %v3715_v40, %v7368_v52  ;;  %v4209_v57 = vrot.slane %v4195_v25, %v11803_v61  ;;  %v4186_v47 = vrot.slane %v4178_v31, %v11803_v61  ;;  %v4193_v15 = vrot.slane %v4179_v11, %v11803_v61  ;;  %1130 = vxpose.xlu1.b32.start [1/4] (short) (narrow) %v246_v42, 64  ;;  %v247_v31 = vld [vmem:[%s7060_s30 + $0x368] sm:$0xff] }
 0x1bb   : > { %11884 = vst [vmem:[#allocation120_spill] sm:$0xff] %v8468_v23  ;;  %11885 = vst [vmem:[#allocation121_spill] sm:$0xff] %v8471_v33  ;;  %v4738_v46 = vcombine.low %v8166_v21, %v768_v45  ;;  %v4739_v24 = vcombine.high %v8166_v21, %v768_v45  ;;  %v4722_v26 = vcombine.low %v8168_v59, %v736_v62  ;;  %1098 = vxpose.xlu0.b32.start [1/4] (short) (narrow) %v242_v63, 64  ;;  %v250_v23 = vld [vmem:[%s7060_s30 + $0x380] sm:$0xff] }
 0x1bc   : > { %11886 = vst [vmem:[#allocation122_spill] sm:$0xff] %v8474_v38  ;;  %11887 = vst [vmem:[#allocation123_spill] sm:$0xff] %v8477_v44  ;;  %v4723_v40 = vcombine.high %v8168_v59, %v736_v62  ;;  %v4242_v5 = vcombine.low %v4186_v47, %v4202_v6  ;;  %v4243_v55 = vcombine.high %v4186_v47, %v4202_v6  ;;  %v243_v59 = vld [vmem:[%s7060_s30 + $0x348] sm:$0xff]  ;;  %v769_v47 = vpop.trf.xlu1 }
 0x1bd   : > { %v4258_v43 = vcombine.low %v4193_v15, %v4209_v57  ;;  %v4259_v25 = vcombine.high %v4193_v15, %v4209_v57  ;;  %v8490_v11 = vrot.slane %v4738_v46, %v11803_v61  ;;  %v8493_v53 = vrot.slane %v4739_v24, %v11803_v61  ;;  %v737_v15 = vpop.trf.xlu0  ;;  %v251_v38 = vld [vmem:[%s7060_s30 + $0x388] sm:$0xff] }
 0x1be   : > { %v8496_v44 = vrot.slane %v4722_v26, %v11803_v61  ;;  %v8499_v21 = vrot.slane %v4723_v40, %v11803_v61  ;;  %v8503_v42 = vrot.slane %v4242_v5, %v7368_v52  ;;  %v8506_v63 = vrot.slane %v4243_v55, %v7368_v52  ;;  %1131 = vxpose.xlu1.b32.cont [2/4] (short) (narrow) %v247_v31, 64  ;;  %v248_v5 = vld [vmem:[%s7060_s30 + $0x370] sm:$0xff] }
 0x1bf   : > { %v8509_v6 = vrot.slane %v4258_v43, %v7368_v52  ;;  %v8512_v57 = vrot.slane %v4259_v25, %v7368_v52  ;;  %v5282_v43 = vcombine.low %v8220_v22, %v769_v47  ;;  %v5283_v24 = vcombine.high %v8220_v22, %v769_v47  ;;  %1099 = vxpose.xlu0.b32.cont [2/4] (short) (narrow) %v243_v59, 64  ;;  %v244_v25 = vld [vmem:[%s7060_s30 + $0x350] sm:$0xff] }
 0x1c0   : > { %11888 = vst [vmem:[#allocation124_spill] sm:$0xff] %v8503_v42  ;;  %11889 = vst [vmem:[#allocation125_spill] sm:$0xff] %v8506_v63  ;;  %v5266_v26 = vcombine.low %v8222_v30, %v737_v15  ;;  %v5267_v40 = vcombine.high %v8222_v30, %v737_v15  ;;  %v8540_v15 = vpop.trf.xlu1  ;;  %v11904_v63 = vcombine.high %v8496_v44, %v8490_v11 }
 0x1c1   : > { %11890 = vst [vmem:[#allocation126_spill] sm:$0xff] %v8509_v6  ;;  %11891 = vst [vmem:[#allocation127_spill] sm:$0xff] %v8512_v57  ;;  %v5290_v22 = vrot.slane %v5282_v43, %v11803_v61  ;;  %v5297_v30 = vrot.slane %v5283_v24, %v11803_v61  ;;  %v8542_v62 = vpop.trf.xlu0  ;;  %v11902_v43 = vcombine.low %v8496_v44, %v8490_v11  ;;  %v255_v57 = vld [vmem:[%s7060_s30 + $0x3a8] sm:$0xff] }
 0x1c2   : > { %v5274_v59 = vrot.slane %v5266_v26, %v11803_v61  ;;  %v5281_v47 = vrot.slane %v5267_v40, %v11803_v61  ;;  %1132 = vxpose.xlu1.b32.cont [3/4] (short) (narrow) %v248_v5, 64  ;;  %v8660_v5 = vrot.slane %v11904_v63, %v7368_v52  ;;  %v11906_v29 = vcombine.low %v8499_v21, %v8493_v53  ;;  %v252_v63 = vld [vmem:[%s7060_s30 + $0x390] sm:$0xff] }
 0x1c3   : > { %1100 = vxpose.xlu0.b32.cont [3/4] (short) (narrow) %v244_v25, 64  ;;  %v11909_v44 = vcombine.high %v8499_v21, %v8493_v53 }
 0x1c4   : > { %v5330_v26 = vcombine.low %v5274_v59, %v5290_v22  ;;  %v5331_v46 = vcombine.high %v5274_v59, %v5290_v22  ;;  %v5346_v40 = vcombine.low %v5281_v47, %v5297_v30  ;;  %v5347_v45 = vcombine.high %v5281_v47, %v5297_v30  ;;  %v8574_v59 = vpop.trf.xlu1  ;;  %11905 = vst [vmem:[#allocation133_spill] sm:$0xff] %v8660_v5 }
 0x1c5   : > { %v8576_v47 = vpop.trf.xlu0  ;;  %v8668_v33 = vrot.slane %v11906_v29, %v7368_v52  ;;  %v8678_v11 = vrot.slane %v11909_v44, %v7368_v52 }
 0x1c6   : > { %v8563_v24 = vrot.slane %v5330_v26, %v7368_v52  ;;  %v8566_v22 = vrot.slane %v5331_v46, %v7368_v52  ;;  %v8569_v25 = vrot.slane %v5346_v40, %v7368_v52  ;;  %v8572_v30 = vrot.slane %v5347_v45, %v7368_v52  ;;  %1133 = vxpose.xlu1.b32.end [4/4] (short) (narrow) %v249_v3, 64  ;;  %v262_v45 = vld [vmem:[%s7060_s30 + $0x3e0] sm:$0xff] }
 0x1c7   : > { %1101 = vxpose.xlu0.b32.end [4/4] (short) (narrow) %v245_v14, 64  ;;  %v8654_v3 = vrot.slane %v11902_v43, %v7368_v52  ;;  %11907 = vst [vmem:[#allocation134_spill] sm:$0xff] %v8668_v33  ;;  %11910 = vst [vmem:[#allocation135_spill] sm:$0xff] %v8678_v11  ;;  %v257_v33 = vld [vmem:[%s7060_s30 + $0x3b8] sm:$0xff] }
 0x1c8   : > { %11892 = vst [vmem:[#allocation128_spill] sm:$0xff] %v8563_v24  ;;  %11893 = vst [vmem:[#allocation129_spill] sm:$0xff] %v8566_v22  ;;  %v8602_v40 = vpop.trf.xlu1  ;;  %v253_v14 = vld [vmem:[%s7060_s30 + $0x398] sm:$0xff] }
 0x1c9   : > { %11894 = vst [vmem:[#allocation130_spill] sm:$0xff] %v8569_v25  ;;  %11895 = vst [vmem:[#allocation131_spill] sm:$0xff] %v8572_v30  ;;  %v8604_v55 = vpop.trf.xlu0  ;;  %v254_v30 = vld [vmem:[%s7060_s30 + $0x3a0] sm:$0xff]  ;;  %v256_v25 = vld [vmem:[%s7060_s30 + $0x3b0] sm:$0xff] }
 0x1ca   : > { %11903 = vst [vmem:[#allocation132_spill] sm:$0xff] %v8654_v3 }
 0x1cc   : > { %v8638_v36 = vpop.trf.xlu1 }
 0x1cd   : > { %v8640_v2 = vpop.trf.xlu0 }
 0x1d0   : > { %v8690_v60 = vpop.trf.xlu1 }
 0x1d1   : > { %v8692_v53 = vpop.trf.xlu0 }
 0x1d4   : > { %v8718_v22 = vpop.trf.xlu1 }
 0x1d5   : > { %v8720_v44 = vpop.trf.xlu0 }
 0x1d8   : > { %v8724_v54 = vpop.trf.xlu1  ;;  %1194 = vxpose.xlu1.b32.start [1/4] (short) (narrow) %v254_v30, 64 }
 0x1d9   : > { %v8726_v51 = vpop.trf.xlu0  ;;  %1162 = vxpose.xlu0.b32.start [1/4] (short) (narrow) %v250_v23, 64 }
 0x1dc   : > { %v8730_v26 = vpop.trf.xlu1  ;;  %1195 = vxpose.xlu1.b32.cont [2/4] (short) (narrow) %v255_v57, 64 }
 0x1dd   : > { %v8732_v5 = vpop.trf.xlu0  ;;  %1163 = vxpose.xlu0.b32.cont [2/4] (short) (narrow) %v251_v38, 64 }
 0x1e0   : > { %v890_v11 = vpop.trf.xlu1  ;;  %1196 = vxpose.xlu1.b32.cont [3/4] (short) (narrow) %v256_v25, 64 }
 0x1e1   : > { %v858_v21 = vpop.trf.xlu0  ;;  %1164 = vxpose.xlu0.b32.cont [3/4] (short) (narrow) %v252_v63, 64  ;;  %v1578_v24 = vcombine.low %v8540_v15, %v890_v11  ;;  %v1579_v23 = vcombine.high %v8540_v15, %v890_v11 }
 0x1e2   : > { %v1562_v30 = vcombine.low %v8542_v62, %v858_v21  ;;  %v1563_v43 = vcombine.high %v8542_v62, %v858_v21 }
 0x1e3   : > { %v8743_v29 = vrot.slane %v1578_v24, %v11803_v61  ;;  %v8746_v38 = vrot.slane %v1579_v23, %v11803_v61 }
 0x1e4   : > { %v8749_v57 = vrot.slane %v1562_v30, %v11803_v61  ;;  %v8752_v25 = vrot.slane %v1563_v43, %v11803_v61  ;;  %v891_v63 = vpop.trf.xlu1  ;;  %1197 = vxpose.xlu1.b32.end [4/4] (short) (narrow) %v257_v33, 64 }
 0x1e5   : > { %v859_v15 = vpop.trf.xlu0  ;;  %1165 = vxpose.xlu0.b32.end [4/4] (short) (narrow) %v253_v14, 64  ;;  %v2122_v23 = vcombine.low %v8574_v59, %v891_v63  ;;  %v2123_v43 = vcombine.high %v8574_v59, %v891_v63 }
 0x1e6   : > { %v2106_v30 = vcombine.low %v8576_v47, %v859_v15  ;;  %v2107_v33 = vcombine.high %v8576_v47, %v859_v15 }
 0x1e7   : > { %v8767_v14 = vrot.slane %v2122_v23, %v11803_v61  ;;  %v8770_v62 = vrot.slane %v2123_v43, %v11803_v61 }
 0x1e8   : > { %v8773_v24 = vrot.slane %v2106_v30, %v11803_v61  ;;  %v8776_v11 = vrot.slane %v2107_v33, %v11803_v61  ;;  %v892_v21 = vpop.trf.xlu1 }
 0x1e9   : > { %11918 = vst [vmem:[#allocation136_spill] sm:$0xff] %v8767_v14  ;;  %11919 = vst [vmem:[#allocation137_spill] sm:$0xff] %v8770_v62  ;;  %v860_v3 = vpop.trf.xlu0  ;;  %v2666_v59 = vcombine.low %v8602_v40, %v892_v21  ;;  %v2667_v63 = vcombine.high %v8602_v40, %v892_v21 }
 0x1ea   : > { %11920 = vst [vmem:[#allocation138_spill] sm:$0xff] %v8773_v24  ;;  %11921 = vst [vmem:[#allocation139_spill] sm:$0xff] %v8776_v11  ;;  %v2650_v47 = vcombine.low %v8604_v55, %v860_v3  ;;  %v2651_v15 = vcombine.high %v8604_v55, %v860_v3 }
 0x1eb   : > { %v8791_v31 = vrot.slane %v2666_v59, %v11803_v61  ;;  %v8794_v40 = vrot.slane %v2667_v63, %v11803_v61 }
 0x1ec   : > { %v8797_v55 = vrot.slane %v2650_v47, %v11803_v61  ;;  %v8800_v3 = vrot.slane %v2651_v15, %v11803_v61  ;;  %v893_v21 = vpop.trf.xlu1 }
 0x1ed   : > { %11922 = vst [vmem:[#allocation140_spill] sm:$0xff] %v8791_v31  ;;  %11923 = vst [vmem:[#allocation141_spill] sm:$0xff] %v8794_v40  ;;  %v861_v43 = vpop.trf.xlu0  ;;  %v3210_v47 = vcombine.low %v8638_v36, %v893_v21  ;;  %v3211_v23 = vcombine.high %v8638_v36, %v893_v21 }
 0x1ee   : > { %11924 = vst [vmem:[#allocation142_spill] sm:$0xff] %v8797_v55  ;;  %11925 = vst [vmem:[#allocation143_spill] sm:$0xff] %v8800_v3  ;;  %v3194_v15 = vcombine.low %v8640_v2, %v861_v43  ;;  %v3195_v6 = vcombine.high %v8640_v2, %v861_v43 }
 0x1ef   : > { %v8815_v46 = vrot.slane %v3210_v47, %v11803_v61  ;;  %v8818_v30 = vrot.slane %v3211_v23, %v11803_v61 }
 0x1f0   : > { %v8821_v33 = vrot.slane %v3194_v15, %v11803_v61  ;;  %v8824_v59 = vrot.slane %v3195_v6, %v11803_v61  ;;  %v894_v63 = vpop.trf.xlu1  ;;  %v258_v6 = vld [vmem:[%s7060_s30 + $0x3c0] sm:$0xff] }
 0x1f1   : > { %11926 = vst [vmem:[#allocation144_spill] sm:$0xff] %v8815_v46  ;;  %11927 = vst [vmem:[#allocation145_spill] sm:$0xff] %v8818_v30  ;;  %v862_v42 = vpop.trf.xlu0  ;;  %v3754_v36 = vcombine.low %v8690_v60, %v894_v63  ;;  %v3755_v21 = vcombine.high %v8690_v60, %v894_v63 }
 0x1f2   : > { %11928 = vst [vmem:[#allocation146_spill] sm:$0xff] %v8821_v33  ;;  %11929 = vst [vmem:[#allocation147_spill] sm:$0xff] %v8824_v59  ;;  %v3738_v2 = vcombine.low %v8692_v53, %v862_v42  ;;  %v3739_v43 = vcombine.high %v8692_v53, %v862_v42 }
 0x1f3   : > { %v8839_v60 = vrot.slane %v3754_v36, %v11803_v61  ;;  %v8842_v63 = vrot.slane %v3755_v21, %v11803_v61 }
 0x1f4   : > { %v8845_v42 = vrot.slane %v3738_v2, %v11803_v61  ;;  %v8848_v53 = vrot.slane %v3739_v43, %v11803_v61  ;;  %v895_v47 = vpop.trf.xlu1 }
 0x1f5   : > { %11930 = vst [vmem:[#allocation148_spill] sm:$0xff] %v8839_v60  ;;  %11931 = vst [vmem:[#allocation149_spill] sm:$0xff] %v8842_v63  ;;  %v863_v23 = vpop.trf.xlu0  ;;  %v4298_v2 = vcombine.low %v8718_v22, %v895_v47  ;;  %v4299_v43 = vcombine.high %v8718_v22, %v895_v47 }
 0x1f6   : > { %11932 = vst [vmem:[#allocation150_spill] sm:$0xff] %v8845_v42  ;;  %11933 = vst [vmem:[#allocation151_spill] sm:$0xff] %v8848_v53  ;;  %v4282_v17 = vcombine.low %v8720_v44, %v863_v23  ;;  %v4283_v28 = vcombine.high %v8720_v44, %v863_v23 }
 0x1f7   : > { %v8865_v49 = vrot.slane %v4298_v2, %v11803_v61  ;;  %v8868_v15 = vrot.slane %v4299_v43, %v11803_v61  ;;  %v263_v43 = vld [vmem:[%s7060_s30 + $0x3e8] sm:$0xff] }
 0x1f8   : > { %v8871_v21 = vrot.slane %v4282_v17, %v11803_v61  ;;  %v8874_v36 = vrot.slane %v4283_v28, %v11803_v61  ;;  %v896_v22 = vpop.trf.xlu1  ;;  %1258 = vxpose.xlu1.b32.start [1/4] (short) (narrow) %v262_v45, 64 }
 0x1f9   : > { %11934 = vst [vmem:[#allocation152_spill] sm:$0xff] %v8865_v49  ;;  %11935 = vst [vmem:[#allocation153_spill] sm:$0xff] %v8868_v15  ;;  %v864_v47 = vpop.trf.xlu0  ;;  %v4842_v20 = vcombine.low %v8724_v54, %v896_v22  ;;  %v4843_v44 = vcombine.high %v8724_v54, %v896_v22  ;;  %1226 = vxpose.xlu0.b32.start [1/4] (short) (narrow) %v258_v6, 64  ;;  %v259_v54 = vld [vmem:[%s7060_s30 + $0x3c8] sm:$0xff] }
 0x1fa   : > { %11936 = vst [vmem:[#allocation154_spill] sm:$0xff] %v8871_v21  ;;  %11937 = vst [vmem:[#allocation155_spill] sm:$0xff] %v8874_v36  ;;  %v4826_v23 = vcombine.low %v8726_v51, %v864_v47  ;;  %v4827_v2 = vcombine.high %v8726_v51, %v864_v47 }
 0x1fb   : > { %v8891_v22 = vrot.slane %v4842_v20, %v11803_v61  ;;  %v8894_v51 = vrot.slane %v4843_v44, %v11803_v61 }
 0x1fc   : > { %v8897_v6 = vrot.slane %v4826_v23, %v11803_v61  ;;  %v8900_v47 = vrot.slane %v4827_v2, %v11803_v61  ;;  %1259 = vxpose.xlu1.b32.cont [2/4] (short) (narrow) %v263_v43, 64  ;;  %v897_v28 = vpop.trf.xlu1  ;;  %v264_v23 = vld [vmem:[%s7060_s30 + $0x3f0] sm:$0xff] }
 0x1fd   : > { %11938 = vst [vmem:[#allocation156_spill] sm:$0xff] %v8891_v22  ;;  %11939 = vst [vmem:[#allocation157_spill] sm:$0xff] %v8894_v51  ;;  %v865_v45 = vpop.trf.xlu0  ;;  %1227 = vxpose.xlu0.b32.cont [2/4] (short) (narrow) %v259_v54, 64  ;;  %v5386_v2 = vcombine.low %v8730_v26, %v897_v28  ;;  %v5387_v43 = vcombine.high %v8730_v26, %v897_v28 }
 0x1fe   : > { %11940 = vst [vmem:[#allocation158_spill] sm:$0xff] %v8897_v6  ;;  %11941 = vst [vmem:[#allocation159_spill] sm:$0xff] %v8900_v47  ;;  %v5370_v13 = vcombine.low %v8732_v5, %v865_v45  ;;  %v5371_v50 = vcombine.high %v8732_v5, %v865_v45 }
 0x1ff   : > { %v8917_v20 = vrot.slane %v5386_v2, %v11803_v61  ;;  %v8920_v44 = vrot.slane %v5387_v43, %v11803_v61  ;;  %v261_v43 = vld [vmem:[%s7060_s30 + $0x3d8] sm:$0xff] }
 0x200   : > { %v8923_v17 = vrot.slane %v5370_v13, %v11803_v61  ;;  %v8926_v54 = vrot.slane %v5371_v50, %v11803_v61  ;;  %1260 = vxpose.xlu1.b32.cont [3/4] (short) (narrow) %v264_v23, 64  ;;  %v954_v26 = vpop.trf.xlu1 }
 0x201   : > { %11942 = vst [vmem:[#allocation160_spill] sm:$0xff] %v8917_v20  ;;  %11943 = vst [vmem:[#allocation161_spill] sm:$0xff] %v8920_v44  ;;  %v922_v28 = vpop.trf.xlu0  ;;  %1228 = vxpose.xlu0.b32.cont [3/4] (short) (narrow) %v260_v10, 64 }
 0x202   : > { %11944 = vst [vmem:[#allocation162_spill] sm:$0xff] %v8923_v17  ;;  %11945 = vst [vmem:[#allocation163_spill] sm:$0xff] %v8926_v54 }
 0x204   : > { %1261 = vxpose.xlu1.b32.end [4/4] (short) (narrow) %v265_v19, 64  ;;  %v955_v50 = vpop.trf.xlu1 }
 0x205   : > { %v8938_v23 = vpop.trf.xlu0  ;;  %1229 = vxpose.xlu0.b32.end [4/4] (short) (narrow) %v261_v43, 64 }
 0x208   : > { %v8940_v10 = vpop.trf.xlu1 }
 0x209   : > { %v8942_v8 = vpop.trf.xlu0 }
 0x20c   : > { %v8944_v5 = vpop.trf.xlu1 }
 0x20d   : > { %v8946_v56 = vpop.trf.xlu0 }
 0x210   : > { %v8948_v45 = vpop.trf.xlu1 }
 0x211   : > { %v8950_v2 = vpop.trf.xlu0 }
 0x214   : > { %v8952_v34 = vpop.trf.xlu1 }
 0x215   : > { %v8954_v13 = vpop.trf.xlu0 }
 0x218   : > { %v8956_v19 = vpop.trf.xlu1 }
 0x219   : > { %v8958_v9 = vpop.trf.xlu0 }
 0x21c   : > { %v8960_v43 = vpop.trf.xlu1 }
 0x21d   : > { %v8962_v35 = vpop.trf.xlu0 }
 0x220   : > { %v1018_v37 = vpop.trf.xlu1 }
 0x221   : > { %v986_v16 = vpop.trf.xlu0  ;;  %v1610_v4 = vcombine.low %v954_v26, %v1018_v37  ;;  %v1611_v48 = vcombine.high %v954_v26, %v1018_v37 }
 0x222   : > { %v1594_v39 = vcombine.low %v922_v28, %v986_v16  ;;  %v1595_v58 = vcombine.high %v922_v28, %v986_v16  ;;  %v11954_v28 = vcombine.low %v8749_v57, %v8743_v29 }
 0x223   : > { %v1618_v1 = vrot.slane %v1610_v4, %v11803_v61  ;;  %v1625_v41 = vrot.slane %v1611_v48, %v11803_v61  ;;  %v11948_v48 = vcombine.high %v8749_v57, %v8743_v29 }
 0x224   : > { %v1602_v0 = vrot.slane %v1594_v39, %v11803_v61  ;;  %v1609_v18 = vrot.slane %v1595_v58, %v11803_v61  ;;  %v1019_v32 = vpop.trf.xlu1  ;;  %v11950_v58 = vcombine.low %v8752_v25, %v8746_v38 }
 0x225   : > { %v987_v12 = vpop.trf.xlu0  ;;  %v8978_v39 = vrot.slane %v11948_v48, %v7368_v52  ;;  %v2154_v29 = vcombine.low %v955_v50, %v1019_v32  ;;  %v2155_v57 = vcombine.high %v955_v50, %v1019_v32 }
 0x226   : > { %v1659_v44 = vcombine.high %v1602_v0, %v1618_v1  ;;  %v1674_v54 = vcombine.low %v1609_v18, %v1625_v41  ;;  %v1675_v20 = vcombine.high %v1609_v18, %v1625_v41  ;;  %v1658_v17 = vcombine.low %v1602_v0, %v1618_v1 }
 0x227   : > { %11949 = vst [vmem:[#allocation166_spill] sm:$0xff] %v8978_v39  ;;  %v8984_v18 = vrot.slane %v11950_v58, %v7368_v52  ;;  %v2139_v39 = vcombine.high %v8938_v23, %v987_v12  ;;  %v9029_v26 = vrot.slane %v2154_v29, %v11803_v61  ;;  %v9032_v32 = vrot.slane %v2155_v57, %v11803_v61 }
 0x228   : > { %v1020_v51 = vpop.trf.xlu1  ;;  %v8969_v37 = vrot.slane %v1659_v44, %v7368_v52  ;;  %v8972_v16 = vrot.slane %v1674_v54, %v7368_v52  ;;  %v8987_v41 = vrot.slane %v1658_v17, %v7368_v52  ;;  %v8990_v1 = vrot.slane %v1675_v20, %v7368_v52 }
 0x229   : > { %v988_v47 = vpop.trf.xlu0  ;;  %11951 = vst [vmem:[#allocation167_spill] sm:$0xff] %v8984_v18  ;;  %v9002_v17 = vrot.slane %v11954_v28, %v7368_v52  ;;  %v11956_v20 = vcombine.high %v8752_v25, %v8746_v38  ;;  %v2138_v28 = vcombine.low %v8938_v23, %v987_v12  ;;  %v11958_v38 = vcombine.high %v8176_v27, %v8387_v7 }
 0x22a   : > { %11946 = vst [vmem:[#allocation164_spill] sm:$0xff] %v8969_v37  ;;  %11947 = vst [vmem:[#allocation165_spill] sm:$0xff] %v8972_v16  ;;  %v9038_v50 = vrot.slane %v2139_v39, %v11803_v61  ;;  %v2698_v23 = vcombine.low %v8940_v10, %v1020_v51  ;;  %v2682_v54 = vcombine.low %v8942_v8, %v988_v47 }
 0x22b   : > { %11952 = vst [vmem:[#allocation168_spill] sm:$0xff] %v8987_v41  ;;  %11953 = vst [vmem:[#allocation169_spill] sm:$0xff] %v8990_v1  ;;  %v9008_v48 = vrot.slane %v11956_v20, %v7368_v52  ;;  %v1691_v58 = vcombine.high %v9002_v17, %v8987_v41  ;;  %v9035_v12 = vrot.slane %v2138_v28, %v11803_v61 }
 0x22c   : > { %v1021_v0 = vpop.trf.xlu1  ;;  %11955 = vst [vmem:[#allocation170_spill] sm:$0xff] %v9002_v17  ;;  %11959 = vst [vmem:[#allocation172_spill] sm:$0xff] %v9029_v26  ;;  %v2683_v41 = vcombine.high %v8942_v8, %v988_v47  ;;  %v2218_v47 = vcombine.low %v9038_v50, %v9032_v32 }
 0x22d   : > { %v989_v4 = vpop.trf.xlu0  ;;  %11957 = vst [vmem:[#allocation171_spill] sm:$0xff] %v9008_v48  ;;  %11960 = vst [vmem:[#allocation173_spill] sm:$0xff] %v9032_v32  ;;  %v3242_v29 = vcombine.low %v8944_v5, %v1021_v0  ;;  %v3243_v57 = vcombine.high %v8944_v5, %v1021_v0  ;;  %v2202_v8 = vcombine.low %v9035_v12, %v9029_v26 }
 0x22e   : > { %11961 = vst [vmem:[#allocation174_spill] sm:$0xff] %v9035_v12  ;;  %11962 = vst [vmem:[#allocation175_spill] sm:$0xff] %v9038_v50  ;;  %v3226_v28 = vcombine.low %v8946_v56, %v989_v4  ;;  %v3227_v17 = vcombine.high %v8946_v56, %v989_v4  ;;  %v9060_v0 = vrot.slane %v2698_v23, %v11803_v61 }
 0x22f   : > { %v9066_v4 = vrot.slane %v2682_v54, %v11803_v61  ;;  %v9072_v12 = vrot.slane %v3242_v29, %v11803_v61  ;;  %v9075_v50 = vrot.slane %v3243_v57, %v11803_v61  ;;  %v11977_v57 = vcombine.low %v8797_v55, %v8791_v31 }
 0x230   : > { %v1022_v44 = vpop.trf.xlu1  ;;  %11963 = vst [vmem:[#allocation176_spill] sm:$0xff] %v9060_v0 }
 0x231   : > { %v990_v37 = vpop.trf.xlu0  ;;  %v3786_v39 = vcombine.low %v8948_v45, %v1022_v44  ;;  %11965 = vst [vmem:[#allocation178_spill] sm:$0xff] %v9066_v4  ;;  %11967 = vst [vmem:[#allocation180_spill] sm:$0xff] %v9072_v12 }
 0x232   : > { %5648 = vrot.lane.b32.xlu1 %v11958_v38, %s6936_s17  ;;  %v2699_v38 = vcombine.high %v8940_v10, %v1020_v51  ;;  %v3770_v7 = vcombine.low %v8950_v2, %v990_v37  ;;  %v3787_v10 = vcombine.high %v8948_v45, %v1022_v44  ;;  %v3771_v5 = vcombine.high %v8950_v2, %v990_v37 }
 0x233   : > { %11968 = vst [vmem:[#allocation181_spill] sm:$0xff] %v9075_v50  ;;  %v9078_v45 = vrot.slane %v3226_v28, %v11803_v61  ;;  %v9081_v2 = vrot.slane %v3227_v17, %v11803_v61  ;;  %v11971_v37 = vcombine.low %v8773_v24, %v8767_v14  ;;  %v9096_v23 = vrot.slane %v3786_v39, %v11803_v61 }
 0x234   : > { %v9022_v25 = vpop.trf.xlu1  ;;  %v9063_v56 = vrot.slane %v2699_v38, %v11803_v61  ;;  %v9099_v38 = vrot.slane %v3770_v7, %v11803_v61  ;;  %v9105_v28 = vrot.slane %v11977_v57, %v7368_v52  ;;  %v9114_v39 = vrot.slane %v3787_v10, %v11803_v61 }
 0x235   : > { %v9024_v20 = vpop.trf.xlu0  ;;  %11969 = vst [vmem:[#allocation182_spill] sm:$0xff] %v9078_v45  ;;  %11970 = vst [vmem:[#allocation183_spill] sm:$0xff] %v9081_v2  ;;  %v9087_v44 = vrot.slane %v11971_v37, %v7368_v52  ;;  %v11979_v37 = vcombine.low %v8800_v3, %v8794_v40  ;;  %v9117_v7 = vrot.slane %v3771_v5, %v11803_v61  ;;  %v11984_v3 = vld [vmem:[#allocation41_spill] sm:$0xff] }
 0x236   : > { %5650 = vrot.lane.b32.xlu1 %v1691_v58, %s6936_s17  ;;  %11964 = vst [vmem:[#allocation177_spill] sm:$0xff] %v9063_v56  ;;  %v9069_v58 = vrot.slane %v2683_v41, %v11803_v61  ;;  %v11973_v41 = vcombine.low %v8776_v11, %v8770_v62  ;;  %11975 = vst [vmem:[#allocation186_spill] sm:$0xff] %v9096_v23  ;;  %v2746_v62 = vcombine.low %v9066_v4, %v9060_v0 }
 0x237   : > { %11972 = vst [vmem:[#allocation184_spill] sm:$0xff] %v9087_v44  ;;  %11976 = vst [vmem:[#allocation187_spill] sm:$0xff] %v9099_v38  ;;  %v4330_v57 = vcombine.low %v8952_v34, %v9022_v25  ;;  %v4331_v40 = vcombine.high %v8952_v34, %v9022_v25  ;;  %v3290_v5 = vcombine.low %v9078_v45, %v9072_v12 }
 0x238   : > { %v1024_v27 = vpop.trf.xlu1  ;;  %11966 = vst [vmem:[#allocation179_spill] sm:$0xff] %v9069_v58  ;;  %v9093_v54 = vrot.slane %v11973_v41, %v7368_v52  ;;  %11978 = vst [vmem:[#allocation188_spill] sm:$0xff] %v9105_v28  ;;  %v9111_v41 = vrot.slane %v11979_v37, %v7368_v52  ;;  %v2762_v31 = vcombine.low %v9069_v58, %v9063_v56  ;;  %v11983_v37 = vld [vmem:[#allocation9_spill] sm:$0xff] }
 0x239   : > { %v9051_v51 = vpop.trf.xlu0  ;;  %11981 = vst [vmem:[#allocation190_spill] sm:$0xff] %v9114_v39  ;;  %11982 = vst [vmem:[#allocation191_spill] sm:$0xff] %v9117_v7  ;;  %v11985_v10 = vcombine.high %v11983_v37, %v11984_v3  ;;  %v3306_v55 = vcombine.low %v9081_v2, %v9075_v50  ;;  %v9136_v4 = vrot.slane %v2202_v8, %v7368_v52 }
 0x23a   : > { %11974 = vst [vmem:[#allocation185_spill] sm:$0xff] %v9093_v54  ;;  %11980 = vst [vmem:[#allocation189_spill] sm:$0xff] %v9111_v41  ;;  %v9139_v58 = vrot.slane %v2218_v47, %v7368_v52  ;;  %v3834_v34 = vcombine.low %v9099_v38, %v9096_v23  ;;  %v4314_v25 = vcombine.low %v8954_v13, %v9024_v20 }
 0x23b   : > { %11986 = vst [vmem:[#allocation192_spill] sm:$0xff] %v9136_v4  ;;  %v4874_v45 = vcombine.low %v8956_v19, %v1024_v27  ;;  %v3850_v8 = vcombine.low %v9117_v7, %v9114_v39  ;;  %v4875_v47 = vcombine.high %v8956_v19, %v1024_v27  ;;  %v4858_v38 = vcombine.low %v8958_v9, %v9051_v51  ;;  %v11990_v7 = vld [vmem:[#allocation73_spill] sm:$0xff] }
 0x23c   : > { %v1025_v17 = vpop.trf.xlu1  ;;  %11987 = vst [vmem:[#allocation193_spill] sm:$0xff] %v9139_v58  ;;  %v9160_v50 = vrot.slane %v4330_v57, %v11803_v61  ;;  %v11991_v39 = vld [vmem:[#allocation105_spill] sm:$0xff]  ;;  %v9172_v19 = vrot.slane %v2746_v62, %v7368_v52  ;;  %v9179_v37 = vrot.slane %v4314_v25, %v11803_v61 }
 0x23d   : > { %v993_v29 = vpop.trf.xlu0  ;;  %v11992_v27 = vcombine.low %v11990_v7, %v11991_v39  ;;  %v5418_v23 = vcombine.low %v8960_v43, %v1025_v17  ;;  %v5419_v57 = vcombine.high %v8960_v43, %v1025_v17  ;;  %v9194_v17 = vrot.slane %v4875_v47, %v11803_v61 }
 0x23e   : > { %5646 = vrot.lane.b32.xlu0 %v11985_v10, %s6936_s17  ;;  %v4315_v10 = vcombine.high %v8954_v13, %v9024_v20  ;;  %11988 = vst [vmem:[#allocation194_spill] sm:$0xff] %v9160_v50  ;;  %v9163_v13 = vrot.slane %v4331_v40, %v11803_v61  ;;  %v4859_v20 = vcombine.high %v8958_v9, %v9051_v51  ;;  %11993 = vst [vmem:[#allocation73_spill] sm:$0xff] %v9172_v19 }
 0x23f   : > { %v5402_v3 = vcombine.low %v8962_v35, %v993_v29  ;;  %v5403_v40 = vcombine.high %v8962_v35, %v993_v29  ;;  %11994 = vst [vmem:[#allocation105_spill] sm:$0xff] %v9179_v37  ;;  %v9185_v51 = vrot.slane %v4874_v45, %v11803_v61  ;;  %11997 = vst [vmem:[#allocation198_spill] sm:$0xff] %v9194_v17 }
 0x240   : > { %v9148_v12 = vpop.trf.xlu1  ;;  %11989 = vst [vmem:[#allocation195_spill] sm:$0xff] %v9163_v13  ;;  %v9182_v9 = vrot.slane %v4315_v10, %v11803_v61  ;;  %v9197_v35 = vrot.slane %v4858_v38, %v11803_v61  ;;  %v9200_v29 = vrot.slane %v2762_v31, %v7368_v52  ;;  %v9205_v25 = vrot.slane %v4859_v20, %v11803_v61 }
 0x241   : > { %v9150_v2 = vpop.trf.xlu0  ;;  %11996 = vst [vmem:[#allocation197_spill] sm:$0xff] %v9185_v51  ;;  %v9208_v10 = vrot.slane %v3290_v5, %v7368_v52  ;;  %v9211_v43 = vrot.slane %v3306_v55, %v7368_v52  ;;  %v9216_v38 = vrot.slane %v5418_v23, %v11803_v61  ;;  %v9219_v31 = vrot.slane %v5419_v57, %v11803_v61 }
 0x242   : > { %5664 = vrot.lane.b32.xlu0 %v11992_v27, %s6937_s25  ;;  %11995 = vst [vmem:[#allocation196_spill] sm:$0xff] %v9182_v9  ;;  %11998 = vst [vmem:[#allocation199_spill] sm:$0xff] %v9197_v35  ;;  %v9222_v45 = vrot.slane %v5402_v3, %v11803_v61  ;;  %v9225_v20 = vrot.slane %v5403_v40, %v11803_v61  ;;  %v12007_v55 = vcombine.low %v8821_v33, %v8815_v46 }
 0x243   : > { %11999 = vst [vmem:[#allocation200_spill] sm:$0xff] %v9200_v29  ;;  %12000 = vst [vmem:[#allocation201_spill] sm:$0xff] %v9205_v25  ;;  %v12009_v23 = vcombine.low %v8824_v59, %v8818_v30  ;;  %v4378_v57 = vcombine.low %v9179_v37, %v9160_v50  ;;  %v4394_v3 = vcombine.low %v9182_v9, %v9163_v13 }
 0x244   : > { %v9187_v27 = vpop.trf.xlu1  ;;  %12001 = vst [vmem:[#allocation202_spill] sm:$0xff] %v9208_v10  ;;  %12002 = vst [vmem:[#allocation203_spill] sm:$0xff] %v9211_v43  ;;  %v9231_v5 = vrot.slane %v12007_v55, %v7368_v52  ;;  %v4922_v55 = vcombine.low %v9197_v35, %v9185_v51  ;;  %v9250_v46 = vrot.slane %v3834_v34, %v7368_v52 }
 0x245   : > { %v9189_v62 = vpop.trf.xlu0  ;;  %12003 = vst [vmem:[#allocation204_spill] sm:$0xff] %v9216_v38  ;;  %12004 = vst [vmem:[#allocation205_spill] sm:$0xff] %v9219_v31  ;;  %v9237_v47 = vrot.slane %v12009_v23, %v7368_v52  ;;  %v4938_v30 = vcombine.low %v9205_v25, %v9194_v17  ;;  %v9257_v37 = vrot.slane %v3850_v8, %v7368_v52 }
 0x246   : > { %12005 = vst [vmem:[#allocation206_spill] sm:$0xff] %v9222_v45  ;;  %12006 = vst [vmem:[#allocation207_spill] sm:$0xff] %v9225_v20  ;;  %v12013_v34 = vcombine.low %v8845_v42, %v8839_v60  ;;  %v5466_v23 = vcombine.low %v9222_v45, %v9216_v38  ;;  %v5482_v25 = vcombine.low %v9225_v20, %v9219_v31 }
 0x247   : > { %12008 = vst [vmem:[#allocation208_spill] sm:$0xff] %v9231_v5  ;;  %12010 = vst [vmem:[#allocation209_spill] sm:$0xff] %v9237_v47  ;;  %v12015_v8 = vcombine.low %v8848_v53, %v8842_v63  ;;  %v9284_v51 = vrot.slane %v4378_v57, %v7368_v52  ;;  %v12019_v20 = vcombine.low %v8871_v21, %v8865_v49  ;;  %v12033_v63 = vld [vmem:[#allocation162_spill] sm:$0xff]  ;;  %v12034_v53 = vld [vmem:[#allocation160_spill] sm:$0xff] }
 0x248   : > { %v9243_v40 = vpop.trf.xlu1  ;;  %12011 = vst [vmem:[#allocation210_spill] sm:$0xff] %v9250_v46  ;;  %12012 = vst [vmem:[#allocation211_spill] sm:$0xff] %v9257_v37  ;;  %v9267_v35 = vrot.slane %v12013_v34, %v7368_v52  ;;  %v9287_v34 = vrot.slane %v4394_v3, %v7368_v52  ;;  %v12021_v45 = vcombine.low %v8874_v36, %v8868_v15  ;;  %v12030_v36 = vld [vmem:[#allocation157_spill] sm:$0xff] }
 0x249   : > { %v9245_v56 = vpop.trf.xlu0  ;;  %v9277_v9 = vrot.slane %v12015_v8, %v7368_v52  ;;  %12017 = vst [vmem:[#allocation214_spill] sm:$0xff] %v9284_v51  ;;  %v9293_v31 = vrot.slane %v12019_v20, %v7368_v52  ;;  %v9304_v57 = vrot.slane %v4922_v55, %v7368_v52  ;;  %v9307_v3 = vrot.slane %v4938_v30, %v7368_v52  ;;  %v12029_v30 = vld [vmem:[#allocation159_spill] sm:$0xff] }
 0x24a   : > { %12014 = vst [vmem:[#allocation212_spill] sm:$0xff] %v9267_v35  ;;  %12018 = vst [vmem:[#allocation215_spill] sm:$0xff] %v9287_v34  ;;  %v9301_v38 = vrot.slane %v12021_v45, %v7368_v52  ;;  %v9312_v20 = vrot.slane %v5466_v23, %v7368_v52  ;;  %v9315_v8 = vrot.slane %v5482_v25, %v7368_v52 }
 0x24b   : > { %12016 = vst [vmem:[#allocation213_spill] sm:$0xff] %v9277_v9  ;;  %12020 = vst [vmem:[#allocation216_spill] sm:$0xff] %v9293_v31  ;;  %v12027_v45 = vcombine.low %v8897_v6, %v8891_v22  ;;  %v12031_v49 = vcombine.low %v12029_v30, %v12030_v36  ;;  %v12035_v9 = vcombine.low %v12033_v63, %v12034_v53  ;;  %v12038_v22 = vld [vmem:[#allocation161_spill] sm:$0xff] }
 0x24c   : > { %v9279_v17 = vpop.trf.xlu1  ;;  %12022 = vst [vmem:[#allocation217_spill] sm:$0xff] %v9301_v38  ;;  %12023 = vst [vmem:[#allocation218_spill] sm:$0xff] %v9304_v57 }
 0x24d   : > { %v9281_v13 = vpop.trf.xlu0  ;;  %12024 = vst [vmem:[#allocation219_spill] sm:$0xff] %v9307_v3  ;;  %12025 = vst [vmem:[#allocation220_spill] sm:$0xff] %v9312_v20  ;;  %v9325_v55 = vrot.slane %v12027_v45, %v7368_v52  ;;  %v9331_v50 = vrot.slane %v12031_v49, %v7368_v52  ;;  %v9341_v37 = vrot.slane %v12035_v9, %v7368_v52  ;;  %v12037_v45 = vld [vmem:[#allocation163_spill] sm:$0xff] }
 0x24e   : > { %12026 = vst [vmem:[#allocation221_spill] sm:$0xff] %v9315_v8  ;;  %v12039_v6 = vcombine.low %v12037_v45, %v12038_v22 }
 0x24f   : > { %12028 = vst [vmem:[#allocation222_spill] sm:$0xff] %v9325_v55  ;;  %12032 = vst [vmem:[#allocation223_spill] sm:$0xff] %v9331_v50 }
 0x250   : > { %v9317_v21 = vpop.trf.xlu1  ;;  %12036 = vst [vmem:[#allocation224_spill] sm:$0xff] %v9341_v37  ;;  %v9347_v60 = vrot.slane %v12039_v6, %v7368_v52 }
 0x251   : > { %v9319_v15 = vpop.trf.xlu0 }
 0x252   : > { %12040 = vst [vmem:[#allocation225_spill] sm:$0xff] %v9347_v60 }
 0x254   : > { %v9357_v9 = vpop.trf.xlu1 }
 0x255   : > { %v9359_v63 = vpop.trf.xlu0 }
 0x258   : > { %v9361_v36 = vpop.trf.xlu1 }
 0x259   : > { %v9363_v6 = vpop.trf.xlu0 }
 0x25c   : > { %v9365_v22 = vpop.trf.xlu1 }
 0x25d   : > { %v9367_v49 = vpop.trf.xlu0 }
 0x260   : > { %v1146_v45 = vpop.trf.xlu1 }
 0x261   : > { %v1114_v25 = vpop.trf.xlu0  ;;  %v1714_v41 = vcombine.low %v9148_v12, %v1146_v45  ;;  %v1715_v0 = vcombine.high %v9148_v12, %v1146_v45 }
 0x262   : > { %v1698_v29 = vcombine.low %v9150_v2, %v1114_v25  ;;  %v1699_v54 = vcombine.high %v9150_v2, %v1114_v25 }
 0x263   : > { %v1722_v11 = vrot.slane %v1714_v41, %v11803_v61  ;;  %v9428_v24 = vrot.slane %v1715_v0, %v11803_v61 }
 0x264   : > { %v1147_v30 = vpop.trf.xlu1  ;;  %v1706_v58 = vrot.slane %v1698_v29, %v11803_v61  ;;  %v9431_v44 = vrot.slane %v1699_v54, %v11803_v61 }
 0x265   : > { %v1115_v50 = vpop.trf.xlu0  ;;  %v2258_v26 = vcombine.low %v9187_v27, %v1147_v30  ;;  %v2259_v12 = vcombine.high %v9187_v27, %v1147_v30 }
 0x266   : > { %v1763_v4 = vcombine.high %v1706_v58, %v1722_v11  ;;  %v2242_v41 = vcombine.low %v9189_v62, %v1115_v50  ;;  %v2243_v2 = vcombine.high %v9189_v62, %v1115_v50  ;;  %v1762_v45 = vcombine.low %v1706_v58, %v1722_v11 }
 0x267   : > { %v1778_v1 = vcombine.low %v9431_v44, %v9428_v24  ;;  %v1779_v27 = vcombine.high %v9431_v44, %v9428_v24  ;;  %v9453_v50 = vrot.slane %v2258_v26, %v11803_v61  ;;  %v9456_v62 = vrot.slane %v2259_v12, %v11803_v61 }
 0x268   : > { %v9369_v23 = vpop.trf.xlu1  ;;  %v9450_v30 = vrot.slane %v1763_v4, %v7368_v52  ;;  %v9459_v48 = vrot.slane %v2242_v41, %v11803_v61  ;;  %v9462_v11 = vrot.slane %v2243_v2, %v11803_v61 }
 0x269   : > { %v9371_v3 = vpop.trf.xlu0  ;;  %v2802_v0 = vcombine.low %v9243_v40, %v9369_v23  ;;  %12045 = vst [vmem:[#allocation230_spill] sm:$0xff] %v9453_v50  ;;  %12046 = vst [vmem:[#allocation231_spill] sm:$0xff] %v9456_v62  ;;  %v2803_v24 = vcombine.high %v9243_v40, %v9369_v23 }
 0x26a   : > { %v2786_v54 = vcombine.low %v9245_v56, %v9371_v3  ;;  %12047 = vst [vmem:[#allocation232_spill] sm:$0xff] %v9459_v48  ;;  %12048 = vst [vmem:[#allocation233_spill] sm:$0xff] %v9462_v11  ;;  %v2787_v4 = vcombine.high %v9245_v56, %v9371_v3 }
 0x26b   : > { %v9471_v12 = vrot.slane %v2802_v0, %v11803_v61  ;;  %v2306_v0 = vcombine.low %v9459_v48, %v9453_v50  ;;  %v2322_v48 = vcombine.low %v9462_v11, %v9456_v62  ;;  %v9506_v50 = vrot.slane %v2803_v24, %v11803_v61 }
 0x26c   : > { %v9373_v53 = vpop.trf.xlu1  ;;  %v9474_v41 = vrot.slane %v2786_v54, %v11803_v61 }
 0x26d   : > { %v9375_v60 = vpop.trf.xlu0  ;;  %12049 = vst [vmem:[#allocation234_spill] sm:$0xff] %v9471_v12  ;;  %v3346_v2 = vcombine.low %v9279_v17, %v9373_v53  ;;  %v3347_v18 = vcombine.high %v9279_v17, %v9373_v53  ;;  %12052 = vst [vmem:[#allocation237_spill] sm:$0xff] %v9506_v50 }
 0x26e   : > { %12050 = vst [vmem:[#allocation235_spill] sm:$0xff] %v9474_v41  ;;  %v3330_v40 = vcombine.low %v9281_v13, %v9375_v60  ;;  %v3331_v56 = vcombine.high %v9281_v13, %v9375_v60 }
 0x270   : > { %v9377_v8 = vpop.trf.xlu1 }
 0x271   : > { %v9379_v37 = vpop.trf.xlu0  ;;  %v3890_v54 = vcombine.low %v9317_v21, %v9377_v8  ;;  %v3891_v60 = vcombine.high %v9317_v21, %v9377_v8  ;;  %v9517_v21 = vrot.slane %v3347_v18, %v11803_v61 }
 0x272   : > { %v3875_v13 = vcombine.high %v9319_v15, %v9379_v37 }
 0x273   : > { %12055 = vst [vmem:[#allocation240_spill] sm:$0xff] %v9517_v21  ;;  %v9526_v8 = vrot.slane %v3890_v54, %v11803_v61 }
 0x274   : > { %v9381_v20 = vpop.trf.xlu1 }
 0x275   : > { %v9383_v55 = vpop.trf.xlu0  ;;  %12058 = vst [vmem:[#allocation243_spill] sm:$0xff] %v9526_v8  ;;  %v4434_v54 = vcombine.low %v9357_v9, %v9381_v20 }
 0x278   : > { %v9385_v57 = vpop.trf.xlu1 }
 0x279   : > { %v9387_v38 = vpop.trf.xlu0 }
 0x27c   : > { %v9389_v34 = vpop.trf.xlu1 }
 0x27d   : > { %v9391_v31 = vpop.trf.xlu0 }
 0x280   : > { %v9393_v51 = vpop.trf.xlu1 }
 0x281   : > { %v9395_v42 = vpop.trf.xlu0 }
 0x284   : > { %v9397_v35 = vpop.trf.xlu1 }
 0x285   : > { %v9399_v46 = vpop.trf.xlu0 }
 0x288   : > { %v9401_v59 = vpop.trf.xlu1 }
 0x289   : > { %v9403_v47 = vpop.trf.xlu0 }
 0x28c   : > { %v9405_v43 = vpop.trf.xlu1 }
 0x28d   : > { %v9407_v33 = vpop.trf.xlu0 }
 0x290   : > { %v9409_v5 = vpop.trf.xlu1 }
 0x291   : > { %v9411_v10 = vpop.trf.xlu0 }
 0x294   : > { %v9415_v28 = vpop.trf.xlu1 }
 0x295   : > { %v9417_v19 = vpop.trf.xlu0 }
 0x298   : > { %v9423_v32 = vpop.trf.xlu1 }
 0x299   : > { %12041 = vst [vmem:[#allocation226_spill] sm:$0xff] %v9423_v32  ;;  %v9425_v14 = vpop.trf.xlu0  ;;  %v9514_v32 = vrot.slane %v3346_v2, %v11803_v61 }
 0x29a   : > { %12042 = vst [vmem:[#allocation227_spill] sm:$0xff] %v9425_v14  ;;  %v9509_v14 = vrot.slane %v2787_v4, %v11803_v61 }
 0x29b   : > { %12054 = vst [vmem:[#allocation239_spill] sm:$0xff] %v9514_v32 }
 0x29c   : > { %v9437_v29 = vpop.trf.xlu1  ;;  %12053 = vst [vmem:[#allocation238_spill] sm:$0xff] %v9509_v14 }
 0x29d   : > { %12043 = vst [vmem:[#allocation228_spill] sm:$0xff] %v9437_v29  ;;  %v9439_v25 = vpop.trf.xlu0  ;;  %v9497_v29 = vrot.slane %v1762_v45, %v7368_v52  ;;  %v2850_v45 = vcombine.low %v9474_v41, %v9471_v12  ;;  %v9552_v41 = vrot.slane %v1778_v1, %v7368_v52 }
 0x29e   : > { %12044 = vst [vmem:[#allocation229_spill] sm:$0xff] %v9439_v25  ;;  %v3874_v25 = vcombine.low %v9319_v15, %v9379_v37  ;;  %v9520_v15 = vrot.slane %v3330_v40, %v11803_v61  ;;  %v9523_v37 = vrot.slane %v3331_v56, %v11803_v61  ;;  %v9542_v40 = vrot.slane %v3891_v60, %v11803_v61 }
 0x29f   : > { %12051 = vst [vmem:[#allocation236_spill] sm:$0xff] %v9497_v29  ;;  %v9545_v56 = vrot.slane %v3875_v13, %v11803_v61  ;;  %v2866_v60 = vcombine.low %v9509_v14, %v9506_v50  ;;  %v4419_v14 = vcombine.high %v9359_v63, %v9383_v55  ;;  %v12071_v50 = vld [vmem:[#allocation42_spill] sm:$0xff] }
 0x2a0   : > { %v1274_v58 = vpop.trf.xlu1  ;;  %12056 = vst [vmem:[#allocation241_spill] sm:$0xff] %v9520_v15  ;;  %12057 = vst [vmem:[#allocation242_spill] sm:$0xff] %v9523_v37  ;;  %v9529_v24 = vrot.slane %v3874_v25, %v11803_v61  ;;  %v3410_v1 = vcombine.low %v9523_v37, %v9517_v21  ;;  %v9586_v21 = vrot.slane %v2850_v45, %v7368_v52 }
 0x2a1   : > { %v1242_v16 = vpop.trf.xlu0  ;;  %v1746_v26 = vcombine.low %v9393_v51, %v1274_v58  ;;  %12061 = vst [vmem:[#allocation246_spill] sm:$0xff] %v9542_v40  ;;  %12062 = vst [vmem:[#allocation247_spill] sm:$0xff] %v9545_v56  ;;  %v4978_v45 = vcombine.low %v9361_v36, %v9385_v57 }
 0x2a2   : > { %v1730_v44 = vcombine.low %v9395_v42, %v1242_v16  ;;  %12059 = vst [vmem:[#allocation244_spill] sm:$0xff] %v9529_v24  ;;  %v1731_v25 = vcombine.high %v9395_v42, %v1242_v16  ;;  %v4418_v42 = vcombine.low %v9359_v63, %v9383_v55  ;;  %v9567_v16 = vrot.slane %v2322_v48, %v7368_v52 }
 0x2a3   : > { %v1754_v3 = vrot.slane %v1746_v26, %v11803_v61  ;;  %v3954_v48 = vcombine.low %v9545_v56, %v9542_v40  ;;  %v9611_v63 = vrot.slane %v2866_v60, %v7368_v52  ;;  %v12070_v40 = vld [vmem:[#allocation10_spill] sm:$0xff] }
 0x2a4   : > { %v1738_v23 = vrot.slane %v1730_v44, %v11803_v61  ;;  %v9492_v53 = vpop.trf.xlu1  ;;  %v1745_v37 = vrot.slane %v1731_v25, %v11803_v61  ;;  %v4979_v25 = vcombine.high %v9361_v36, %v9385_v57 }
 0x2a5   : > { %v9494_v17 = vpop.trf.xlu0  ;;  %12065 = vst [vmem:[#allocation250_spill] sm:$0xff] %v9611_v63  ;;  %v2290_v57 = vcombine.low %v9397_v35, %v9492_v53  ;;  %v9627_v56 = vrot.slane %v3954_v48, %v7368_v52  ;;  %v12072_v48 = vcombine.low %v12070_v40, %v12071_v50 }
 0x2a6   : > { %v1794_v26 = vcombine.low %v1738_v23, %v1754_v3  ;;  %v1795_v44 = vcombine.high %v1738_v23, %v1754_v3  ;;  %v1747_v23 = vcombine.high %v9393_v51, %v1274_v58  ;;  %v3394_v51 = vcombine.low %v9520_v15, %v9514_v32 }
 0x2a7   : > { %v9651_v12 = vrot.slane %v4979_v25, %v11803_v61 }
 0x2a8   : > { %v9531_v4 = vpop.trf.xlu1  ;;  %v9536_v2 = vrot.slane %v1795_v44, %v7368_v52  ;;  %v9539_v18 = vrot.slane %v1794_v26, %v7368_v52  ;;  %v9555_v44 = vrot.slane %v1779_v27, %v7368_v52  ;;  %v9558_v26 = vrot.slane %v2306_v0, %v7368_v52 }
 0x2a9   : > { %v9533_v3 = vpop.trf.xlu0  ;;  %v3938_v27 = vcombine.low %v9529_v24, %v9526_v8  ;;  %v1761_v32 = vrot.slane %v1747_v23, %v11803_v61  ;;  %v4435_v24 = vcombine.high %v9357_v9, %v9381_v20  ;;  %v9591_v8 = vrot.slane %v4434_v54, %v11803_v61  ;;  %12074 = vst [vmem:[#allocation42_spill] sm:$0xff] %v9651_v12 }
 0x2aa   : > { %12060 = vst [vmem:[#allocation245_spill] sm:$0xff] %v9539_v18  ;;  %v1828_v58 = vcombine.low %v9450_v30, %v9536_v2  ;;  %v1827_v0 = vcombine.high %v9497_v29, %v9539_v18  ;;  %v9598_v23 = vrot.slane %v4418_v42, %v11803_v61  ;;  %v4962_v20 = vcombine.low %v9363_v6, %v9387_v38  ;;  %v12101_v18 = vld [vmem:[#allocation75_spill] sm:$0xff]  ;;  %v12105_v29 = vld [vmem:[#allocation229_spill] sm:$0xff] }
 0x2ab   : > { %12063 = vst [vmem:[#allocation248_spill] sm:$0xff] %v9591_v8  ;;  %v9614_v55 = vrot.slane %v3394_v51, %v7368_v52  ;;  %v9617_v42 = vrot.slane %v3410_v1, %v7368_v52  ;;  %v1810_v36 = vcombine.low %v1745_v37, %v1761_v32  ;;  %v9630_v60 = vrot.slane %v4435_v24, %v11803_v61 }
 0x2ac   : > { %v9577_v13 = vpop.trf.xlu1  ;;  %5668 = vrot.lane.b32.xlu0 %v1828_v58, %s6937_s25  ;;  %5652 = vrot.lane.b32.xlu1 %v1827_v0, %s6936_s17  ;;  %12064 = vst [vmem:[#allocation249_spill] sm:$0xff] %v9598_v23  ;;  %v9620_v58 = vrot.slane %v3938_v27, %v7368_v52  ;;  %v2274_v0 = vcombine.low %v9399_v46, %v9494_v17 }
 0x2ad   : > { %v9579_v15 = vpop.trf.xlu0  ;;  %12066 = vst [vmem:[#allocation251_spill] sm:$0xff] %v9614_v55  ;;  %12067 = vst [vmem:[#allocation252_spill] sm:$0xff] %v9630_v60  ;;  %v9633_v51 = vrot.slane %v4419_v14, %v11803_v61  ;;  %v12069_v27 = vcombine.high %v11990_v7, %v11991_v39  ;;  %v9648_v14 = vrot.slane %v4978_v45, %v11803_v61 }
 0x2ae   : > { %v9654_v1 = vrot.slane %v4962_v20, %v11803_v61  ;;  %v1811_v11 = vcombine.high %v1745_v37, %v1761_v32  ;;  %v2291_v39 = vcombine.high %v9397_v35, %v9492_v53  ;;  %v2275_v7 = vcombine.high %v9399_v46, %v9494_v17 }
 0x2af   : > { %12068 = vst [vmem:[#allocation253_spill] sm:$0xff] %v9633_v51  ;;  %12073 = vst [vmem:[#allocation10_spill] sm:$0xff] %v9648_v14  ;;  %v9669_v20 = vrot.slane %v2290_v57, %v11803_v61  ;;  %v9672_v32 = vrot.slane %v2274_v0, %v11803_v61  ;;  %v9675_v35 = vrot.slane %v1810_v36, %v7368_v52  ;;  %v12078_v57 = vld [vmem:[#allocation164_spill] sm:$0xff] }
 0x2b0   : > { %v9606_v9 = vpop.trf.xlu1  ;;  %5680 = vrot.lane.b32.xlu0 %v12069_v27, %s6938_s27  ;;  %5662 = vrot.lane.b32.xlu1 %v12072_v48, %s6937_s25  ;;  %12075 = vst [vmem:[#allocation254_spill] sm:$0xff] %v9654_v1  ;;  %v1829_v27 = vcombine.high %v9450_v30, %v9536_v2  ;;  %v2834_v46 = vcombine.low %v9401_v59, %v9531_v4 }
 0x2b1   : > { %v9608_v54 = vpop.trf.xlu0  ;;  %12076 = vst [vmem:[#allocation255_spill] sm:$0xff] %v9672_v32  ;;  %v2835_v30 = vcombine.high %v9401_v59, %v9531_v4  ;;  %v2818_v53 = vcombine.low %v9403_v47, %v9533_v3  ;;  %v2819_v17 = vcombine.high %v9403_v47, %v9533_v3  ;;  %v3378_v37 = vcombine.low %v9405_v43, %v9577_v13  ;;  %v12077_v4 = vld [vmem:[#allocation166_spill] sm:$0xff] }
 0x2b2   : > { %v3379_v2 = vcombine.high %v9405_v43, %v9577_v13  ;;  %v3362_v36 = vcombine.low %v9407_v33, %v9579_v15  ;;  %v3363_v59 = vcombine.high %v9407_v33, %v9579_v15  ;;  %v12079_v0 = vcombine.low %v12077_v4, %v12078_v57 }
 0x2b3   : > { %v9699_v47 = vrot.slane %v2291_v39, %v11803_v61  ;;  %v9702_v3 = vrot.slane %v2275_v7, %v11803_v61  ;;  %v3922_v43 = vcombine.low %v9409_v5, %v9606_v9  ;;  %v9707_v13 = vrot.slane %v1811_v11, %v7368_v52 }
 0x2b4   : > { %v9662_v48 = vpop.trf.xlu1  ;;  %5684 = vrot.lane.b32.xlu0 %v1829_v27, %s6938_s27  ;;  %5666 = vrot.lane.b32.xlu1 %v12079_v0, %s6937_s25  ;;  %v2338_v33 = vcombine.low %v9672_v32, %v9669_v20  ;;  %v3923_v15 = vcombine.high %v9409_v5, %v9606_v9  ;;  %v3906_v27 = vcombine.low %v9411_v10, %v9608_v54  ;;  %v12085_v5 = vld [vmem:[#allocation74_spill] sm:$0xff] }
 0x2b5   : > { %v9664_v45 = vpop.trf.xlu0  ;;  %12080 = vst [vmem:[#allocation166_spill] sm:$0xff] %v9702_v3  ;;  %v3907_v39 = vcombine.high %v9411_v10, %v9608_v54  ;;  %v9718_v7 = vrot.slane %v2834_v46, %v11803_v61  ;;  %v9721_v0 = vrot.slane %v2835_v30, %v11803_v61  ;;  %v9724_v11 = vrot.slane %v2818_v53, %v11803_v61  ;;  %v12086_v9 = vld [vmem:[#allocation106_spill] sm:$0xff] }
 0x2b6   : > { %v9727_v24 = vrot.slane %v2819_v17, %v11803_v61  ;;  %v12087_v25 = vcombine.high %v12085_v5, %v12086_v9  ;;  %v9734_v10 = vrot.slane %v3378_v37, %v11803_v61  ;;  %v9737_v54 = vrot.slane %v3379_v2, %v11803_v61 }
 0x2b7   : > { %12081 = vst [vmem:[#allocation164_spill] sm:$0xff] %v9718_v7  ;;  %12082 = vst [vmem:[#allocation256_spill] sm:$0xff] %v9721_v0  ;;  %v9740_v46 = vrot.slane %v3362_v36, %v11803_v61  ;;  %v9743_v30 = vrot.slane %v3363_v59, %v11803_v61  ;;  %v12092_v53 = vcombine.high %v12070_v40, %v12071_v50 }
 0x2b8   : > { %12083 = vst [vmem:[#allocation257_spill] sm:$0xff] %v9724_v11  ;;  %12084 = vst [vmem:[#allocation258_spill] sm:$0xff] %v9727_v24  ;;  %5696 = vrot.lane.b32.xlu0 %v12087_v25, %s6936_s17  ;;  %v1280_v62 = vpop.trf.xlu1  ;;  %v5523_v25 = vcombine.high %v9365_v22, %v9389_v34  ;;  %v2354_v17 = vcombine.low %v9702_v3, %v9699_v47  ;;  %v9754_v37 = vrot.slane %v3922_v43, %v11803_v61 }
 0x2b9   : > { %v1248_v32 = vpop.trf.xlu0  ;;  %12088 = vst [vmem:[#allocation259_spill] sm:$0xff] %v9734_v10  ;;  %12089 = vst [vmem:[#allocation260_spill] sm:$0xff] %v9737_v54  ;;  %5678 = vrot.lane.b32.xlu1 %v12092_v53, %s6938_s27  ;;  %v1831_v2 = vcombine.high %v9552_v41, %v9675_v35  ;;  %v9759_v36 = vrot.slane %v3923_v15, %v11803_v61  ;;  %v9762_v59 = vrot.slane %v3906_v27, %v11803_v61 }
 0x2ba   : > { %12090 = vst [vmem:[#allocation261_spill] sm:$0xff] %v9740_v46  ;;  %12091 = vst [vmem:[#allocation262_spill] sm:$0xff] %v9743_v30  ;;  %v9765_v50 = vrot.slane %v3907_v39, %v11803_v61  ;;  %v4466_v40 = vcombine.low %v9415_v28, %v9662_v48  ;;  %v5506_v53 = vcombine.low %v9367_v49, %v9391_v31 }
 0x2bb   : > { %12093 = vst [vmem:[#allocation263_spill] sm:$0xff] %v9754_v37  ;;  %12094 = vst [vmem:[#allocation264_spill] sm:$0xff] %v9759_v36  ;;  %v5507_v43 = vcombine.high %v9367_v49, %v9391_v31  ;;  %v2882_v9 = vcombine.low %v9724_v11, %v9718_v7  ;;  %v2898_v15 = vcombine.low %v9727_v24, %v9721_v0  ;;  %v12106_v11 = vld [vmem:[#allocation11_spill] sm:$0xff] }
 0x2bc   : > { %12095 = vst [vmem:[#allocation265_spill] sm:$0xff] %v9762_v59  ;;  %12096 = vst [vmem:[#allocation266_spill] sm:$0xff] %v9765_v50  ;;  %5700 = vrot.lane.b32.xlu0 %v1831_v2, %s6936_s17  ;;  %v3426_v27 = vcombine.low %v9740_v46, %v9734_v10  ;;  %v3442_v39 = vcombine.low %v9743_v30, %v9737_v54  ;;  %v12097_v5 = vcombine.high %v12077_v4, %v12078_v57  ;;  %v1281_v54 = vpop.trf.xlu1  ;;  %v12107_v7 = vld [vmem:[#allocation43_spill] sm:$0xff] }
 0x2bd   : > { %v1832_v31 = vcombine.low %v9555_v44, %v9707_v13  ;;  %v9789_v49 = vrot.slane %v2338_v33, %v7368_v52  ;;  %v4467_v2 = vcombine.high %v9415_v28, %v9662_v48  ;;  %v4450_v46 = vcombine.low %v9417_v19, %v9664_v45  ;;  %v1249_v10 = vpop.trf.xlu0  ;;  %v12099_v48 = vld [vmem:[#allocation226_spill] sm:$0xff] }
 0x2be   : > { %5682 = vrot.lane.b32.xlu1 %v12097_v5, %s6938_s27  ;;  %v4451_v30 = vcombine.high %v9417_v19, %v9664_v45  ;;  %v3970_v57 = vcombine.low %v9762_v59, %v9754_v37  ;;  %v3986_v33 = vcombine.low %v9765_v50, %v9759_v36  ;;  %v9804_v5 = vrot.slane %v4466_v40, %v11803_v61  ;;  %v12100_v45 = vld [vmem:[#allocation227_spill] sm:$0xff]  ;;  %v12104_v50 = vld [vmem:[#allocation228_spill] sm:$0xff] }
 0x2bf   : > { %v9807_v28 = vrot.slane %v2354_v17, %v7368_v52  ;;  %v5010_v24 = vcombine.low %v12099_v48, %v1280_v62  ;;  %v5011_v19 = vcombine.high %v12099_v48, %v1280_v62  ;;  %v4994_v0 = vcombine.low %v12100_v45, %v1248_v32  ;;  %v12102_v59 = vld [vmem:[#allocation107_spill] sm:$0xff] }
 0x2c0   : > { %12098 = vst [vmem:[#allocation267_spill] sm:$0xff] %v9804_v5  ;;  %v4995_v4 = vcombine.high %v12100_v45, %v1248_v32  ;;  %v12103_v37 = vcombine.low %v12101_v18, %v12102_v59  ;;  %v5554_v36 = vcombine.low %v12104_v50, %v1281_v54  ;;  %v5555_v40 = vcombine.high %v12104_v50, %v1281_v54 }
 0x2c1   : > { %v5538_v17 = vcombine.low %v12105_v29, %v1249_v10  ;;  %v12108_v3 = vcombine.high %v12106_v11, %v12107_v7  ;;  %v5539_v32 = vcombine.high %v12105_v29, %v1249_v10  ;;  %v9828_v48 = vrot.slane %v2882_v9, %v7368_v52  ;;  %v12121_v29 = vld [vmem:[#allocation165_spill] sm:$0xff] }
 0x2c2   : > { %5712 = vrot.lane.b32.xlu0 %v12103_v37, %s6937_s25  ;;  %v9831_v37 = vrot.slane %v2898_v15, %v7368_v52  ;;  %v9836_v50 = vrot.slane %v4467_v2, %v11803_v61  ;;  %v9839_v45 = vrot.slane %v4450_v46, %v11803_v61  ;;  %v9847_v9 = vrot.slane %v5010_v24, %v11803_v61 }
 0x2c3   : > { %5694 = vrot.lane.b32.xlu1 %v12108_v3, %s6936_s17  ;;  %v9842_v3 = vrot.slane %v4451_v30, %v11803_v61  ;;  %v9850_v10 = vrot.slane %v5011_v19, %v11803_v61  ;;  %v9853_v15 = vrot.slane %v4994_v0, %v11803_v61  ;;  %v9856_v2 = vrot.slane %v4995_v4, %v11803_v61  ;;  %v12120_v19 = vld [vmem:[#allocation167_spill] sm:$0xff] }
 0x2c4   : > { %12109 = vst [vmem:[#allocation226_spill] sm:$0xff] %v9831_v37  ;;  %12110 = vst [vmem:[#allocation227_spill] sm:$0xff] %v9836_v50  ;;  %v9860_v46 = vrot.slane %v5554_v36, %v11803_v61  ;;  %v9863_v30 = vrot.slane %v5555_v40, %v11803_v61  ;;  %v9866_v24 = vrot.slane %v5538_v17, %v11803_v61 }
 0x2c5   : > { %12111 = vst [vmem:[#allocation75_spill] sm:$0xff] %v9839_v45  ;;  %12112 = vst [vmem:[#allocation107_spill] sm:$0xff] %v9842_v3  ;;  %v12122_v54 = vcombine.high %v12120_v19, %v12121_v29  ;;  %v9873_v0 = vrot.slane %v3426_v27, %v7368_v52  ;;  %v9876_v4 = vrot.slane %v5539_v32, %v11803_v61 }
 0x2c6   : > { %12113 = vst [vmem:[#allocation228_spill] sm:$0xff] %v9847_v9  ;;  %12114 = vst [vmem:[#allocation229_spill] sm:$0xff] %v9850_v10  ;;  %5716 = vrot.lane.b32.xlu0 %v1832_v31, %s6937_s25  ;;  %v9879_v36 = vrot.slane %v3442_v39, %v7368_v52  ;;  %v12125_v17 = vcombine.high %v9363_v6, %v9387_v38  ;;  %v12127_v27 = vcombine.low %v9365_v22, %v9389_v34 }
 0x2c7   : > { %12115 = vst [vmem:[#allocation11_spill] sm:$0xff] %v9853_v15  ;;  %12116 = vst [vmem:[#allocation43_spill] sm:$0xff] %v9856_v2  ;;  %5698 = vrot.lane.b32.xlu1 %v12122_v54, %s6936_s17  ;;  %v9898_v39 = vrot.slane %v5523_v25, %v11803_v61  ;;  %v4514_v31 = vcombine.low %v9839_v45, %v9804_v5  ;;  %v9903_v40 = vrot.slane %v5506_v53, %v11803_v61  ;;  %v12133_v53 = vld [vmem:[#allocation12_spill] sm:$0xff]  ;;  %v12243_v45 = vld [vmem:[#allocation177_spill] sm:$0xff] }
 0x2c8   : > { %12117 = vst [vmem:[#allocation268_spill] sm:$0xff] %v9860_v46  ;;  %12118 = vst [vmem:[#allocation269_spill] sm:$0xff] %v9863_v30  ;;  %v9889_v54 = vrot.slane %v12125_v17, %v11803_v61  ;;  %v9895_v32 = vrot.slane %v12127_v27, %v11803_v61  ;;  %v9906_v62 = vrot.slane %v5507_v43, %v11803_v61  ;;  %v12134_v43 = vld [vmem:[#allocation44_spill] sm:$0xff] }
 0x2c9   : > { %12119 = vst [vmem:[#allocation270_spill] sm:$0xff] %v9866_v24  ;;  %12123 = vst [vmem:[#allocation167_spill] sm:$0xff] %v9873_v0  ;;  %v12132_v38 = vcombine.high %v12101_v18, %v12102_v59  ;;  %v9913_v22 = vrot.slane %v3970_v57, %v7368_v52  ;;  %v9916_v34 = vrot.slane %v3986_v33, %v7368_v52 }
 0x2ca   : > { %12124 = vst [vmem:[#allocation165_spill] sm:$0xff] %v9876_v4  ;;  %12126 = vst [vmem:[#allocation271_spill] sm:$0xff] %v9889_v54  ;;  %v4530_v6 = vcombine.low %v9842_v3, %v9836_v50  ;;  %v5058_v25 = vcombine.low %v9853_v15, %v9847_v9  ;;  %v5074_v61 = vcombine.low %v9856_v2, %v9850_v10 }
 0x2cb   : > { %12128 = vst [vmem:[#allocation272_spill] sm:$0xff] %v9895_v32  ;;  %12129 = vst [vmem:[#allocation273_spill] sm:$0xff] %v9898_v39  ;;  %5728 = vrot.lane.b32.xlu0 %v12132_v38, %s6938_s27  ;;  %v12135_v18 = vcombine.low %v12133_v53, %v12134_v43  ;;  %v5602_v57 = vcombine.low %v9866_v24, %v9860_v46  ;;  %v5618_v33 = vcombine.low %v9876_v4, %v9863_v30  ;;  %v12137_v30 = vld [vmem:[#allocation171_spill] sm:$0xff]  ;;  %v12138_v46 = vld [vmem:[#allocation169_spill] sm:$0xff] }
 0x2cc   : > { %12130 = vst [vmem:[#allocation274_spill] sm:$0xff] %v9903_v40  ;;  %12131 = vst [vmem:[#allocation275_spill] sm:$0xff] %v9906_v62  ;;  %v1833_v17 = vcombine.high %v9555_v44, %v9707_v13  ;;  %v4498_v38 = vcombine.low %v9633_v51, %v9630_v60  ;;  %v5042_v59 = vcombine.low %v9889_v54, %v9651_v12  ;;  %v12217_v51 = vld [vmem:[#allocation73_spill] sm:$0xff] }
 0x2cd   : > { %5710 = vrot.lane.b32.xlu1 %v12135_v18, %s6937_s25  ;;  %v5026_v18 = vcombine.low %v9654_v1, %v9648_v14  ;;  %v9945_v24 = vrot.slane %v4514_v31, %v7368_v52  ;;  %v5570_v4 = vcombine.low %v9903_v40, %v9895_v32  ;;  %v5586_v44 = vcombine.low %v9906_v62, %v9898_v39  ;;  %v12151_v32 = vld [vmem:[#allocation108_spill] sm:$0xff] }
 0x2ce   : > { %v12139_v54 = vcombine.low %v12137_v30, %v12138_v46  ;;  %v12140_v31 = vcombine.low %v9598_v23, %v9591_v8  ;;  %v9967_v62 = vrot.slane %v4530_v6, %v7368_v52  ;;  %v9973_v13 = vrot.slane %v5074_v61, %v7368_v52  ;;  %v12150_v61 = vld [vmem:[#allocation76_spill] sm:$0xff]  ;;  %v5647_v23 = vpop.permute.xlu0 %5646  ;;  %v12233_v8 = vld [vmem:[#allocation238_spill] sm:$0xff] }
 0x2cf   : > { %12136 = vst [vmem:[#allocation12_spill] sm:$0xff] %v9945_v24  ;;  %5732 = vrot.lane.b32.xlu0 %v1833_v17, %s6938_s27  ;;  %v9970_v17 = vrot.slane %v5058_v25, %v7368_v52  ;;  %v9976_v27 = vrot.slane %v5602_v57, %v7368_v52  ;;  %v9982_v39 = vrot.slane %v4498_v38, %v7368_v52  ;;  %v12161_v25 = vld [vmem:[#allocation109_spill] sm:$0xff] }
 0x2d0   : > { %v9964_v40 = vrot.slane %v12140_v31, %v7368_v52  ;;  %12142 = vst [vmem:[#allocation171_spill] sm:$0xff] %v9967_v62  ;;  %12144 = vst [vmem:[#allocation276_spill] sm:$0xff] %v9973_v13  ;;  %v9985_v31 = vrot.slane %v5026_v18, %v7368_v52  ;;  %v9988_v6 = vrot.slane %v5042_v59, %v7368_v52 }
 0x2d1   : > { %5714 = vrot.lane.b32.xlu1 %v12139_v54, %s6937_s25  ;;  %12143 = vst [vmem:[#allocation169_spill] sm:$0xff] %v9970_v17  ;;  %12145 = vst [vmem:[#allocation277_spill] sm:$0xff] %v9976_v27  ;;  %v9979_v54 = vrot.slane %v5618_v33, %v7368_v52  ;;  %v12152_v57 = vcombine.high %v12150_v61, %v12151_v32  ;;  %v9997_v33 = vrot.slane %v5570_v4, %v7368_v52  ;;  %v12156_v4 = vld [vmem:[#allocation255_spill] sm:$0xff] }
 0x2d2   : > { %12141 = vst [vmem:[#allocation44_spill] sm:$0xff] %v9964_v40  ;;  %12147 = vst [vmem:[#allocation279_spill] sm:$0xff] %v9982_v39  ;;  %v10000_v38 = vrot.slane %v5586_v44, %v7368_v52  ;;  %v12155_v18 = vcombine.high %v12133_v53, %v12134_v43  ;;  %v2339_v12 = vcombine.high %v12156_v4, %v9669_v20  ;;  %v12157_v43 = vld [vmem:[#allocation230_spill] sm:$0xff]  ;;  %v12160_v4 = vld [vmem:[#allocation77_spill] sm:$0xff] }
 0x2d3   : > { %12146 = vst [vmem:[#allocation278_spill] sm:$0xff] %v9979_v54  ;;  %12148 = vst [vmem:[#allocation280_spill] sm:$0xff] %v9985_v31  ;;  %5744 = vrot.lane.b32.xlu0 %v12152_v57, %s6936_s17  ;;  %v2371_v44 = vcombine.high %v9558_v26, %v9789_v49  ;;  %v12159_v57 = vcombine.high %v12137_v30, %v12138_v46  ;;  %v12162_v10 = vcombine.low %v12160_v4, %v12161_v25  ;;  %v12163_v53 = vld [vmem:[#allocation13_spill] sm:$0xff]  ;;  %v12167_v54 = vld [vmem:[#allocation174_spill] sm:$0xff] }
 0x2d4   : > { %12149 = vst [vmem:[#allocation281_spill] sm:$0xff] %v9988_v6  ;;  %12153 = vst [vmem:[#allocation76_spill] sm:$0xff] %v9997_v33  ;;  %v2353_v20 = vrot.slane %v2339_v12, %v7368_v52  ;;  %v12168_v46 = vld [vmem:[#allocation192_spill] sm:$0xff] }
 0x2d5   : > { %12154 = vst [vmem:[#allocation108_spill] sm:$0xff] %v10000_v38  ;;  %5726 = vrot.lane.b32.xlu1 %v12155_v18, %s6938_s27  ;;  %v12158_v18 = vld [vmem:[#allocation232_spill] sm:$0xff]  ;;  %v12164_v38 = vld [vmem:[#allocation45_spill] sm:$0xff] }
 0x2d6   : > { %v2307_v59 = vcombine.high %v12158_v18, %v12157_v43  ;;  %v12165_v43 = vcombine.high %v12163_v53, %v12164_v38  ;;  %v12166_v18 = vld [vmem:[#allocation172_spill] sm:$0xff] }
 0x2d7   : > { %5748 = vrot.lane.b32.xlu0 %v2371_v44, %s6936_s17  ;;  %v2203_v33 = vcombine.high %v12167_v54, %v12166_v18  ;;  %v12169_v30 = vld [vmem:[#allocation184_spill] sm:$0xff]  ;;  %v12174_v54 = vld [vmem:[#allocation14_spill] sm:$0xff] }
 0x2d8   : > { %v2321_v2 = vrot.slane %v2307_v59, %v7368_v52  ;;  %v12171_v59 = vld [vmem:[#allocation138_spill] sm:$0xff] }
 0x2d9   : > { %5730 = vrot.lane.b32.xlu1 %v12159_v57, %s6938_s27  ;;  %v2235_v57 = vcombine.high %v12169_v30, %v12168_v46  ;;  %v2217_v12 = vrot.slane %v2203_v33, %v7368_v52  ;;  %v12175_v18 = vld [vmem:[#allocation46_spill] sm:$0xff] }
 0x2da   : > { %v2372_v44 = vcombine.low %v2321_v2, %v2353_v20  ;;  %v12176_v13 = vcombine.low %v12174_v54, %v12175_v18  ;;  %v12177_v33 = vld [vmem:[#allocation78_spill] sm:$0xff] }
 0x2db   : > { %5760 = vrot.lane.b32.xlu0 %v12162_v10, %s6937_s25  ;;  %v12170_v10 = vcombine.high %v12160_v4, %v12161_v25  ;;  %v12178_v25 = vld [vmem:[#allocation110_spill] sm:$0xff] }
 0x2dc   : > { %v12179_v4 = vcombine.high %v12177_v33, %v12178_v25 }
 0x2dd   : > { %5742 = vrot.lane.b32.xlu1 %v12165_v43, %s6936_s17  ;;  %v12172_v43 = vld [vmem:[#allocation136_spill] sm:$0xff] }
 0x2de   : > { %v12173_v27 = vcombine.high %v12171_v59, %v12172_v43  ;;  %v12183_v59 = vld [vmem:[#allocation233_spill] sm:$0xff] }
 0x2df   : > { %5764 = vrot.lane.b32.xlu0 %v2372_v44, %s6937_s25  ;;  %v2373_v44 = vcombine.high %v2321_v2, %v2353_v20  ;;  %v2375_v2 = vcombine.high %v9567_v16, %v9807_v28  ;;  %v12182_v20 = vld [vmem:[#allocation231_spill] sm:$0xff] }
 0x2e0   : > { %v2185_v6 = vrot.slane %v12173_v27, %v7368_v52  ;;  %v12180_v27 = vcombine.high %v12174_v54, %v12175_v18  ;;  %v12185_v54 = vld [vmem:[#allocation111_spill] sm:$0xff] }
 0x2e1   : > { %5746 = vrot.lane.b32.xlu1 %v2235_v57, %s6936_s17  ;;  %v12181_v57 = vld [vmem:[#allocation166_spill] sm:$0xff] }
 0x2e2   : > { %v2236_v1 = vcombine.low %v2185_v6, %v2217_v12 }
 0x2e3   : > { %5776 = vrot.lane.b32.xlu0 %v12170_v10, %s6938_s27  ;;  %v2355_v10 = vcombine.high %v12181_v57, %v9699_v47  ;;  %v12190_v57 = vld [vmem:[#allocation173_spill] sm:$0xff] }
 0x2e5   : > { %5758 = vrot.lane.b32.xlu1 %v12176_v13, %s6937_s25  ;;  %v2237_v13 = vcombine.high %v2185_v6, %v2217_v12  ;;  %v2369_v43 = vrot.slane %v2355_v10, %v7368_v52 }
 0x2e7   : > { %5780 = vrot.lane.b32.xlu0 %v2373_v44, %s6938_s27  ;;  %v12184_v44 = vld [vmem:[#allocation79_spill] sm:$0xff] }
 0x2e8   : > { %v12186_v18 = vcombine.low %v12184_v44, %v12185_v54 }
 0x2e9   : > { %5762 = vrot.lane.b32.xlu1 %v2236_v1, %s6937_s25  ;;  %v2323_v1 = vcombine.high %v12183_v59, %v12182_v20  ;;  %v12191_v20 = vld [vmem:[#allocation175_spill] sm:$0xff]  ;;  %v12192_v59 = vld [vmem:[#allocation193_spill] sm:$0xff] }
 0x2eb   : > { %5792 = vrot.lane.b32.xlu0 %v12179_v4, %s6936_s17  ;;  %v2337_v47 = vrot.slane %v2323_v1, %v7368_v52  ;;  %v12187_v4 = vld [vmem:[#allocation15_spill] sm:$0xff]  ;;  %v12194_v1 = vcombine.high %v12184_v44, %v12185_v54  ;;  %v12202_v44 = vld [vmem:[#allocation112_spill] sm:$0xff] }
 0x2ed   : > { %5774 = vrot.lane.b32.xlu1 %v12180_v27, %s6938_s27  ;;  %v12188_v27 = vld [vmem:[#allocation47_spill] sm:$0xff]  ;;  %v2376_v12 = vcombine.low %v2337_v47, %v2369_v43 }
 0x2ee   : > { %v12189_v6 = vcombine.high %v12187_v4, %v12188_v27 }
 0x2ef   : > { %5796 = vrot.lane.b32.xlu0 %v2375_v2, %s6936_s17  ;;  %v2219_v2 = vcombine.high %v12191_v20, %v12190_v57  ;;  %v12198_v57 = vld [vmem:[#allocation16_spill] sm:$0xff] }
 0x2f0   : > { %v12199_v20 = vld [vmem:[#allocation48_spill] sm:$0xff] }
 0x2f1   : > { %5778 = vrot.lane.b32.xlu1 %v2237_v13, %s6938_s27  ;;  %v12193_v13 = vld [vmem:[#allocation185_spill] sm:$0xff]  ;;  %v2233_v10 = vrot.slane %v2219_v2, %v7368_v52  ;;  %v12200_v15 = vcombine.low %v12198_v57, %v12199_v20  ;;  %v12205_v2 = vld [vmem:[#allocation164_spill] sm:$0xff] }
 0x2f2   : > { %v2239_v14 = vcombine.high %v12193_v13, %v12192_v59 }
 0x2f3   : > { %5808 = vrot.lane.b32.xlu0 %v12186_v18, %s6937_s25  ;;  %v12195_v18 = vld [vmem:[#allocation139_spill] sm:$0xff] }
 0x2f5   : > { %5790 = vrot.lane.b32.xlu1 %v12189_v6, %s6936_s17  ;;  %v12196_v6 = vld [vmem:[#allocation137_spill] sm:$0xff] }
 0x2f6   : > { %v12197_v31 = vcombine.high %v12195_v18, %v12196_v6  ;;  %v12208_v6 = vld [vmem:[#allocation235_spill] sm:$0xff] }
 0x2f7   : > { %5812 = vrot.lane.b32.xlu0 %v2376_v12, %s6937_s25  ;;  %v2377_v12 = vcombine.high %v2337_v47, %v2369_v43  ;;  %v12207_v47 = vld [vmem:[#allocation234_spill] sm:$0xff] }
 0x2f8   : > { %v2201_v17 = vrot.slane %v12197_v31, %v7368_v52  ;;  %v12204_v31 = vcombine.high %v12198_v57, %v12199_v20  ;;  %v12210_v57 = vld [vmem:[#allocation113_spill] sm:$0xff] }
 0x2f9   : > { %5794 = vrot.lane.b32.xlu1 %v2239_v14, %s6936_s17  ;;  %v12201_v14 = vld [vmem:[#allocation80_spill] sm:$0xff] }
 0x2fa   : > { %v2240_v9 = vcombine.low %v2201_v17, %v2233_v10  ;;  %v12203_v54 = vcombine.high %v12201_v14, %v12202_v44  ;;  %v2241_v43 = vcombine.high %v2201_v17, %v2233_v10 }
 0x2fb   : > { %5824 = vrot.lane.b32.xlu0 %v12194_v1, %s6938_s27  ;;  %v12206_v1 = vld [vmem:[#allocation257_spill] sm:$0xff] }
 0x2fc   : > { %v2883_v18 = vcombine.high %v12206_v1, %v12205_v2  ;;  %v12212_v2 = vld [vmem:[#allocation17_spill] sm:$0xff] }
 0x2fd   : > { %5806 = vrot.lane.b32.xlu1 %v12200_v15, %s6937_s25  ;;  %v2915_v15 = vcombine.high %v9586_v21, %v9828_v48  ;;  %v12213_v1 = vld [vmem:[#allocation49_spill] sm:$0xff] }
 0x2fe   : > { %v12214_v17 = vcombine.high %v12212_v2, %v12213_v1 }
 0x2ff   : > { %5828 = vrot.lane.b32.xlu0 %v2377_v12, %s6938_s27  ;;  %v2897_v12 = vrot.slane %v2883_v18, %v7368_v52 }
 0x301   : > { %5810 = vrot.lane.b32.xlu1 %v2240_v9, %s6937_s25  ;;  %v2851_v9 = vcombine.high %v12208_v6, %v12207_v47  ;;  %v12215_v47 = vld [vmem:[#allocation176_spill] sm:$0xff]  ;;  %v12216_v6 = vld [vmem:[#allocation178_spill] sm:$0xff] }
 0x303   : > { %5840 = vrot.lane.b32.xlu0 %v12203_v54, %s6936_s17  ;;  %v12209_v54 = vld [vmem:[#allocation81_spill] sm:$0xff] }
 0x304   : > { %v12211_v20 = vcombine.low %v12209_v54, %v12210_v57 }
 0x305   : > { %5822 = vrot.lane.b32.xlu1 %v12204_v31, %s6938_s27  ;;  %v2865_v31 = vrot.slane %v2851_v9, %v7368_v52  ;;  %v12219_v9 = vcombine.high %v12209_v54, %v12210_v57  ;;  %v12226_v54 = vld [vmem:[#allocation82_spill] sm:$0xff] }
 0x306   : > { %v12227_v57 = vld [vmem:[#allocation114_spill] sm:$0xff] }
 0x307   : > { %5844 = vrot.lane.b32.xlu0 %v2915_v15, %s6936_s17  ;;  %v2916_v10 = vcombine.low %v2865_v31, %v2897_v12  ;;  %v2747_v15 = vcombine.high %v12216_v6, %v12215_v47  ;;  %v12223_v47 = vld [vmem:[#allocation18_spill] sm:$0xff] }
 0x308   : > { %v12224_v6 = vld [vmem:[#allocation50_spill] sm:$0xff] }
 0x309   : > { %5826 = vrot.lane.b32.xlu1 %v2241_v43, %s6938_s27  ;;  %v12218_v43 = vld [vmem:[#allocation188_spill] sm:$0xff]  ;;  %v2761_v18 = vrot.slane %v2747_v15, %v7368_v52  ;;  %v12225_v3 = vcombine.low %v12223_v47, %v12224_v6  ;;  %v12228_v15 = vcombine.high %v12226_v54, %v12227_v57 }
 0x30a   : > { %v2779_v60 = vcombine.high %v12218_v43, %v12217_v51  ;;  %v12245_v51 = vld [vmem:[#allocation236_spill] sm:$0xff] }
 0x30b   : > { %5856 = vrot.lane.b32.xlu0 %v12211_v20, %s6937_s25  ;;  %v12220_v20 = vld [vmem:[#allocation142_spill] sm:$0xff] }
 0x30d   : > { %5838 = vrot.lane.b32.xlu1 %v12214_v17, %s6936_s17  ;;  %v12221_v17 = vld [vmem:[#allocation140_spill] sm:$0xff] }
 0x30e   : > { %v12222_v39 = vcombine.high %v12220_v20, %v12221_v17  ;;  %v5665_v20 = vpop.permute.xlu0 %5664  ;;  %v2919_v17 = vcombine.high %v9611_v63, %v9831_v37  ;;  %v12241_v37 = vld [vmem:[#allocation51_spill] sm:$0xff] }
 0x30f   : > { %5860 = vrot.lane.b32.xlu0 %v2916_v10, %s6937_s25  ;;  %v2917_v10 = vcombine.high %v2865_v31, %v2897_v12  ;;  %v12231_v12 = vld [vmem:[#allocation258_spill] sm:$0xff] }
 0x310   : > { %v2729_v62 = vrot.slane %v12222_v39, %v7368_v52  ;;  %v12229_v39 = vcombine.high %v12223_v47, %v12224_v6 }
 0x311   : > { %5842 = vrot.lane.b32.xlu1 %v2779_v60, %s6936_s17  ;;  %v5649_v60 = vpop.permute.xlu1 %5648 }
 0x312   : > { %v2780_v50 = vcombine.low %v2729_v62, %v2761_v18 }
 0x313   : > { %5872 = vrot.lane.b32.xlu0 %v12219_v9, %s6938_s27 }
 0x315   : > { %5854 = vrot.lane.b32.xlu1 %v12225_v3, %s6937_s25  ;;  %v12230_v3 = vld [vmem:[#allocation256_spill] sm:$0xff]  ;;  %v5651_v9 = vpop.permute.xlu1 %5650 }
 0x316   : > { %v2899_v31 = vcombine.high %v12231_v12, %v12230_v3  ;;  %v12235_v3 = vld [vmem:[#allocation115_spill] sm:$0xff] }
 0x317   : > { %5876 = vrot.lane.b32.xlu0 %v2917_v10, %s6938_s27  ;;  %v2781_v10 = vcombine.high %v2729_v62, %v2761_v18  ;;  %v12238_v18 = vld [vmem:[#allocation104_spill] sm:$0xff] }
 0x318   : > { %v2913_v6 = vrot.slane %v2899_v31, %v7368_v52 }
 0x319   : > { %5858 = vrot.lane.b32.xlu1 %v2780_v50, %s6937_s25  ;;  %v12232_v50 = vld [vmem:[#allocation237_spill] sm:$0xff] }
 0x31a   : > { %v2867_v40 = vcombine.high %v12233_v8, %v12232_v50  ;;  %v12237_v8 = vld [vmem:[#allocation8_spill] sm:$0xff]  ;;  %v12240_v50 = vld [vmem:[#allocation19_spill] sm:$0xff] }
 0x31b   : > { %5888 = vrot.lane.b32.xlu0 %v12228_v15, %s6936_s17  ;;  %v12242_v63 = vcombine.high %v12240_v50, %v12241_v37 }
 0x31c   : > { %v2881_v62 = vrot.slane %v2867_v40, %v7368_v52  ;;  %v12246_v40 = vld [vmem:[#allocation245_spill] sm:$0xff] }
 0x31d   : > { %5870 = vrot.lane.b32.xlu1 %v12229_v39, %s6938_s27  ;;  %v12234_v39 = vld [vmem:[#allocation83_spill] sm:$0xff]  ;;  %v12247_v43 = vcombine.low %v12245_v51, %v12246_v40  ;;  %v12257_v40 = vld [vmem:[#allocation9_spill] sm:$0xff] }
 0x31e   : > { %v5653_v15 = vpop.permute.xlu1 %5652  ;;  %v5669_v47 = vpop.permute.xlu0 %5668  ;;  %v12236_v12 = vcombine.low %v12234_v39, %v12235_v3  ;;  %v2920_v24 = vcombine.low %v2881_v62, %v2913_v6 }
 0x31f   : > { %5892 = vrot.lane.b32.xlu0 %v2919_v17, %s6936_s17  ;;  %v12239_v17 = vcombine.low %v12237_v8, %v12238_v18  ;;  %v6414_v8 = vsel %vm6410_vm0, %v12247_v43, %v5653_v15  ;;  %v12248_v18 = vld [vmem:[#allocation200_spill] sm:$0xff]  ;;  %v12251_v15 = vld [vmem:[#allocation143_spill] sm:$0xff] }
 0x321   : > { %5874 = vrot.lane.b32.xlu1 %v2781_v10, %s6938_s27  ;;  %v6412_v10 = vsel %vm6410_vm0, %v12239_v17, %v5649_v60  ;;  %v12249_v17 = vld [vmem:[#allocation189_spill] sm:$0xff] }
 0x322   : > { %v6417_v31 = vsel %vm6415_vm1, %v6412_v10, %v5665_v20  ;;  %v5663_v57 = vpop.permute.xlu1 %5662  ;;  %v5681_v54 = vpop.permute.xlu0 %5680  ;;  %v2783_v1 = vcombine.high %v12249_v17, %v12248_v18  ;;  %v12250_v20 = vcombine.high %v12234_v39, %v12235_v3 }
 0x323   : > { %5904 = vrot.lane.b32.xlu0 %v12236_v12, %s6937_s25  ;;  %v12244_v12 = vld [vmem:[#allocation179_spill] sm:$0xff]  ;;  %v6422_v60 = vsel %vm6420_vm2, %v6417_v31, %v5681_v54  ;;  %v12255_v31 = vld [vmem:[#allocation52_spill] sm:$0xff] }
 0x324   : > { %v2763_v5 = vcombine.high %v12244_v12, %v12243_v45  ;;  %6621 = vst [vmem:[%s10193_s29 + $0x80] sm:$0xff] %v6422_v60 }
 0x325   : > { %5886 = vrot.lane.b32.xlu1 %v12242_v63, %s6936_s17  ;;  %v6419_v63 = vsel %vm6415_vm1, %v6414_v8, %v5669_v47  ;;  %v12254_v47 = vld [vmem:[#allocation20_spill] sm:$0xff]  ;;  %v12258_v8 = vld [vmem:[#allocation41_spill] sm:$0xff] }
 0x326   : > { %v5685_v45 = vpop.permute.xlu0 %5684  ;;  %v5667_v51 = vpop.permute.xlu1 %5666  ;;  %v2777_v54 = vrot.slane %v2763_v5, %v7368_v52  ;;  %v12256_v12 = vcombine.low %v12254_v47, %v12255_v31  ;;  %v12259_v60 = vcombine.low %v12257_v40, %v12258_v8  ;;  %v12264_v8 = vld [vmem:[#allocation116_spill] sm:$0xff] }
 0x327   : > { %5908 = vrot.lane.b32.xlu0 %v2920_v24, %s6937_s25  ;;  %v6424_v43 = vsel %vm6420_vm2, %v6419_v63, %v5685_v45  ;;  %v12252_v24 = vld [vmem:[#allocation141_spill] sm:$0xff]  ;;  %v2921_v45 = vcombine.high %v2881_v62, %v2913_v6  ;;  %v12263_v62 = vld [vmem:[#allocation84_spill] sm:$0xff] }
 0x328   : > { %6653 = vst [vmem:[%s10193_s29 + $0x180] sm:$0xff] %v6424_v43  ;;  %v12253_v10 = vcombine.high %v12251_v15, %v12252_v24  ;;  %v6411_v5 = vsel %vm6410_vm0, %v12259_v60, %v5647_v23  ;;  %v12260_v15 = vld [vmem:[#allocation170_spill] sm:$0xff]  ;;  %v12261_v24 = vld [vmem:[#allocation168_spill] sm:$0xff]  ;;  %v12265_v60 = vcombine.high %v12263_v62, %v12264_v8 }
 0x329   : > { %5890 = vrot.lane.b32.xlu1 %v2783_v1, %s6936_s17  ;;  %v6416_v39 = vsel %vm6415_vm1, %v6411_v5, %v5663_v57  ;;  %v12266_v5 = vcombine.high %v12254_v47, %v12255_v31  ;;  %v12282_v62 = vld [vmem:[#allocation202_spill] sm:$0xff] }
 0x32a   : > { %v2745_v1 = vrot.slane %v12253_v10, %v7368_v52  ;;  %v5697_v63 = vpop.permute.xlu0 %5696  ;;  %v12262_v10 = vcombine.low %v12260_v15, %v12261_v24  ;;  %v12269_v15 = vld [vmem:[#allocation239_spill] sm:$0xff]  ;;  %v12270_v24 = vld [vmem:[#allocation241_spill] sm:$0xff] }
 0x32b   : > { %5920 = vrot.lane.b32.xlu0 %v12250_v20, %s6938_s27  ;;  %v5679_v3 = vpop.permute.xlu1 %5678 }
 0x32c   : > { %v2784_v43 = vcombine.low %v2745_v1, %v2777_v54  ;;  %v6421_v20 = vsel %vm6420_vm2, %v6416_v39, %v5679_v3  ;;  %v12268_v39 = vld [vmem:[#allocation261_spill] sm:$0xff] }
 0x32d   : > { %5902 = vrot.lane.b32.xlu1 %v12256_v12, %s6937_s25  ;;  %6605 = vst [vmem:[%s10193_s29] sm:$0xff] %v6421_v20  ;;  %v6413_v12 = vsel %vm6410_vm0, %v12262_v10, %v5651_v9  ;;  %v2785_v20 = vcombine.high %v2745_v1, %v2777_v54  ;;  %v3395_v10 = vcombine.high %v12270_v24, %v12269_v15  ;;  %v12274_v54 = vld [vmem:[#allocation74_spill] sm:$0xff] }
 0x32e   : > { %v5701_v23 = vpop.permute.xlu0 %5700  ;;  %v6418_v40 = vsel %vm6415_vm1, %v6413_v12, %v5667_v51  ;;  %v3459_v51 = vcombine.high %v9614_v55, %v9873_v0  ;;  %v12275_v1 = vld [vmem:[#allocation106_spill] sm:$0xff]  ;;  %v12280_v0 = vld [vmem:[#allocation180_spill] sm:$0xff] }
 0x32f   : > { %5924 = vrot.lane.b32.xlu0 %v2921_v45, %s6938_s27  ;;  %v12267_v45 = vld [vmem:[#allocation259_spill] sm:$0xff]  ;;  %v12281_v55 = vld [vmem:[#allocation182_spill] sm:$0xff] }
 0x330   : > { %v5683_v6 = vpop.permute.xlu1 %5682  ;;  %v3427_v9 = vcombine.high %v12268_v39, %v12267_v45  ;;  %v12277_v39 = vld [vmem:[#allocation21_spill] sm:$0xff] }
 0x331   : > { %5906 = vrot.lane.b32.xlu1 %v2784_v43, %s6937_s25  ;;  %v6423_v57 = vsel %vm6420_vm2, %v6418_v40, %v5683_v6  ;;  %v12271_v40 = vld [vmem:[#allocation85_spill] sm:$0xff] }
 0x332   : > { %6637 = vst [vmem:[%s10193_s29 + $0x100] sm:$0xff] %v6423_v57  ;;  %v3441_v47 = vrot.slane %v3427_v9, %v7368_v52  ;;  %v12272_v6 = vld [vmem:[#allocation117_spill] sm:$0xff] }
 0x333   : > { %5936 = vrot.lane.b32.xlu0 %v12265_v60, %s6936_s17  ;;  %v12273_v57 = vcombine.low %v12271_v40, %v12272_v6  ;;  %v3409_v60 = vrot.slane %v3395_v10, %v7368_v52 }
 0x334   : > { %v5713_v3 = vpop.permute.xlu0 %5712 }
 0x335   : > { %5918 = vrot.lane.b32.xlu1 %v12266_v5, %s6938_s27  ;;  %v5695_v43 = vpop.permute.xlu1 %5694  ;;  %v12276_v5 = vcombine.low %v12274_v54, %v12275_v1  ;;  %v3460_v24 = vcombine.low %v3409_v60, %v3441_v47  ;;  %v12283_v54 = vld [vmem:[#allocation208_spill] sm:$0xff] }
 0x336   : > { %v3323_v1 = vcombine.high %v12283_v54, %v12282_v62 }
 0x337   : > { %5940 = vrot.lane.b32.xlu0 %v3459_v51, %s6936_s17  ;;  %v6426_v45 = vsel %vm6410_vm0, %v12276_v5, %v5697_v63  ;;  %v12278_v51 = vld [vmem:[#allocation53_spill] sm:$0xff]  ;;  %v12284_v63 = vcombine.low %v9552_v41, %v9675_v35  ;;  %v12286_v41 = vld [vmem:[#allocation146_spill] sm:$0xff]  ;;  %v12287_v35 = vld [vmem:[#allocation144_spill] sm:$0xff] }
 0x338   : > { %v5717_v12 = vpop.permute.xlu0 %5716  ;;  %v6430_v9 = vsel %vm6415_vm1, %v6426_v45, %v5713_v3 }
 0x339   : > { %5922 = vrot.lane.b32.xlu1 %v2785_v20, %s6938_s27  ;;  %v5699_v31 = vpop.permute.xlu1 %5698  ;;  %v12279_v20 = vcombine.high %v12277_v39, %v12278_v51  ;;  %v6428_v3 = vsel %vm6410_vm0, %v12284_v63, %v5701_v23  ;;  %v12288_v23 = vcombine.high %v12286_v41, %v12287_v35 }
 0x33a   : > { %v6432_v5 = vsel %vm6415_vm1, %v6428_v3, %v5717_v12  ;;  %v12289_v12 = vld [vmem:[#allocation22_spill] sm:$0xff]  ;;  %v3461_v3 = vcombine.high %v3409_v60, %v3441_v47 }
 0x33b   : > { %5952 = vrot.lane.b32.xlu0 %v12273_v57, %s6937_s25  ;;  %v3291_v57 = vcombine.high %v12281_v55, %v12280_v0  ;;  %v12294_v60 = vld [vmem:[#allocation86_spill] sm:$0xff] }
 0x33d   : > { %5934 = vrot.lane.b32.xlu1 %v12279_v20, %s6936_s17  ;;  %v5729_v15 = vpop.permute.xlu0 %5728  ;;  %v3305_v20 = vrot.slane %v3291_v57, %v7368_v52 }
 0x33e   : > { %v6434_v10 = vsel %vm6420_vm2, %v6430_v9, %v5729_v15  ;;  %v12285_v9 = vcombine.high %v12271_v40, %v12272_v6  ;;  %v3273_v15 = vrot.slane %v12288_v23, %v7368_v52 }
 0x33f   : > { %v5711_v8 = vpop.permute.xlu1 %5710  ;;  %6622 = vst [vmem:[%s10193_s29 + $0x88] sm:$0xff] %v6434_v10  ;;  %5956 = vrot.lane.b32.xlu0 %v3460_v24, %s6937_s25  ;;  %v12290_v24 = vld [vmem:[#allocation54_spill] sm:$0xff] }
 0x340   : > { %v12291_v10 = vcombine.low %v12289_v12, %v12290_v24  ;;  %v12297_v35 = vcombine.high %v12289_v12, %v12290_v24 }
 0x341   : > { %5938 = vrot.lane.b32.xlu1 %v3323_v1, %s6936_s17  ;;  %v5733_v45 = vpop.permute.xlu0 %5732  ;;  %v12292_v1 = vcombine.low %v12106_v11, %v12107_v7 }
 0x342   : > { %v6436_v0 = vsel %vm6420_vm2, %v6432_v5, %v5733_v45  ;;  %v3324_v5 = vcombine.low %v3273_v15, %v3305_v20 }
 0x343   : > { %v5715_v55 = vpop.permute.xlu1 %5714  ;;  %6654 = vst [vmem:[%s10193_s29 + $0x188] sm:$0xff] %v6436_v0  ;;  %5968 = vrot.lane.b32.xlu0 %v12285_v9, %s6938_s27  ;;  %v6425_v57 = vsel %vm6410_vm0, %v12292_v1, %v5695_v43  ;;  %v12293_v0 = vcombine.low %v12120_v19, %v12121_v29  ;;  %v12295_v9 = vld [vmem:[#allocation118_spill] sm:$0xff]  ;;  %v12298_v29 = vld [vmem:[#allocation260_spill] sm:$0xff]  ;;  %v3325_v1 = vcombine.high %v3273_v15, %v3305_v20 }
 0x344   : > { %v6429_v40 = vsel %vm6415_vm1, %v6425_v57, %v5711_v8  ;;  %v12296_v41 = vcombine.high %v12294_v60, %v12295_v9  ;;  %v12299_v19 = vld [vmem:[#allocation262_spill] sm:$0xff]  ;;  %v12300_v57 = vld [vmem:[#allocation240_spill] sm:$0xff]  ;;  %v12305_v20 = vcombine.low %v12150_v61, %v12151_v32  ;;  %v12312_v32 = vld [vmem:[#allocation209_spill] sm:$0xff] }
 0x345   : > { %5950 = vrot.lane.b32.xlu1 %v12291_v10, %s6937_s25  ;;  %v5745_v63 = vpop.permute.xlu0 %5744  ;;  %v6427_v7 = vsel %vm6410_vm0, %v12293_v0, %v5699_v31  ;;  %v3443_v31 = vcombine.high %v12299_v19, %v12298_v29  ;;  %v12309_v19 = vld [vmem:[#allocation181_spill] sm:$0xff] }
 0x346   : > { %v6431_v43 = vsel %vm6415_vm1, %v6427_v7, %v5715_v55  ;;  %v3463_v55 = vcombine.high %v9617_v42, %v9879_v36  ;;  %v6438_v15 = vsel %vm6410_vm0, %v12305_v20, %v5745_v63  ;;  %v12313_v63 = vcombine.low %v9558_v26, %v9789_v49  ;;  %v12315_v26 = vld [vmem:[#allocation147_spill] sm:$0xff]  ;;  %v12316_v49 = vld [vmem:[#allocation145_spill] sm:$0xff] }
 0x347   : > { %v5727_v6 = vpop.permute.xlu1 %5726  ;;  %5972 = vrot.lane.b32.xlu0 %v3461_v3, %s6938_s27  ;;  %v12301_v3 = vld [vmem:[#allocation242_spill] sm:$0xff]  ;;  %v3457_v12 = vrot.slane %v3443_v31, %v7368_v52  ;;  %v12310_v31 = vld [vmem:[#allocation183_spill] sm:$0xff] }
 0x348   : > { %v6433_v45 = vsel %vm6420_vm2, %v6429_v40, %v5727_v6  ;;  %v3411_v40 = vcombine.high %v12301_v3, %v12300_v57  ;;  %v12311_v3 = vld [vmem:[#allocation203_spill] sm:$0xff] }
 0x349   : > { %6606 = vst [vmem:[%s10193_s29 + $0x8] sm:$0xff] %v6433_v45  ;;  %5954 = vrot.lane.b32.xlu1 %v3324_v5, %s6937_s25  ;;  %v5749_v11 = vpop.permute.xlu0 %5748  ;;  %v12302_v5 = vld [vmem:[#allocation87_spill] sm:$0xff]  ;;  %v3327_v61 = vcombine.high %v12312_v32, %v12311_v3 }
 0x34a   : > { %v12303_v45 = vld [vmem:[#allocation119_spill] sm:$0xff]  ;;  %v3425_v7 = vrot.slane %v3411_v40, %v7368_v52 }
 0x34b   : > { %v5731_v47 = vpop.permute.xlu1 %5730  ;;  %5984 = vrot.lane.b32.xlu0 %v12296_v41, %s6936_s17  ;;  %v12304_v0 = vcombine.low %v12302_v5, %v12303_v45 }
 0x34c   : > { %v6435_v8 = vsel %vm6420_vm2, %v6431_v43, %v5731_v47  ;;  %v12306_v43 = vld [vmem:[#allocation23_spill] sm:$0xff]  ;;  %v3464_v29 = vcombine.low %v3425_v7, %v3457_v12 }
 0x34d   : > { %6638 = vst [vmem:[%s10193_s29 + $0x108] sm:$0xff] %v6435_v8  ;;  %5966 = vrot.lane.b32.xlu1 %v12297_v35, %s6938_s27  ;;  %v5761_v23 = vpop.permute.xlu0 %5760  ;;  %v12307_v47 = vld [vmem:[#allocation55_spill] sm:$0xff] }
 0x34e   : > { %v12308_v8 = vcombine.high %v12306_v43, %v12307_v47  ;;  %v6442_v41 = vsel %vm6415_vm1, %v6438_v15, %v5761_v23  ;;  %v6440_v23 = vsel %vm6410_vm0, %v12313_v63, %v5749_v11  ;;  %v12317_v11 = vcombine.high %v12315_v26, %v12316_v49 }
 0x34f   : > { %v5743_v10 = vpop.permute.xlu1 %5742  ;;  %5988 = vrot.lane.b32.xlu0 %v3463_v55, %s6936_s17  ;;  %v3307_v55 = vcombine.high %v12310_v31, %v12309_v19  ;;  %v12321_v31 = vcombine.low %v12163_v53, %v12164_v38 }
 0x351   : > { %5970 = vrot.lane.b32.xlu1 %v3325_v1, %s6938_s27  ;;  %v5765_v6 = vpop.permute.xlu0 %5764 }
 0x352   : > { %v6444_v40 = vsel %vm6415_vm1, %v6440_v23, %v5765_v6  ;;  %v12318_v6 = vld [vmem:[#allocation24_spill] sm:$0xff] }
 0x353   : > { %v5747_v24 = vpop.permute.xlu1 %5746  ;;  %6000 = vrot.lane.b32.xlu0 %v12304_v0, %s6937_s25 }
 0x355   : > { %5982 = vrot.lane.b32.xlu1 %v12308_v8, %s6936_s17  ;;  %v5777_v35 = vpop.permute.xlu0 %5776  ;;  %v3321_v8 = vrot.slane %v3307_v55, %v7368_v52  ;;  %v6437_v55 = vsel %vm6410_vm0, %v12321_v31, %v5743_v10  ;;  %v12330_v31 = vld [vmem:[#allocation244_spill] sm:$0xff] }
 0x356   : > { %v6446_v57 = vsel %vm6420_vm2, %v6442_v41, %v5777_v35  ;;  %v12314_v41 = vcombine.high %v12302_v5, %v12303_v45  ;;  %v3289_v35 = vrot.slane %v12317_v11, %v7368_v52 }
 0x357   : > { %v5759_v1 = vpop.permute.xlu1 %5758  ;;  %6623 = vst [vmem:[%s10193_s29 + $0x90] sm:$0xff] %v6446_v57  ;;  %6004 = vrot.lane.b32.xlu0 %v3464_v29, %s6937_s25  ;;  %v12319_v29 = vld [vmem:[#allocation56_spill] sm:$0xff] }
 0x358   : > { %v12320_v19 = vcombine.low %v12318_v6, %v12319_v29  ;;  %v6441_v5 = vsel %vm6415_vm1, %v6437_v55, %v5759_v1  ;;  %v3328_v63 = vcombine.low %v3289_v35, %v3321_v8  ;;  %v12323_v1 = vld [vmem:[#allocation88_spill] sm:$0xff]  ;;  %v3329_v11 = vcombine.high %v3289_v35, %v3321_v8 }
 0x359   : > { %5986 = vrot.lane.b32.xlu1 %v3327_v61, %s6936_s17  ;;  %v5781_v0 = vpop.permute.xlu0 %5780  ;;  %v3465_v61 = vcombine.high %v3425_v7, %v3457_v12  ;;  %v12334_v8 = vcombine.low %v12177_v33, %v12178_v25  ;;  %v12341_v33 = vld [vmem:[#allocation212_spill] sm:$0xff] }
 0x35a   : > { %v6448_v15 = vsel %vm6420_vm2, %v6444_v40, %v5781_v0  ;;  %v12322_v40 = vcombine.low %v12169_v30, %v12168_v46  ;;  %v12324_v0 = vld [vmem:[#allocation120_spill] sm:$0xff]  ;;  %v12327_v46 = vld [vmem:[#allocation263_spill] sm:$0xff]  ;;  %v12328_v30 = vld [vmem:[#allocation265_spill] sm:$0xff] }
 0x35b   : > { %v5763_v20 = vpop.permute.xlu1 %5762  ;;  %6655 = vst [vmem:[%s10193_s29 + $0x190] sm:$0xff] %v6448_v15  ;;  %6016 = vrot.lane.b32.xlu0 %v12314_v41, %s6938_s27  ;;  %v12325_v15 = vcombine.high %v12323_v1, %v12324_v0  ;;  %v12326_v41 = vcombine.high %v12318_v6, %v12319_v29 }
 0x35c   : > { %v6439_v38 = vsel %vm6410_vm0, %v12322_v40, %v5747_v24  ;;  %v3971_v24 = vcombine.high %v12328_v30, %v12327_v46  ;;  %v12335_v40 = vld [vmem:[#allocation25_spill] sm:$0xff]  ;;  %v12339_v46 = vld [vmem:[#allocation187_spill] sm:$0xff] }
 0x35d   : > { %5998 = vrot.lane.b32.xlu1 %v12320_v19, %s6937_s25  ;;  %v5793_v57 = vpop.permute.xlu0 %5792  ;;  %v6443_v10 = vsel %vm6415_vm1, %v6439_v38, %v5763_v20  ;;  %v4003_v20 = vcombine.high %v9620_v58, %v9913_v22  ;;  %v12329_v19 = vld [vmem:[#allocation243_spill] sm:$0xff]  ;;  %v12336_v38 = vld [vmem:[#allocation57_spill] sm:$0xff] }
 0x35e   : > { %v3939_v55 = vcombine.high %v12330_v31, %v12329_v19  ;;  %v3985_v6 = vrot.slane %v3971_v24, %v7368_v52  ;;  %v6450_v35 = vsel %vm6410_vm0, %v12334_v8, %v5793_v57  ;;  %v12342_v57 = vcombine.low %v9567_v16, %v9807_v28  ;;  %v12344_v16 = vld [vmem:[#allocation150_spill] sm:$0xff]  ;;  %v12345_v28 = vld [vmem:[#allocation148_spill] sm:$0xff] }
 0x35f   : > { %v5775_v45 = vpop.permute.xlu1 %5774  ;;  %6020 = vrot.lane.b32.xlu0 %v3465_v61, %s6938_s27 }
 0x360   : > { %v6445_v23 = vsel %vm6420_vm2, %v6441_v5, %v5775_v45  ;;  %v12331_v5 = vld [vmem:[#allocation89_spill] sm:$0xff] }
 0x361   : > { %6607 = vst [vmem:[%s10193_s29 + $0x10] sm:$0xff] %v6445_v23  ;;  %6002 = vrot.lane.b32.xlu1 %v3328_v63, %s6937_s25  ;;  %v5797_v53 = vpop.permute.xlu0 %5796  ;;  %v12332_v45 = vld [vmem:[#allocation121_spill] sm:$0xff]  ;;  %v3953_v23 = vrot.slane %v3939_v55, %v7368_v52 }
 0x362   : > { %v12333_v63 = vcombine.low %v12331_v5, %v12332_v45 }
 0x363   : > { %v5779_v12 = vpop.permute.xlu1 %5778  ;;  %6032 = vrot.lane.b32.xlu0 %v12325_v15, %s6936_s17  ;;  %v4004_v15 = vcombine.low %v3953_v23, %v3985_v6 }
 0x364   : > { %v6447_v7 = vsel %vm6420_vm2, %v6443_v10, %v5779_v12  ;;  %v12337_v10 = vcombine.high %v12335_v40, %v12336_v38 }
 0x365   : > { %6639 = vst [vmem:[%s10193_s29 + $0x110] sm:$0xff] %v6447_v7  ;;  %6014 = vrot.lane.b32.xlu1 %v12326_v41, %s6938_s27  ;;  %v5809_v26 = vpop.permute.xlu0 %5808  ;;  %v12338_v41 = vld [vmem:[#allocation186_spill] sm:$0xff] }
 0x366   : > { %v6454_v12 = vsel %vm6415_vm1, %v6450_v35, %v5809_v26  ;;  %v3835_v30 = vcombine.high %v12339_v46, %v12338_v41  ;;  %v6452_v26 = vsel %vm6410_vm0, %v12342_v57, %v5797_v53  ;;  %v12343_v35 = vcombine.high %v12331_v5, %v12332_v45 }
 0x367   : > { %v5791_v49 = vpop.permute.xlu1 %5790  ;;  %6036 = vrot.lane.b32.xlu0 %v4003_v20, %s6936_s17  ;;  %v12346_v53 = vcombine.high %v12344_v16, %v12345_v28  ;;  %v12351_v57 = vcombine.low %v12193_v13, %v12192_v59  ;;  %v12356_v59 = vld [vmem:[#allocation264_spill] sm:$0xff]  ;;  %v12357_v13 = vld [vmem:[#allocation266_spill] sm:$0xff] }
 0x368   : > { %v3849_v8 = vrot.slane %v3835_v30, %v7368_v52  ;;  %v4005_v30 = vcombine.high %v3953_v23, %v3985_v6  ;;  %v12358_v28 = vld [vmem:[#allocation246_spill] sm:$0xff] }
 0x369   : > { %6018 = vrot.lane.b32.xlu1 %v3329_v11, %s6938_s27  ;;  %v5813_v61 = vpop.permute.xlu0 %5812  ;;  %v12340_v11 = vld [vmem:[#allocation210_spill] sm:$0xff] }
 0x36a   : > { %v3867_v25 = vcombine.high %v12341_v33, %v12340_v11  ;;  %v6456_v19 = vsel %vm6415_vm1, %v6452_v26, %v5813_v61  ;;  %v12347_v61 = vld [vmem:[#allocation26_spill] sm:$0xff] }
 0x36b   : > { %v5795_v29 = vpop.permute.xlu1 %5794  ;;  %6048 = vrot.lane.b32.xlu0 %v12333_v63, %s6937_s25  ;;  %v12353_v26 = vld [vmem:[#allocation122_spill] sm:$0xff] }
 0x36d   : > { %6030 = vrot.lane.b32.xlu1 %v12337_v10, %s6936_s17  ;;  %v5825_v7 = vpop.permute.xlu0 %5824  ;;  %v3817_v10 = vrot.slane %v12346_v53, %v7368_v52  ;;  %v12359_v53 = vld [vmem:[#allocation247_spill] sm:$0xff] }
 0x36e   : > { %v6458_v20 = vsel %vm6420_vm2, %v6454_v12, %v5825_v7  ;;  %v12348_v12 = vld [vmem:[#allocation58_spill] sm:$0xff] }
 0x36f   : > { %v5807_v24 = vpop.permute.xlu1 %5806  ;;  %6624 = vst [vmem:[%s10193_s29 + $0x98] sm:$0xff] %v6458_v20  ;;  %6052 = vrot.lane.b32.xlu0 %v4004_v15, %s6937_s25  ;;  %v12349_v7 = vcombine.low %v12347_v61, %v12348_v12  ;;  %v12350_v15 = vcombine.low %v12187_v4, %v12188_v27  ;;  %v3868_v20 = vcombine.low %v3817_v10, %v3849_v8 }
 0x370   : > { %v6451_v4 = vsel %vm6410_vm0, %v12351_v57, %v5795_v29  ;;  %v3987_v29 = vcombine.high %v12357_v13, %v12356_v59  ;;  %v3869_v16 = vcombine.high %v3817_v10, %v3849_v8  ;;  %v12363_v8 = vcombine.low %v12201_v14, %v12202_v44  ;;  %v12370_v14 = vld [vmem:[#allocation213_spill] sm:$0xff] }
 0x371   : > { %6034 = vrot.lane.b32.xlu1 %v3867_v25, %s6936_s17  ;;  %v5829_v31 = vpop.permute.xlu0 %5828  ;;  %v6449_v41 = vsel %vm6410_vm0, %v12350_v15, %v5791_v49 }
 0x372   : > { %v6460_v63 = vsel %vm6420_vm2, %v6456_v19, %v5829_v31  ;;  %v6453_v5 = vsel %vm6415_vm1, %v6449_v41, %v5807_v24  ;;  %v12352_v24 = vld [vmem:[#allocation90_spill] sm:$0xff]  ;;  %v12355_v31 = vcombine.high %v12347_v61, %v12348_v12  ;;  %v4001_v61 = vrot.slane %v3987_v29, %v7368_v52  ;;  %v12360_v41 = vld [vmem:[#allocation91_spill] sm:$0xff] }
 0x373   : > { %v5811_v55 = vpop.permute.xlu1 %5810  ;;  %6656 = vst [vmem:[%s10193_s29 + $0x198] sm:$0xff] %v6460_v63  ;;  %6064 = vrot.lane.b32.xlu0 %v12343_v35, %s6938_s27  ;;  %v12354_v19 = vcombine.high %v12352_v24, %v12353_v26  ;;  %v12369_v29 = vld [vmem:[#allocation211_spill] sm:$0xff] }
 0x374   : > { %v6455_v49 = vsel %vm6415_vm1, %v6451_v4, %v5811_v55  ;;  %v4007_v55 = vcombine.high %v9627_v56, %v9916_v34  ;;  %v3871_v44 = vcombine.high %v12370_v14, %v12369_v29 }
 0x375   : > { %6046 = vrot.lane.b32.xlu1 %v12349_v7, %s6937_s25  ;;  %v5841_v46 = vpop.permute.xlu0 %5840  ;;  %v3955_v7 = vcombine.high %v12359_v53, %v12358_v28 }
 0x376   : > { %v6462_v10 = vsel %vm6410_vm0, %v12363_v8, %v5841_v46  ;;  %v12371_v46 = vcombine.low %v9586_v21, %v9828_v48  ;;  %v12373_v21 = vld [vmem:[#allocation151_spill] sm:$0xff]  ;;  %v12374_v48 = vld [vmem:[#allocation149_spill] sm:$0xff] }
 0x377   : > { %v5823_v45 = vpop.permute.xlu1 %5822  ;;  %6068 = vrot.lane.b32.xlu0 %v4005_v30, %s6938_s27  ;;  %v12361_v30 = vld [vmem:[#allocation123_spill] sm:$0xff] }
 0x378   : > { %v6457_v25 = vsel %vm6420_vm2, %v6453_v5, %v5823_v45  ;;  %v12362_v5 = vcombine.low %v12360_v41, %v12361_v30  ;;  %v3969_v45 = vrot.slane %v3955_v7, %v7368_v52 }
 0x379   : > { %6608 = vst [vmem:[%s10193_s29 + $0x18] sm:$0xff] %v6457_v25  ;;  %6050 = vrot.lane.b32.xlu1 %v3868_v20, %s6937_s25  ;;  %v5845_v27 = vpop.permute.xlu0 %5844  ;;  %v12364_v20 = vld [vmem:[#allocation27_spill] sm:$0xff] }
 0x37a   : > { %v12365_v25 = vld [vmem:[#allocation59_spill] sm:$0xff] }
 0x37b   : > { %v5827_v6 = vpop.permute.xlu1 %5826  ;;  %6080 = vrot.lane.b32.xlu0 %v12354_v19, %s6936_s17  ;;  %v12366_v57 = vcombine.high %v12364_v20, %v12365_v25  ;;  %v12368_v19 = vld [vmem:[#allocation191_spill] sm:$0xff] }
 0x37c   : > { %v6459_v23 = vsel %vm6420_vm2, %v6455_v49, %v5827_v6  ;;  %v4008_v6 = vcombine.low %v3969_v45, %v4001_v61 }
 0x37d   : > { %6640 = vst [vmem:[%s10193_s29 + $0x118] sm:$0xff] %v6459_v23  ;;  %6062 = vrot.lane.b32.xlu1 %v12355_v31, %s6938_s27  ;;  %v5857_v63 = vpop.permute.xlu0 %5856  ;;  %v12367_v23 = vld [vmem:[#allocation190_spill] sm:$0xff] }
 0x37e   : > { %v6466_v4 = vsel %vm6415_vm1, %v6462_v10, %v5857_v63  ;;  %v3851_v31 = vcombine.high %v12368_v19, %v12367_v23  ;;  %v6464_v63 = vsel %vm6410_vm0, %v12371_v46, %v5845_v27  ;;  %v12375_v27 = vcombine.high %v12373_v21, %v12374_v48  ;;  %v12377_v10 = vld [vmem:[#allocation60_spill] sm:$0xff]  ;;  %v12382_v46 = vld [vmem:[#allocation73_spill] sm:$0xff]  ;;  %v12388_v21 = vld [vmem:[#allocation267_spill] sm:$0xff] }
 0x37f   : > { %v5839_v35 = vpop.permute.xlu1 %5838  ;;  %6084 = vrot.lane.b32.xlu0 %v4007_v55, %s6936_s17  ;;  %v4009_v19 = vcombine.high %v3969_v45, %v4001_v61  ;;  %v12389_v48 = vld [vmem:[#allocation75_spill] sm:$0xff] }
 0x380   : > { %v3865_v7 = vrot.slane %v3851_v31, %v7368_v52  ;;  %v3833_v8 = vrot.slane %v12375_v27, %v7368_v52 }
 0x381   : > { %6066 = vrot.lane.b32.xlu1 %v3869_v16, %s6938_s27  ;;  %v5861_v15 = vpop.permute.xlu0 %5860 }
 0x382   : > { %v6468_v55 = vsel %vm6415_vm1, %v6464_v63, %v5861_v15  ;;  %v12376_v15 = vld [vmem:[#allocation28_spill] sm:$0xff]  ;;  %v3872_v31 = vcombine.low %v3833_v8, %v3865_v7 }
 0x383   : > { %v5843_v12 = vpop.permute.xlu1 %5842  ;;  %6096 = vrot.lane.b32.xlu0 %v12362_v5, %s6937_s25  ;;  %v12372_v5 = vcombine.high %v12360_v41, %v12361_v30 }
 0x385   : > { %6078 = vrot.lane.b32.xlu1 %v12366_v57, %s6936_s17  ;;  %v5873_v49 = vpop.permute.xlu0 %5872  ;;  %v12378_v57 = vcombine.low %v12376_v15, %v12377_v10 }
 0x386   : > { %v6470_v13 = vsel %vm6420_vm2, %v6466_v4, %v5873_v49  ;;  %v12379_v4 = vld [vmem:[#allocation49_spill] sm:$0xff] }
 0x387   : > { %v5855_v59 = vpop.permute.xlu1 %5854  ;;  %6625 = vst [vmem:[%s10193_s29 + $0xa0] sm:$0xff] %v6470_v13  ;;  %6100 = vrot.lane.b32.xlu0 %v4008_v6, %s6937_s25  ;;  %v12380_v49 = vcombine.low %v12212_v2, %v12379_v4 }
 0x389   : > { %6082 = vrot.lane.b32.xlu1 %v3871_v44, %s6936_s17  ;;  %v5877_v16 = vpop.permute.xlu0 %5876  ;;  %v6461_v6 = vsel %vm6410_vm0, %v12380_v49, %v5839_v35  ;;  %v12381_v44 = vld [vmem:[#allocation188_spill] sm:$0xff] }
 0x38a   : > { %v6472_v53 = vsel %vm6420_vm2, %v6468_v55, %v5877_v16  ;;  %v6465_v41 = vsel %vm6415_vm1, %v6461_v6, %v5855_v59  ;;  %v12383_v63 = vcombine.low %v12381_v44, %v12382_v46  ;;  %v12384_v59 = vld [vmem:[#allocation92_spill] sm:$0xff]  ;;  %v3873_v6 = vcombine.high %v3833_v8, %v3865_v7  ;;  %v12395_v44 = vld [vmem:[#allocation125_spill] sm:$0xff]  ;;  %v12397_v7 = vld [vmem:[#allocation82_spill] sm:$0xff] }
 0x38b   : > { %v5859_v28 = vpop.permute.xlu1 %5858  ;;  %6657 = vst [vmem:[%s10193_s29 + $0x1a0] sm:$0xff] %v6472_v53  ;;  %6112 = vrot.lane.b32.xlu0 %v12372_v5, %s6938_s27  ;;  %v12385_v16 = vld [vmem:[#allocation124_spill] sm:$0xff]  ;;  %v12387_v5 = vcombine.high %v12376_v15, %v12377_v10  ;;  %v12398_v8 = vld [vmem:[#allocation114_spill] sm:$0xff] }
 0x38c   : > { %v6463_v2 = vsel %vm6410_vm0, %v12383_v63, %v5843_v12  ;;  %v12386_v53 = vcombine.high %v12384_v59, %v12385_v16  ;;  %v4515_v12 = vcombine.high %v12389_v48, %v12388_v21 }
 0x38d   : > { %6094 = vrot.lane.b32.xlu1 %v12378_v57, %s6937_s25  ;;  %v5889_v23 = vpop.permute.xlu0 %5888  ;;  %v6467_v55 = vsel %vm6415_vm1, %v6463_v2, %v5859_v28  ;;  %v12390_v57 = vld [vmem:[#allocation12_spill] sm:$0xff]  ;;  %v12399_v2 = vcombine.low %v12397_v7, %v12398_v8  ;;  %v12408_v8 = vld [vmem:[#allocation226_spill] sm:$0xff] }
 0x38e   : > { %v12391_v28 = vld [vmem:[#allocation44_spill] sm:$0xff]  ;;  %v4529_v15 = vrot.slane %v4515_v12, %v7368_v52  ;;  %v12403_v12 = vld [vmem:[#allocation194_spill] sm:$0xff] }
 0x38f   : > { %v5871_v30 = vpop.permute.xlu1 %5870  ;;  %6116 = vrot.lane.b32.xlu0 %v4009_v19, %s6938_s27  ;;  %v4547_v4 = vcombine.high %v12391_v28, %v12390_v57  ;;  %v12392_v19 = vld [vmem:[#allocation248_spill] sm:$0xff] }
 0x390   : > { %v6469_v13 = vsel %vm6420_vm2, %v6465_v41, %v5871_v30  ;;  %v12393_v41 = vld [vmem:[#allocation249_spill] sm:$0xff] }
 0x391   : > { %6609 = vst [vmem:[%s10193_s29 + $0x20] sm:$0xff] %v6469_v13  ;;  %6098 = vrot.lane.b32.xlu1 %v3872_v31, %s6937_s25  ;;  %v5893_v35 = vpop.permute.xlu0 %5892  ;;  %v4483_v30 = vcombine.high %v12393_v41, %v12392_v19  ;;  %v12394_v13 = vld [vmem:[#allocation93_spill] sm:$0xff] }
 0x392   : > { %v12396_v46 = vcombine.low %v12394_v13, %v12395_v44 }
 0x393   : > { %v5875_v61 = vpop.permute.xlu1 %5874  ;;  %6128 = vrot.lane.b32.xlu0 %v12386_v53, %s6936_s17  ;;  %v4497_v63 = vrot.slane %v4483_v30, %v7368_v52  ;;  %v12405_v30 = vld [vmem:[#allocation214_spill] sm:$0xff] }
 0x394   : > { %v6471_v45 = vsel %vm6420_vm2, %v6467_v55, %v5875_v61  ;;  %v6474_v55 = vsel %vm6410_vm0, %v12399_v2, %v5889_v23  ;;  %v12400_v61 = vld [vmem:[#allocation29_spill] sm:$0xff]  ;;  %v12407_v23 = vld [vmem:[#allocation250_spill] sm:$0xff] }
 0x395   : > { %6641 = vst [vmem:[%s10193_s29 + $0x120] sm:$0xff] %v6471_v45  ;;  %6110 = vrot.lane.b32.xlu1 %v12387_v5, %s6938_s27  ;;  %v5905_v27 = vpop.permute.xlu0 %5904  ;;  %v12401_v45 = vld [vmem:[#allocation61_spill] sm:$0xff]  ;;  %v4548_v48 = vcombine.low %v4497_v63, %v4529_v15  ;;  %v12409_v2 = vcombine.low %v12407_v23, %v12408_v8  ;;  %v12415_v23 = vld [vmem:[#allocation62_spill] sm:$0xff] }
 0x396   : > { %v12402_v53 = vcombine.high %v12400_v61, %v12401_v45  ;;  %v6478_v5 = vsel %vm6415_vm1, %v6474_v55, %v5905_v27 }
 0x397   : > { %v5887_v49 = vpop.permute.xlu1 %5886  ;;  %6132 = vrot.lane.b32.xlu0 %v4547_v4, %s6936_s17  ;;  %v12404_v4 = vld [vmem:[#allocation105_spill] sm:$0xff]  ;;  %v6476_v27 = vsel %vm6410_vm0, %v12409_v2, %v5893_v35  ;;  %v12412_v35 = vld [vmem:[#allocation152_spill] sm:$0xff]  ;;  %v12417_v2 = vcombine.low %v12240_v50, %v12241_v37 }
 0x399   : > { %6114 = vrot.lane.b32.xlu1 %v3873_v6, %s6938_s27  ;;  %v5909_v31 = vpop.permute.xlu0 %5908  ;;  %v4379_v6 = vcombine.high %v12404_v4, %v12403_v12  ;;  %v12411_v4 = vld [vmem:[#allocation154_spill] sm:$0xff] }
 0x39a   : > { %v6480_v55 = vsel %vm6415_vm1, %v6476_v27, %v5909_v31  ;;  %v12414_v31 = vld [vmem:[#allocation30_spill] sm:$0xff] }
 0x39b   : > { %v5891_v10 = vpop.permute.xlu1 %5890  ;;  %6144 = vrot.lane.b32.xlu0 %v12396_v46, %s6937_s25  ;;  %v12406_v46 = vld [vmem:[#allocation216_spill] sm:$0xff]  ;;  %v12416_v8 = vcombine.low %v12414_v31, %v12415_v23 }
 0x39c   : > { %v4411_v7 = vcombine.high %v12406_v46, %v12405_v30 }
 0x39d   : > { %6126 = vrot.lane.b32.xlu1 %v12402_v53, %s6936_s17  ;;  %v5921_v21 = vpop.permute.xlu0 %5920 }
 0x39e   : > { %v6482_v41 = vsel %vm6420_vm2, %v6478_v5, %v5921_v21  ;;  %v4393_v21 = vrot.slane %v4379_v6, %v7368_v52  ;;  %v6473_v6 = vsel %vm6410_vm0, %v12417_v2, %v5887_v49  ;;  %v12425_v2 = vld [vmem:[#allocation171_spill] sm:$0xff] }
 0x39f   : > { %v5903_v19 = vpop.permute.xlu1 %5902  ;;  %6626 = vst [vmem:[%s10193_s29 + $0xa8] sm:$0xff] %v6482_v41  ;;  %6148 = vrot.lane.b32.xlu0 %v4548_v48, %s6937_s25  ;;  %v12410_v48 = vcombine.high %v12394_v13, %v12395_v44  ;;  %v12413_v41 = vcombine.high %v12411_v4, %v12412_v35  ;;  %v12420_v4 = vld [vmem:[#allocation126_spill] sm:$0xff] }
 0x3a0   : > { %v6477_v13 = vsel %vm6415_vm1, %v6473_v6, %v5903_v19  ;;  %v12419_v19 = vld [vmem:[#allocation94_spill] sm:$0xff] }
 0x3a1   : > { %6130 = vrot.lane.b32.xlu1 %v4411_v7, %s6936_s17  ;;  %v5925_v53 = vpop.permute.xlu0 %5924  ;;  %v4361_v7 = vrot.slane %v12413_v41, %v7368_v52  ;;  %v12421_v35 = vcombine.high %v12419_v19, %v12420_v4  ;;  %v12422_v41 = vcombine.high %v12414_v31, %v12415_v23  ;;  %v12440_v4 = vld [vmem:[#allocation215_spill] sm:$0xff] }
 0x3a2   : > { %v6484_v5 = vsel %vm6420_vm2, %v6480_v55, %v5925_v53  ;;  %v4549_v55 = vcombine.high %v4497_v63, %v4529_v15 }
 0x3a3   : > { %v5907_v12 = vpop.permute.xlu1 %5906  ;;  %6658 = vst [vmem:[%s10193_s29 + $0x1a8] sm:$0xff] %v6484_v5  ;;  %6160 = vrot.lane.b32.xlu0 %v12410_v48, %s6938_s27  ;;  %v4412_v53 = vcombine.low %v4361_v7, %v4393_v21  ;;  %v12418_v48 = vcombine.low %v12249_v17, %v12248_v18  ;;  %v12423_v18 = vld [vmem:[#allocation227_spill] sm:$0xff] }
 0x3a4   : > { %v12424_v17 = vld [vmem:[#allocation107_spill] sm:$0xff] }
 0x3a5   : > { %6142 = vrot.lane.b32.xlu1 %v12416_v8, %s6937_s25  ;;  %v5937_v27 = vpop.permute.xlu0 %5936  ;;  %v6475_v37 = vsel %vm6410_vm0, %v12418_v48, %v5891_v10  ;;  %v4531_v10 = vcombine.high %v12424_v17, %v12423_v18  ;;  %v12435_v18 = vld [vmem:[#allocation31_spill] sm:$0xff] }
 0x3a6   : > { %v6479_v49 = vsel %vm6415_vm1, %v6475_v37, %v5907_v12  ;;  %v12426_v12 = vld [vmem:[#allocation279_spill] sm:$0xff] }
 0x3a7   : > { %v5919_v44 = vpop.permute.xlu1 %5918  ;;  %6164 = vrot.lane.b32.xlu0 %v4549_v55, %s6938_s27  ;;  %v4551_v6 = vcombine.high %v12426_v12, %v12425_v2  ;;  %v4545_v31 = vrot.slane %v4531_v10, %v7368_v52  ;;  %v12429_v37 = vld [vmem:[#allocation95_spill] sm:$0xff]  ;;  %v12439_v2 = vld [vmem:[#allocation196_spill] sm:$0xff] }
 0x3a8   : > { %v6481_v5 = vsel %vm6420_vm2, %v6477_v13, %v5919_v44  ;;  %v4413_v13 = vcombine.high %v4361_v7, %v4393_v21  ;;  %v12427_v44 = vld [vmem:[#allocation252_spill] sm:$0xff]  ;;  %v12436_v17 = vld [vmem:[#allocation63_spill] sm:$0xff] }
 0x3a9   : > { %6610 = vst [vmem:[%s10193_s29 + $0x28] sm:$0xff] %v6481_v5  ;;  %6146 = vrot.lane.b32.xlu1 %v4412_v53, %s6937_s25  ;;  %v5941_v50 = vpop.permute.xlu0 %5940  ;;  %v12428_v53 = vld [vmem:[#allocation253_spill] sm:$0xff]  ;;  %v12432_v21 = vld [vmem:[#allocation84_spill] sm:$0xff] }
 0x3aa   : > { %v4499_v5 = vcombine.high %v12428_v53, %v12427_v44  ;;  %v12433_v7 = vld [vmem:[#allocation116_spill] sm:$0xff]  ;;  %v12438_v53 = vld [vmem:[#allocation195_spill] sm:$0xff] }
 0x3ab   : > { %v5923_v15 = vpop.permute.xlu1 %5922  ;;  %6176 = vrot.lane.b32.xlu0 %v12421_v35, %s6936_s17  ;;  %v12434_v35 = vcombine.low %v12432_v21, %v12433_v7  ;;  %v12441_v21 = vld [vmem:[#allocation217_spill] sm:$0xff] }
 0x3ac   : > { %v6483_v63 = vsel %vm6420_vm2, %v6479_v49, %v5923_v15  ;;  %v12430_v49 = vld [vmem:[#allocation127_spill] sm:$0xff]  ;;  %v4415_v7 = vcombine.high %v12441_v21, %v12440_v4 }
 0x3ad   : > { %6642 = vst [vmem:[%s10193_s29 + $0x128] sm:$0xff] %v6483_v63  ;;  %6158 = vrot.lane.b32.xlu1 %v12422_v41, %s6938_s27  ;;  %v5953_v8 = vpop.permute.xlu0 %5952  ;;  %v12431_v15 = vcombine.low %v12429_v37, %v12430_v49  ;;  %v4513_v63 = vrot.slane %v4499_v5, %v7368_v52  ;;  %v6486_v41 = vsel %vm6410_vm0, %v12434_v35, %v5937_v27  ;;  %v12442_v27 = vld [vmem:[#allocation251_spill] sm:$0xff] }
 0x3ae   : > { %v6490_v10 = vsel %vm6415_vm1, %v6486_v41, %v5953_v8  ;;  %v12443_v35 = vld [vmem:[#allocation167_spill] sm:$0xff] }
 0x3af   : > { %v5935_v55 = vpop.permute.xlu1 %5934  ;;  %6180 = vrot.lane.b32.xlu0 %v4551_v6, %s6936_s17  ;;  %v12437_v6 = vcombine.high %v12435_v18, %v12436_v17  ;;  %v4552_v44 = vcombine.low %v4513_v63, %v4545_v31 }
 0x3b1   : > { %6162 = vrot.lane.b32.xlu1 %v4413_v13, %s6938_s27  ;;  %v5957_v48 = vpop.permute.xlu0 %5956 }
 0x3b3   : > { %v5939_v23 = vpop.permute.xlu1 %5938  ;;  %6192 = vrot.lane.b32.xlu0 %v12431_v15, %s6937_s25  ;;  %v4395_v15 = vcombine.high %v12439_v2, %v12438_v53  ;;  %v12446_v53 = vld [vmem:[#allocation155_spill] sm:$0xff] }
 0x3b5   : > { %6174 = vrot.lane.b32.xlu1 %v12437_v6, %s6936_s17  ;;  %v5969_v13 = vpop.permute.xlu0 %5968  ;;  %v12444_v6 = vcombine.low %v12442_v27, %v12443_v35  ;;  %v12450_v27 = vld [vmem:[#allocation64_spill] sm:$0xff] }
 0x3b6   : > { %v6494_v5 = vsel %vm6420_vm2, %v6490_v10, %v5969_v13  ;;  %v4409_v13 = vrot.slane %v4395_v15, %v7368_v52 }
 0x3b7   : > { %v5951_v12 = vpop.permute.xlu1 %5950  ;;  %6627 = vst [vmem:[%s10193_s29 + $0xb0] sm:$0xff] %v6494_v5  ;;  %6196 = vrot.lane.b32.xlu0 %v4552_v44, %s6937_s25  ;;  %v6488_v8 = vsel %vm6410_vm0, %v12444_v6, %v5941_v50  ;;  %v12445_v44 = vcombine.high %v12429_v37, %v12430_v49  ;;  %v12447_v50 = vld [vmem:[#allocation153_spill] sm:$0xff] }
 0x3b8   : > { %v6492_v41 = vsel %vm6415_vm1, %v6488_v8, %v5957_v48  ;;  %v12448_v5 = vcombine.high %v12446_v53, %v12447_v50  ;;  %v12449_v48 = vld [vmem:[#allocation32_spill] sm:$0xff]  ;;  %v4553_v8 = vcombine.high %v4513_v63, %v4545_v31 }
 0x3b9   : > { %6178 = vrot.lane.b32.xlu1 %v4415_v7, %s6936_s17  ;;  %v5973_v17 = vpop.permute.xlu0 %5972  ;;  %v12451_v35 = vcombine.low %v12449_v48, %v12450_v27  ;;  %v12454_v63 = vld [vmem:[#allocation96_spill] sm:$0xff] }
 0x3ba   : > { %v6496_v10 = vsel %vm6420_vm2, %v6492_v41, %v5973_v17  ;;  %v4377_v7 = vrot.slane %v12448_v5, %v7368_v52  ;;  %v12452_v17 = vcombine.low %v12277_v39, %v12278_v51  ;;  %v12455_v53 = vld [vmem:[#allocation132_spill] sm:$0xff]  ;;  %v12457_v5 = vcombine.high %v12449_v48, %v12450_v27 }
 0x3bb   : > { %v5955_v2 = vpop.permute.xlu1 %5954  ;;  %6659 = vst [vmem:[%s10193_s29 + $0x1b0] sm:$0xff] %v6496_v10  ;;  %6208 = vrot.lane.b32.xlu0 %v12445_v44, %s6938_s27  ;;  %v12453_v44 = vcombine.low %v12283_v54, %v12282_v62  ;;  %v12456_v50 = vcombine.high %v12454_v63, %v12455_v53  ;;  %v12458_v62 = vld [vmem:[#allocation228_spill] sm:$0xff]  ;;  %v12459_v54 = vld [vmem:[#allocation11_spill] sm:$0xff] }
 0x3bc   : > { %v6485_v15 = vsel %vm6410_vm0, %v12452_v17, %v5935_v55  ;;  %v4416_v41 = vcombine.low %v4377_v7, %v4409_v13  ;;  %v12460_v17 = vld [vmem:[#allocation169_spill] sm:$0xff] }
 0x3bd   : > { %6190 = vrot.lane.b32.xlu1 %v12451_v35, %s6937_s25  ;;  %v5985_v6 = vpop.permute.xlu0 %5984  ;;  %v6489_v37 = vsel %vm6415_vm1, %v6485_v15, %v5951_v12  ;;  %v6487_v39 = vsel %vm6410_vm0, %v12453_v44, %v5939_v23  ;;  %v5059_v23 = vcombine.high %v12459_v54, %v12458_v62 }
 0x3be   : > { %v6491_v55 = vsel %vm6415_vm1, %v6487_v39, %v5955_v2  ;;  %v12461_v2 = vld [vmem:[#allocation280_spill] sm:$0xff]  ;;  %v12464_v39 = vld [vmem:[#allocation97_spill] sm:$0xff] }
 0x3bf   : > { %v5967_v49 = vpop.permute.xlu1 %5966  ;;  %6212 = vrot.lane.b32.xlu0 %v4553_v8, %s6938_s27  ;;  %v5091_v15 = vcombine.high %v12461_v2, %v12460_v17  ;;  %v5073_v48 = vrot.slane %v5059_v23, %v7368_v52  ;;  %v12473_v17 = vld [vmem:[#allocation218_spill] sm:$0xff] }
 0x3c0   : > { %v6493_v10 = vsel %vm6420_vm2, %v6489_v37, %v5967_v49  ;;  %v4417_v37 = vcombine.high %v4377_v7, %v4409_v13  ;;  %v12462_v49 = vld [vmem:[#allocation10_spill] sm:$0xff]  ;;  %v12467_v13 = vcombine.low %v12294_v60, %v12295_v9 }
 0x3c1   : > { %6611 = vst [vmem:[%s10193_s29 + $0x30] sm:$0xff] %v6493_v10  ;;  %6194 = vrot.lane.b32.xlu1 %v4416_v41, %s6937_s25  ;;  %v5989_v51 = vpop.permute.xlu0 %5988  ;;  %v12463_v41 = vld [vmem:[#allocation254_spill] sm:$0xff] }
 0x3c2   : > { %v5027_v10 = vcombine.high %v12463_v41, %v12462_v49  ;;  %v6498_v7 = vsel %vm6410_vm0, %v12467_v13, %v5985_v6  ;;  %v12472_v49 = vld [vmem:[#allocation199_spill] sm:$0xff]  ;;  %v12474_v60 = vld [vmem:[#allocation222_spill] sm:$0xff]  ;;  %v12475_v6 = vcombine.low %v9617_v42, %v9879_v36 }
 0x3c3   : > { %v5971_v31 = vpop.permute.xlu1 %5970  ;;  %6224 = vrot.lane.b32.xlu0 %v12456_v50, %s6936_s17  ;;  %v12468_v50 = vld [vmem:[#allocation33_spill] sm:$0xff]  ;;  %v4955_v9 = vcombine.high %v12474_v60, %v12473_v17  ;;  %v12477_v42 = vld [vmem:[#allocation34_spill] sm:$0xff] }
 0x3c4   : > { %v6495_v12 = vsel %vm6420_vm2, %v6491_v55, %v5971_v31  ;;  %v12465_v55 = vld [vmem:[#allocation133_spill] sm:$0xff]  ;;  %v12478_v36 = vld [vmem:[#allocation70_spill] sm:$0xff] }
 0x3c5   : > { %6643 = vst [vmem:[%s10193_s29 + $0x130] sm:$0xff] %v6495_v12  ;;  %6206 = vrot.lane.b32.xlu1 %v12457_v5, %s6938_s27  ;;  %v6001_v35 = vpop.permute.xlu0 %6000  ;;  %v12466_v31 = vcombine.low %v12464_v39, %v12465_v55  ;;  %v5041_v12 = vrot.slane %v5027_v10, %v7368_v52  ;;  %v12469_v5 = vld [vmem:[#allocation69_spill] sm:$0xff] }
 0x3c6   : > { %v12470_v62 = vcombine.high %v12468_v50, %v12469_v5  ;;  %v6502_v54 = vsel %vm6415_vm1, %v6498_v7, %v6001_v35  ;;  %v6500_v35 = vsel %vm6410_vm0, %v12475_v6, %v5989_v51  ;;  %v12479_v51 = vcombine.low %v12477_v42, %v12478_v36 }
 0x3c7   : > { %v5983_v8 = vpop.permute.xlu1 %5982  ;;  %6228 = vrot.lane.b32.xlu0 %v5091_v15, %s6936_s17  ;;  %v5092_v15 = vcombine.low %v5041_v12, %v5073_v48 }
 0x3c9   : > { %6210 = vrot.lane.b32.xlu1 %v4417_v37, %s6938_s27  ;;  %v6005_v44 = vpop.permute.xlu0 %6004  ;;  %v12471_v37 = vld [vmem:[#allocation197_spill] sm:$0xff] }
 0x3ca   : > { %v4923_v41 = vcombine.high %v12472_v49, %v12471_v37  ;;  %v6504_v13 = vsel %vm6415_vm1, %v6500_v35, %v6005_v44  ;;  %v12480_v44 = vld [vmem:[#allocation158_spill] sm:$0xff]  ;;  %v12481_v37 = vld [vmem:[#allocation156_spill] sm:$0xff]  ;;  %v5093_v35 = vcombine.high %v5041_v12, %v5073_v48 }
 0x3cb   : > { %v5987_v27 = vpop.permute.xlu1 %5986  ;;  %6240 = vrot.lane.b32.xlu0 %v12466_v31, %s6937_s25  ;;  %v12482_v49 = vcombine.high %v12480_v44, %v12481_v37  ;;  %v12488_v44 = vcombine.high %v12477_v42, %v12478_v36  ;;  %v12494_v42 = vcombine.low %v12323_v1, %v12324_v0  ;;  %v12502_v0 = vcombine.low %v9620_v58, %v9913_v22  ;;  %v12507_v58 = vld [vmem:[#allocation72_spill] sm:$0xff] }
 0x3cd   : > { %6222 = vrot.lane.b32.xlu1 %v12470_v62, %s6936_s17  ;;  %v6017_v23 = vpop.permute.xlu0 %6016 }
 0x3ce   : > { %v6506_v10 = vsel %vm6420_vm2, %v6502_v54, %v6017_v23  ;;  %v4937_v23 = vrot.slane %v4923_v41, %v7368_v52 }
 0x3cf   : > { %v5999_v31 = vpop.permute.xlu1 %5998  ;;  %6628 = vst [vmem:[%s10193_s29 + $0xb8] sm:$0xff] %v6506_v10  ;;  %6244 = vrot.lane.b32.xlu0 %v5092_v15, %s6937_s25  ;;  %v12476_v15 = vcombine.high %v12464_v39, %v12465_v55  ;;  %v4905_v10 = vrot.slane %v12482_v49, %v7368_v52 }
 0x3d1   : > { %6226 = vrot.lane.b32.xlu1 %v4955_v9, %s6936_s17  ;;  %v6021_v7 = vpop.permute.xlu0 %6020  ;;  %v12483_v9 = vcombine.low %v12306_v43, %v12307_v47  ;;  %v4957_v49 = vcombine.high %v4905_v10, %v4937_v23 }
 0x3d2   : > { %v6508_v54 = vsel %vm6420_vm2, %v6504_v13, %v6021_v7  ;;  %v4956_v13 = vcombine.low %v4905_v10, %v4937_v23 }
 0x3d3   : > { %v6003_v62 = vpop.permute.xlu1 %6002  ;;  %6660 = vst [vmem:[%s10193_s29 + $0x1b8] sm:$0xff] %v6508_v54  ;;  %6256 = vrot.lane.b32.xlu0 %v12476_v15, %s6938_s27  ;;  %v6497_v41 = vsel %vm6410_vm0, %v12483_v9, %v5983_v8  ;;  %v12484_v54 = vcombine.low %v12312_v32, %v12311_v3  ;;  %v12486_v15 = vld [vmem:[#allocation134_spill] sm:$0xff]  ;;  %v12489_v32 = vld [vmem:[#allocation276_spill] sm:$0xff] }
 0x3d4   : > { %v6501_v39 = vsel %vm6415_vm1, %v6497_v41, %v5999_v31  ;;  %v12485_v31 = vld [vmem:[#allocation98_spill] sm:$0xff] }
 0x3d5   : > { %6238 = vrot.lane.b32.xlu1 %v12479_v51, %s6937_s25  ;;  %v6033_v6 = vpop.permute.xlu0 %6032  ;;  %v6499_v43 = vsel %vm6410_vm0, %v12484_v54, %v5987_v27  ;;  %v12487_v51 = vcombine.high %v12485_v31, %v12486_v15  ;;  %v12490_v27 = vld [vmem:[#allocation281_spill] sm:$0xff] }
 0x3d6   : > { %v6503_v8 = vsel %vm6415_vm1, %v6499_v43, %v6003_v62  ;;  %v5095_v37 = vcombine.high %v12490_v27, %v12489_v32  ;;  %v6510_v36 = vsel %vm6410_vm0, %v12494_v42, %v6033_v6  ;;  %v12498_v43 = vld [vmem:[#allocation220_spill] sm:$0xff] }
 0x3d7   : > { %v6015_v55 = vpop.permute.xlu1 %6014  ;;  %6260 = vrot.lane.b32.xlu0 %v5093_v35, %s6938_s27  ;;  %v12491_v35 = vld [vmem:[#allocation37_spill] sm:$0xff] }
 0x3d8   : > { %v6505_v7 = vsel %vm6420_vm2, %v6501_v39, %v6015_v55  ;;  %v12492_v39 = vld [vmem:[#allocation65_spill] sm:$0xff] }
 0x3d9   : > { %6612 = vst [vmem:[%s10193_s29 + $0x38] sm:$0xff] %v6505_v7  ;;  %6242 = vrot.lane.b32.xlu1 %v4956_v13, %s6937_s25  ;;  %v6037_v47 = vpop.permute.xlu0 %6036  ;;  %v12493_v55 = vcombine.high %v12491_v35, %v12492_v39  ;;  %v12495_v13 = vld [vmem:[#allocation35_spill] sm:$0xff]  ;;  %v12530_v39 = vld [vmem:[#allocation274_spill] sm:$0xff] }
 0x3da   : > { %v12496_v7 = vld [vmem:[#allocation71_spill] sm:$0xff]  ;;  %v6512_v6 = vsel %vm6410_vm0, %v12502_v0, %v6037_v47  ;;  %v12509_v47 = vld [vmem:[#allocation229_spill] sm:$0xff] }
 0x3db   : > { %v6019_v48 = vpop.permute.xlu1 %6018  ;;  %6272 = vrot.lane.b32.xlu0 %v12487_v51, %s6936_s17  ;;  %v12497_v23 = vcombine.high %v12495_v13, %v12496_v7 }
 0x3dc   : > { %v6507_v12 = vsel %vm6420_vm2, %v6503_v8, %v6019_v48  ;;  %v12499_v8 = vld [vmem:[#allocation224_spill] sm:$0xff] }
 0x3dd   : > { %6644 = vst [vmem:[%s10193_s29 + $0x138] sm:$0xff] %v6507_v12  ;;  %6254 = vrot.lane.b32.xlu1 %v12488_v44, %s6938_s27  ;;  %v6049_v3 = vpop.permute.xlu0 %6048  ;;  %v5499_v48 = vcombine.high %v12499_v8, %v12498_v43  ;;  %v12500_v44 = vld [vmem:[#allocation219_spill] sm:$0xff]  ;;  %v12529_v8 = vld [vmem:[#allocation272_spill] sm:$0xff] }
 0x3de   : > { %v6514_v10 = vsel %vm6415_vm1, %v6510_v36, %v6049_v3  ;;  %v12503_v36 = vld [vmem:[#allocation39_spill] sm:$0xff] }
 0x3df   : > { %v6031_v62 = vpop.permute.xlu1 %6030  ;;  %6276 = vrot.lane.b32.xlu0 %v5095_v37, %s6936_s17  ;;  %v12501_v37 = vld [vmem:[#allocation223_spill] sm:$0xff] }
 0x3e0   : > { %v4959_v1 = vcombine.high %v12501_v37, %v12500_v44  ;;  %v12534_v44 = vld [vmem:[#allocation278_spill] sm:$0xff]  ;;  %v12535_v37 = vld [vmem:[#allocation108_spill] sm:$0xff] }
 0x3e1   : > { %6258 = vrot.lane.b32.xlu1 %v4957_v49, %s6938_s27  ;;  %v6053_v9 = vpop.permute.xlu0 %6052 }
 0x3e2   : > { %v6516_v3 = vsel %vm6415_vm1, %v6512_v6, %v6053_v9  ;;  %v12511_v9 = vcombine.low %v12335_v40, %v12336_v38  ;;  %v12512_v6 = vld [vmem:[#allocation221_spill] sm:$0xff]  ;;  %v12516_v40 = vld [vmem:[#allocation100_spill] sm:$0xff] }
 0x3e3   : > { %v6035_v41 = vpop.permute.xlu1 %6034  ;;  %6318 = vrot.lane.b32.xlu0 %v12493_v55, %s6936_s17  ;;  %v12517_v38 = vld [vmem:[#allocation128_spill] sm:$0xff] }
 0x3e5   : > { %6270 = vrot.lane.b32.xlu1 %v12497_v23, %s6936_s17  ;;  %v6065_v54 = vpop.permute.xlu0 %6064  ;;  %v12504_v23 = vld [vmem:[#allocation67_spill] sm:$0xff] }
 0x3e6   : > { %v6518_v51 = vsel %vm6420_vm2, %v6514_v10, %v6065_v54  ;;  %v12505_v10 = vcombine.high %v12503_v36, %v12504_v23  ;;  %v12506_v54 = vld [vmem:[#allocation36_spill] sm:$0xff]  ;;  %v12514_v23 = vld [vmem:[#allocation42_spill] sm:$0xff]  ;;  %v12515_v36 = vld [vmem:[#allocation271_spill] sm:$0xff] }
 0x3e7   : > { %v6047_v12 = vpop.permute.xlu1 %6046  ;;  %6629 = vst [vmem:[%s10193_s29 + $0xc0] sm:$0xff] %v6518_v51  ;;  %6322 = vrot.lane.b32.xlu0 %v5499_v48, %s6936_s17  ;;  %v12508_v22 = vcombine.low %v12506_v54, %v12507_v58  ;;  %v12510_v48 = vld [vmem:[#allocation43_spill] sm:$0xff]  ;;  %v5043_v43 = vcombine.high %v12515_v36, %v12514_v23 }
 0x3e8   : > { %v5075_v51 = vcombine.high %v12510_v48, %v12509_v47  ;;  %v12519_v47 = vcombine.low %v12341_v33, %v12340_v11  ;;  %v12525_v33 = vld [vmem:[#allocation268_spill] sm:$0xff] }
 0x3e9   : > { %6274 = vrot.lane.b32.xlu1 %v4959_v1, %s6936_s17  ;;  %v6069_v49 = vpop.permute.xlu0 %6068  ;;  %v6509_v1 = vsel %vm6410_vm0, %v12511_v9, %v6031_v62  ;;  %v12518_v62 = vcombine.high %v12516_v40, %v12517_v38  ;;  %v10837_v11 = vrot.slane %v5043_v43, %v7368_v52  ;;  %v12531_v43 = vld [vmem:[#allocation102_spill] sm:$0xff] }
 0x3ea   : > { %v6520_v42 = vsel %vm6420_vm2, %v6516_v3, %v6069_v49  ;;  %v12513_v3 = vld [vmem:[#allocation225_spill] sm:$0xff]  ;;  %v10826_v9 = vrot.slane %v5075_v51, %v7368_v52 }
 0x3eb   : > { %v6051_v55 = vpop.permute.xlu1 %6050  ;;  %6661 = vst [vmem:[%s10193_s29 + $0x1c0] sm:$0xff] %v6520_v42  ;;  %6366 = vrot.lane.b32.xlu0 %v12505_v10, %s6936_s17  ;;  %v5503_v49 = vcombine.high %v12513_v3, %v12512_v6  ;;  %v6513_v42 = vsel %vm6415_vm1, %v6509_v1, %v6047_v12  ;;  %v6511_v12 = vsel %vm6410_vm0, %v12519_v47, %v6035_v41  ;;  %v12520_v1 = vld [vmem:[#allocation277_spill] sm:$0xff]  ;;  %v12526_v41 = vld [vmem:[#allocation270_spill] sm:$0xff] }
 0x3ec   : > { %v6515_v36 = vsel %vm6415_vm1, %v6511_v12, %v6051_v55  ;;  %v5603_v55 = vcombine.high %v12526_v41, %v12525_v33  ;;  %v5096_v47 = vcombine.low %v10837_v11, %v10826_v9  ;;  %v12527_v12 = vld [vmem:[#allocation198_spill] sm:$0xff] }
 0x3ed   : > { %6286 = vrot.lane.b32.xlu1 %v12508_v22, %s6937_s25  ;;  %v6081_v0 = vpop.permute.xlu0 %6080 }
 0x3ee   : > { %v10855_v33 = vrot.slane %v5603_v55, %v7368_v52  ;;  %v12539_v55 = vcombine.low %v12352_v24, %v12353_v26  ;;  %v12545_v24 = vld [vmem:[#allocation204_spill] sm:$0xff]  ;;  %v12546_v26 = vld [vmem:[#allocation206_spill] sm:$0xff] }
 0x3ef   : > { %v6063_v10 = vpop.permute.xlu1 %6062  ;;  %6370 = vrot.lane.b32.xlu0 %v5503_v49, %s6936_s17  ;;  %v12521_v49 = vld [vmem:[#allocation76_spill] sm:$0xff] }
 0x3f0   : > { %v6517_v22 = vsel %vm6420_vm2, %v6513_v42, %v6063_v10  ;;  %v5635_v42 = vcombine.high %v12521_v49, %v12520_v1  ;;  %v5639_v1 = vcombine.high %v12535_v37, %v12534_v44  ;;  %v12540_v44 = vld [vmem:[#allocation159_spill] sm:$0xff]  ;;  %v12541_v37 = vld [vmem:[#allocation157_spill] sm:$0xff] }
 0x3f1   : > { %6613 = vst [vmem:[%s10193_s29 + $0x40] sm:$0xff] %v6517_v22  ;;  %6320 = vrot.lane.b32.xlu1 %v12518_v62, %s6936_s17  ;;  %v6085_v48 = vpop.permute.xlu0 %6084  ;;  %v12522_v22 = vld [vmem:[#allocation99_spill] sm:$0xff]  ;;  %v12544_v49 = vld [vmem:[#allocation165_spill] sm:$0xff] }
 0x3f2   : > { %v12523_v62 = vld [vmem:[#allocation135_spill] sm:$0xff] }
 0x3f3   : > { %v6067_v23 = vpop.permute.xlu1 %6066  ;;  %v12524_v6 = vcombine.low %v12522_v22, %v12523_v62 }
 0x3f4   : > { %v6519_v10 = vsel %vm6420_vm2, %v6515_v36, %v6067_v23  ;;  %v12528_v36 = vld [vmem:[#allocation201_spill] sm:$0xff] }
 0x3f5   : > { %6288 = vrot.lane.b32.xlu0 %v12524_v6, %s6937_s25  ;;  %6645 = vst [vmem:[%s10193_s29 + $0x140] sm:$0xff] %v6519_v10  ;;  %6324 = vrot.lane.b32.xlu1 %v5635_v42, %s6936_s17  ;;  %v6097_v51 = vpop.permute.xlu0 %6096  ;;  %v4939_v23 = vcombine.high %v12528_v36, %v12527_v12  ;;  %v5571_v6 = vcombine.high %v12530_v39, %v12529_v8  ;;  %v12532_v10 = vld [vmem:[#allocation130_spill] sm:$0xff]  ;;  %v12536_v39 = vld [vmem:[#allocation101_spill] sm:$0xff] }
 0x3f6   : > { %v12533_v42 = vcombine.high %v12531_v43, %v12532_v10  ;;  %v12537_v8 = vld [vmem:[#allocation129_spill] sm:$0xff] }
 0x3f7   : > { %v6079_v3 = vpop.permute.xlu1 %6078  ;;  %v10860_v12 = vrot.slane %v4939_v23, %v7368_v52  ;;  %v10867_v36 = vrot.slane %v5571_v6, %v7368_v52  ;;  %v12542_v23 = vcombine.high %v12540_v44, %v12541_v37  ;;  %v12543_v43 = vld [vmem:[#allocation269_spill] sm:$0xff] }
 0x3f8   : > { %v5619_v7 = vcombine.high %v12544_v49, %v12543_v43  ;;  %v12547_v37 = vld [vmem:[#allocation273_spill] sm:$0xff]  ;;  %v12549_v49 = vcombine.low %v9627_v56, %v9916_v34  ;;  %v12550_v56 = vld [vmem:[#allocation103_spill] sm:$0xff] }
 0x3f9   : > { %6292 = vrot.lane.b32.xlu0 %v5096_v47, %s6937_s25  ;;  %6368 = vrot.lane.b32.xlu1 %v12533_v42, %s6936_s17  ;;  %v6101_v35 = vpop.permute.xlu0 %6100  ;;  %v12538_v47 = vcombine.low %v12536_v39, %v12537_v8  ;;  %v6522_v42 = vsel %vm6410_vm0, %v12539_v55, %v6081_v0  ;;  %v10878_v10 = vrot.slane %v12542_v23, %v7368_v52  ;;  %v12548_v23 = vld [vmem:[#allocation275_spill] sm:$0xff] }
 0x3fa   : > { %v5636_v13 = vcombine.low %v10867_v36, %v10855_v33  ;;  %v5467_v0 = vcombine.high %v12546_v26, %v12545_v24  ;;  %v5587_v38 = vcombine.high %v12548_v23, %v12547_v37  ;;  %v12551_v34 = vld [vmem:[#allocation131_spill] sm:$0xff]  ;;  %v12557_v37 = vld [vmem:[#allocation160_spill] sm:$0xff] }
 0x3fb   : > { %v6083_v41 = vpop.permute.xlu1 %6082  ;;  %v4960_v44 = vcombine.low %v10878_v10, %v10860_v12 }
 0x3fc   : > { %v10905_v26 = vrot.slane %v5467_v0, %v7368_v52  ;;  %v12559_v0 = vcombine.low %v12364_v20, %v12365_v25  ;;  %v12562_v20 = vcombine.low %v12370_v14, %v12369_v29  ;;  %v12567_v14 = vld [vmem:[#allocation163_spill] sm:$0xff] }
 0x3fd   : > { %6336 = vrot.lane.b32.xlu0 %v12538_v47, %s6937_s25  ;;  %6372 = vrot.lane.b32.xlu1 %v5639_v1, %s6936_s17  ;;  %v6526_v47 = vsel %vm6415_vm1, %v6522_v42, %v6097_v51  ;;  %v6113_v6 = vpop.permute.xlu0 %6112  ;;  %v6524_v51 = vsel %vm6410_vm0, %v12549_v49, %v6085_v48  ;;  %v5601_v48 = vrot.slane %v5587_v38, %v7368_v52  ;;  %v12561_v38 = vld [vmem:[#allocation207_spill] sm:$0xff] }
 0x3fe   : > { %v6530_v55 = vsel %vm6420_vm2, %v6526_v47, %v6113_v6  ;;  %v6528_v43 = vsel %vm6415_vm1, %v6524_v51, %v6101_v35  ;;  %v10901_v47 = vrot.slane %v5619_v7, %v7368_v52  ;;  %v12553_v35 = vld [vmem:[#allocation38_spill] sm:$0xff]  ;;  %v6521_v51 = vsel %vm6410_vm0, %v12559_v0, %v6079_v3 }
 0x3ff   : > { %v6095_v1 = vpop.permute.xlu1 %6094  ;;  %6630 = vst [vmem:[%s10193_s29 + $0xc8] sm:$0xff] %v6530_v55  ;;  %v12554_v55 = vld [vmem:[#allocation66_spill] sm:$0xff]  ;;  %v6523_v25 = vsel %vm6410_vm0, %v12562_v20, %v6083_v41  ;;  %v12568_v41 = vld [vmem:[#allocation161_spill] sm:$0xff] }
 0x400   : > { %v12555_v7 = vcombine.low %v12553_v35, %v12554_v55  ;;  %v6525_v40 = vsel %vm6415_vm1, %v6521_v51, %v6095_v1  ;;  %v12565_v51 = vld [vmem:[#allocation68_spill] sm:$0xff] }
 0x401   : > { %6340 = vrot.lane.b32.xlu0 %v5636_v13, %s6937_s25  ;;  %6290 = vrot.lane.b32.xlu1 %v4960_v44, %s6937_s25  ;;  %v6117_v42 = vpop.permute.xlu0 %6116  ;;  %v12552_v13 = vcombine.low %v12550_v56, %v12551_v34  ;;  %v12556_v44 = vld [vmem:[#allocation162_spill] sm:$0xff] }
 0x402   : > { %v6532_v24 = vsel %vm6420_vm2, %v6528_v43, %v6117_v42  ;;  %v12558_v23 = vcombine.high %v12556_v44, %v12557_v37  ;;  %v5640_v42 = vcombine.low %v5601_v48, %v10901_v47 }
 0x403   : > { %v6099_v6 = vpop.permute.xlu1 %6098  ;;  %6662 = vst [vmem:[%s10193_s29 + $0x1c8] sm:$0xff] %v6532_v24  ;;  %v12560_v24 = vld [vmem:[#allocation205_spill] sm:$0xff] }
 0x404   : > { %v5449_v49 = vrot.slane %v12558_v23, %v7368_v52  ;;  %v6527_v37 = vsel %vm6415_vm1, %v6523_v25, %v6099_v6  ;;  %v12569_v6 = vcombine.high %v12567_v14, %v12568_v41  ;;  %v12579_v41 = vld [vmem:[#allocation126_spill] sm:$0xff] }
 0x405   : > { %6384 = vrot.lane.b32.xlu0 %v12552_v13, %s6937_s25  ;;  %6334 = vrot.lane.b32.xlu1 %v12555_v7, %s6937_s25  ;;  %v6129_v43 = vpop.permute.xlu0 %6128  ;;  %v5483_v13 = vcombine.high %v12561_v38, %v12560_v24  ;;  %v5097_v38 = vcombine.high %v10837_v11, %v10826_v9  ;;  %v12572_v9 = vcombine.high %v12506_v54, %v12507_v58 }
 0x406   : > { %v5500_v32 = vcombine.low %v5449_v49, %v10905_v26 }
 0x407   : > { %v6111_v7 = vpop.permute.xlu1 %6110  ;;  %v5497_v1 = vrot.slane %v5483_v13, %v7368_v52 }
 0x408   : > { %v6529_v44 = vsel %vm6420_vm2, %v6525_v40, %v6111_v7  ;;  %v12563_v40 = vcombine.high %v12522_v22, %v12523_v62 }
 0x409   : > { %6388 = vrot.lane.b32.xlu0 %v5640_v42, %s6937_s25  ;;  %6614 = vst [vmem:[%s10193_s29 + $0x48] sm:$0xff] %v6529_v44  ;;  %6338 = vrot.lane.b32.xlu1 %v5500_v32, %s6937_s25  ;;  %v6133_v3 = vpop.permute.xlu0 %6132  ;;  %v12564_v32 = vld [vmem:[#allocation40_spill] sm:$0xff]  ;;  %v5465_v42 = vrot.slane %v12569_v6, %v7368_v52  ;;  %v12570_v44 = vcombine.high %v12536_v39, %v12537_v8 }
 0x40a   : > { %v12566_v29 = vcombine.low %v12564_v32, %v12565_v51  ;;  %v12571_v52 = vcombine.low %v12384_v59, %v12385_v16  ;;  %v4961_v59 = vcombine.high %v10878_v10, %v10860_v12  ;;  %v12573_v16 = vcombine.low %v12391_v28, %v12390_v57 }
 0x40b   : > { %v6115_v23 = vpop.permute.xlu1 %6114  ;;  %v5504_v7 = vcombine.low %v5465_v42, %v5497_v1  ;;  %v12574_v10 = vcombine.high %v12550_v56, %v12551_v34  ;;  %v12575_v57 = vcombine.high %v12553_v35, %v12554_v55  ;;  %v12576_v28 = vcombine.low %v12400_v61, %v12401_v45 }
 0x40c   : > { %v6531_v0 = vsel %vm6420_vm2, %v6527_v37, %v6115_v23  ;;  %v6534_v20 = vsel %vm6410_vm0, %v12571_v52, %v6129_v43  ;;  %v5637_v37 = vcombine.high %v10867_v36, %v10855_v33  ;;  %v6536_v54 = vsel %vm6410_vm0, %v12573_v16, %v6133_v3 }
 0x40d   : > { %6304 = vrot.lane.b32.xlu0 %v12563_v40, %s6938_s27  ;;  %6646 = vst [vmem:[%s10193_s29 + $0x148] sm:$0xff] %v6531_v0  ;;  %6382 = vrot.lane.b32.xlu1 %v12566_v29, %s6937_s25  ;;  %v6145_v24 = vpop.permute.xlu0 %6144  ;;  %v5641_v3 = vcombine.high %v5601_v48, %v10901_v47  ;;  %v5501_v56 = vcombine.high %v5449_v49, %v10905_v26 }
 0x40e   : > { %v6538_v11 = vsel %vm6415_vm1, %v6534_v20, %v6145_v24  ;;  %v12577_v61 = vcombine.low %v12406_v46, %v12405_v30  ;;  %v12578_v26 = vcombine.high %v12564_v32, %v12565_v51  ;;  %v5505_v14 = vcombine.high %v5465_v42, %v5497_v1  ;;  %v12581_v51 = vld [vmem:[#allocation279_spill] sm:$0xff] }
 0x40f   : > { %v6127_v13 = vpop.permute.xlu1 %6126  ;;  %v12580_v6 = vcombine.low %v12419_v19, %v12579_v41  ;;  %v12584_v20 = vld [vmem:[#allocation63_spill] sm:$0xff] }
 0x410   : > { %v6533_v12 = vsel %vm6410_vm0, %v12576_v28, %v6127_v13  ;;  %v12587_v28 = vcombine.low %v12454_v63, %v12455_v53 }
 0x411   : > { %6308 = vrot.lane.b32.xlu0 %v5097_v38, %s6938_s27  ;;  %6386 = vrot.lane.b32.xlu1 %v5504_v7, %s6937_s25  ;;  %v6149_v22 = vpop.permute.xlu0 %6148 }
 0x412   : > { %v6540_v58 = vsel %vm6415_vm1, %v6536_v54, %v6149_v22  ;;  %v12582_v22 = vld [vmem:[#allocation171_spill] sm:$0xff] }
 0x413   : > { %v6131_v62 = vpop.permute.xlu1 %6130  ;;  %v12583_v1 = vcombine.low %v12581_v51, %v12582_v22 }
 0x414   : > { %v6535_v45 = vsel %vm6410_vm0, %v12577_v61, %v6131_v62 }
 0x415   : > { %6352 = vrot.lane.b32.xlu0 %v12570_v44, %s6938_s27  ;;  %6302 = vrot.lane.b32.xlu1 %v12572_v9, %s6938_s27  ;;  %v6161_v25 = vpop.permute.xlu0 %6160  ;;  %v12585_v9 = vcombine.low %v12435_v18, %v12584_v20 }
 0x416   : > { %v6542_v39 = vsel %vm6420_vm2, %v6538_v11, %v6161_v25 }
 0x417   : > { %v6143_v23 = vpop.permute.xlu1 %6142  ;;  %6631 = vst [vmem:[%s10193_s29 + $0xd0] sm:$0xff] %v6542_v39 }
 0x418   : > { %v6537_v0 = vsel %vm6415_vm1, %v6533_v12, %v6143_v23 }
 0x419   : > { %6356 = vrot.lane.b32.xlu0 %v5637_v37, %s6938_s27  ;;  %6306 = vrot.lane.b32.xlu1 %v4961_v59, %s6938_s27  ;;  %v6165_v33 = vpop.permute.xlu0 %6164  ;;  %v12586_v59 = vcombine.low %v12441_v21, %v12440_v4 }
 0x41a   : > { %v6544_v36 = vsel %vm6420_vm2, %v6540_v58, %v6165_v33 }
 0x41b   : > { %v6147_v8 = vpop.permute.xlu1 %6146  ;;  %6663 = vst [vmem:[%s10193_s29 + $0x1d0] sm:$0xff] %v6544_v36 }
 0x41c   : > { %v6539_v47 = vsel %vm6415_vm1, %v6535_v45, %v6147_v8  ;;  %v12590_v45 = vcombine.low %v12468_v50, %v12469_v5 }
 0x41d   : > { %6400 = vrot.lane.b32.xlu0 %v12574_v10, %s6938_s27  ;;  %6350 = vrot.lane.b32.xlu1 %v12575_v57, %s6938_s27  ;;  %v6177_v43 = vpop.permute.xlu0 %6176 }
 0x41e   : > { %v6546_v24 = vsel %vm6410_vm0, %v12580_v6, %v6177_v43 }
 0x41f   : > { %v6159_v40 = vpop.permute.xlu1 %6158 }
 0x420   : > { %v6541_v34 = vsel %vm6420_vm2, %v6537_v0, %v6159_v40  ;;  %v12588_v0 = vld [vmem:[#allocation169_spill] sm:$0xff] }
 0x421   : > { %6404 = vrot.lane.b32.xlu0 %v5641_v3, %s6938_s27  ;;  %6615 = vst [vmem:[%s10193_s29 + $0x50] sm:$0xff] %v6541_v34  ;;  %6354 = vrot.lane.b32.xlu1 %v5501_v56, %s6938_s27  ;;  %v6181_v35 = vpop.permute.xlu0 %6180  ;;  %v12589_v40 = vcombine.low %v12461_v2, %v12588_v0 }
 0x422   : > { %v6548_v42 = vsel %vm6410_vm0, %v12583_v1, %v6181_v35 }
 0x423   : > { %v6163_v48 = vpop.permute.xlu1 %6162 }
 0x424   : > { %v6543_v55 = vsel %vm6420_vm2, %v6539_v47, %v6163_v48 }
 0x425   : > { %6647 = vst [vmem:[%s10193_s29 + $0x150] sm:$0xff] %v6543_v55  ;;  %6398 = vrot.lane.b32.xlu1 %v12578_v26, %s6938_s27  ;;  %v6193_v49 = vpop.permute.xlu0 %6192  ;;  %v12591_v26 = vcombine.low %v12474_v60, %v12473_v17 }
 0x426   : > { %v6550_v38 = vsel %vm6415_vm1, %v6546_v24, %v6193_v49 }
 0x427   : > { %v6175_v29 = vpop.permute.xlu1 %6174 }
 0x428   : > { %v6545_v11 = vsel %vm6410_vm0, %v12585_v9, %v6175_v29  ;;  %v12592_v9 = vcombine.low %v12485_v31, %v12486_v15 }
 0x429   : > { %6402 = vrot.lane.b32.xlu1 %v5505_v14, %s6938_s27  ;;  %v6197_v30 = vpop.permute.xlu0 %6196 }
 0x42a   : > { %v6552_v62 = vsel %vm6415_vm1, %v6548_v42, %v6197_v30 }
 0x42b   : > { %v6179_v46 = vpop.permute.xlu1 %6178 }
 0x42c   : > { %v6547_v16 = vsel %vm6410_vm0, %v12586_v59, %v6179_v46  ;;  %v12593_v59 = vld [vmem:[#allocation276_spill] sm:$0xff] }
 0x42d   : > { %v6209_v13 = vpop.permute.xlu0 %6208 }
 0x42e   : > { %v6554_v32 = vsel %vm6420_vm2, %v6550_v38, %v6209_v13 }
 0x42f   : > { %v6191_v7 = vpop.permute.xlu1 %6190  ;;  %6632 = vst [vmem:[%s10193_s29 + $0xd8] sm:$0xff] %v6554_v32 }
 0x430   : > { %v6549_v37 = vsel %vm6415_vm1, %v6545_v11, %v6191_v7 }
 0x431   : > { %v6213_v44 = vpop.permute.xlu0 %6212 }
 0x432   : > { %v6556_v52 = vsel %vm6420_vm2, %v6552_v62, %v6213_v44 }
 0x433   : > { %v6195_v19 = vpop.permute.xlu1 %6194  ;;  %6664 = vst [vmem:[%s10193_s29 + $0x1d8] sm:$0xff] %v6556_v52 }
 0x434   : > { %v6551_v58 = vsel %vm6415_vm1, %v6547_v16, %v6195_v19  ;;  %v12594_v16 = vcombine.low %v12490_v27, %v12593_v59 }
 0x435   : > { %v6225_v25 = vpop.permute.xlu0 %6224 }
 0x436   : > { %v6558_v4 = vsel %vm6410_vm0, %v12587_v28, %v6225_v25  ;;  %v12599_v28 = vld [vmem:[#allocation71_spill] sm:$0xff] }
 0x437   : > { %v6207_v23 = vpop.permute.xlu1 %6206 }
 0x438   : > { %v6553_v39 = vsel %vm6420_vm2, %v6549_v37, %v6207_v23 }
 0x439   : > { %6616 = vst [vmem:[%s10193_s29 + $0x58] sm:$0xff] %v6553_v39  ;;  %v6229_v54 = vpop.permute.xlu0 %6228 }
 0x43a   : > { %v6560_v56 = vsel %vm6410_vm0, %v12589_v40, %v6229_v54 }
 0x43b   : > { %v6211_v33 = vpop.permute.xlu1 %6210 }
 0x43c   : > { %v6555_v18 = vsel %vm6420_vm2, %v6551_v58, %v6211_v33 }
 0x43d   : > { %6648 = vst [vmem:[%s10193_s29 + $0x158] sm:$0xff] %v6555_v18  ;;  %v6241_v8 = vpop.permute.xlu0 %6240  ;;  %v12595_v18 = vld [vmem:[#allocation100_spill] sm:$0xff] }
 0x43e   : > { %v6562_v21 = vsel %vm6415_vm1, %v6558_v4, %v6241_v8  ;;  %v12596_v8 = vld [vmem:[#allocation128_spill] sm:$0xff] }
 0x43f   : > { %v6223_v36 = vpop.permute.xlu1 %6222 }
 0x440   : > { %v6557_v35 = vsel %vm6410_vm0, %v12590_v45, %v6223_v36  ;;  %v12597_v36 = vcombine.low %v12595_v18, %v12596_v8  ;;  %v12605_v45 = vld [vmem:[#allocation219_spill] sm:$0xff] }
 0x441   : > { %v6245_v10 = vpop.permute.xlu0 %6244  ;;  %v12620_v18 = vld [vmem:[#allocation67_spill] sm:$0xff] }
 0x442   : > { %v6564_v34 = vsel %vm6415_vm1, %v6560_v56, %v6245_v10  ;;  %v12601_v56 = vld [vmem:[#allocation76_spill] sm:$0xff] }
 0x443   : > { %v6227_v57 = vpop.permute.xlu1 %6226 }
 0x444   : > { %v6559_v49 = vsel %vm6410_vm0, %v12591_v26, %v6227_v57  ;;  %v12598_v57 = vld [vmem:[#allocation35_spill] sm:$0xff] }
 0x445   : > { %v6257_v12 = vpop.permute.xlu0 %6256  ;;  %v12600_v4 = vcombine.low %v12598_v57, %v12599_v28  ;;  %v12623_v57 = vld [vmem:[#allocation221_spill] sm:$0xff] }
 0x446   : > { %v6566_v3 = vsel %vm6420_vm2, %v6562_v21, %v6257_v12 }
 0x447   : > { %v6239_v43 = vpop.permute.xlu1 %6238  ;;  %6633 = vst [vmem:[%s10193_s29 + $0xe0] sm:$0xff] %v6566_v3 }
 0x448   : > { %v6561_v48 = vsel %vm6415_vm1, %v6557_v35, %v6239_v43 }
 0x449   : > { %v6261_v61 = vpop.permute.xlu0 %6260 }
 0x44a   : > { %v6568_v53 = vsel %vm6420_vm2, %v6564_v34, %v6261_v61  ;;  %v12602_v34 = vld [vmem:[#allocation277_spill] sm:$0xff] }
 0x44b   : > { %v6243_v63 = vpop.permute.xlu1 %6242  ;;  %6665 = vst [vmem:[%s10193_s29 + $0x1e0] sm:$0xff] %v6568_v53  ;;  %v12603_v61 = vcombine.low %v12601_v56, %v12602_v34  ;;  %v12604_v53 = vld [vmem:[#allocation223_spill] sm:$0xff] }
 0x44c   : > { %v6563_v14 = vsel %vm6415_vm1, %v6559_v49, %v6243_v63  ;;  %v12606_v35 = vcombine.low %v12604_v53, %v12605_v45 }
 0x44d   : > { %v6273_v47 = vpop.permute.xlu0 %6272 }
 0x44e   : > { %v6570_v11 = vsel %vm6410_vm0, %v12592_v9, %v6273_v47 }
 0x44f   : > { %v6255_v55 = vpop.permute.xlu1 %6254 }
 0x450   : > { %v6565_v2 = vsel %vm6420_vm2, %v6561_v48, %v6255_v55 }
 0x451   : > { %6617 = vst [vmem:[%s10193_s29 + $0x60] sm:$0xff] %v6565_v2  ;;  %v6277_v29 = vpop.permute.xlu0 %6276 }
 0x452   : > { %v6572_v54 = vsel %vm6410_vm0, %v12594_v16, %v6277_v29 }
 0x453   : > { %v6259_v30 = vpop.permute.xlu1 %6258 }
 0x454   : > { %v6567_v50 = vsel %vm6420_vm2, %v6563_v14, %v6259_v30  ;;  %v12607_v14 = vld [vmem:[#allocation102_spill] sm:$0xff] }
 0x455   : > { %6649 = vst [vmem:[%s10193_s29 + $0x160] sm:$0xff] %v6567_v50  ;;  %v6319_v5 = vpop.permute.xlu0 %6318  ;;  %v12608_v30 = vld [vmem:[#allocation130_spill] sm:$0xff] }
 0x456   : > { %v12609_v50 = vcombine.low %v12607_v14, %v12608_v30 }
 0x457   : > { %v6271_v46 = vpop.permute.xlu1 %6270 }
 0x458   : > { %v6569_v27 = vsel %vm6410_vm0, %v12600_v4, %v6271_v46 }
 0x459   : > { %v6323_v41 = vpop.permute.xlu0 %6322 }
 0x45b   : > { %v6275_v6 = vpop.permute.xlu1 %6274 }
 0x45c   : > { %v6571_v47 = vsel %vm6410_vm0, %v12606_v35, %v6275_v6  ;;  %v12610_v6 = vld [vmem:[#allocation37_spill] sm:$0xff] }
 0x45d   : > { %v11073_v24 = vpop.permute.xlu0 %6366 }
 0x45f   : > { %v6287_v38 = vpop.permute.xlu1 %6286 }
 0x460   : > { %v6573_v43 = vsel %vm6415_vm1, %v6569_v27, %v6287_v38  ;;  %v12611_v38 = vld [vmem:[#allocation65_spill] sm:$0xff] }
 0x461   : > { %v11075_v13 = vpop.permute.xlu0 %6370 }
 0x463   : > { %v6321_v7 = vpop.permute.xlu1 %6320 }
 0x464   : > { %v6582_v10 = vsel %vm6410_vm0, %v12597_v36, %v6321_v7  ;;  %v12612_v7 = vcombine.low %v12610_v6, %v12611_v38 }
 0x467   : > { %v6289_v17 = vpop.permute.xlu0 %6288  ;;  %v6325_v60 = vpop.permute.xlu1 %6324 }
 0x468   : > { %v6574_v25 = vsel %vm6415_vm1, %v6570_v11, %v6289_v17  ;;  %v6584_v63 = vsel %vm6410_vm0, %v12603_v61, %v6325_v60  ;;  %v6581_v17 = vsel %vm6410_vm0, %v12612_v7, %v6319_v5  ;;  %v12614_v11 = vld [vmem:[#allocation278_spill] sm:$0xff] }
 0x46b   : > { %v6293_v32 = vpop.permute.xlu0 %6292  ;;  %v6369_v51 = vpop.permute.xlu1 %6368 }
 0x46c   : > { %v6576_v58 = vsel %vm6415_vm1, %v6572_v54, %v6293_v32  ;;  %v6594_v46 = vsel %vm6410_vm0, %v12609_v50, %v6369_v51  ;;  %v12613_v51 = vld [vmem:[#allocation108_spill] sm:$0xff] }
 0x46f   : > { %v6337_v22 = vpop.permute.xlu0 %6336  ;;  %v6373_v1 = vpop.permute.xlu1 %6372 }
 0x470   : > { %v6586_v21 = vsel %vm6415_vm1, %v6582_v10, %v6337_v22  ;;  %v12622_v10 = vld [vmem:[#allocation225_spill] sm:$0xff] }
 0x471   : > { %v12624_v28 = vcombine.low %v12622_v10, %v12623_v57 }
 0x473   : > { %v6341_v42 = vpop.permute.xlu0 %6340  ;;  %v6291_v62 = vpop.permute.xlu1 %6290  ;;  %v6595_v4 = vsel %vm6410_vm0, %v12624_v28, %v11075_v13 }
 0x474   : > { %v6588_v48 = vsel %vm6415_vm1, %v6584_v63, %v6341_v42  ;;  %v6575_v2 = vsel %vm6415_vm1, %v6571_v47, %v6291_v62 }
 0x477   : > { %v6385_v44 = vpop.permute.xlu0 %6384  ;;  %v6335_v19 = vpop.permute.xlu1 %6334 }
 0x478   : > { %v6598_v60 = vsel %vm6415_vm1, %v6594_v46, %v6385_v44  ;;  %v6585_v22 = vsel %vm6415_vm1, %v6581_v17, %v6335_v19  ;;  %v12616_v44 = vld [vmem:[#allocation224_spill] sm:$0xff] }
 0x47b   : > { %v6389_v52 = vpop.permute.xlu0 %6388  ;;  %v6339_v20 = vpop.permute.xlu1 %6338 }
 0x47f   : > { %v6305_v37 = vpop.permute.xlu0 %6304  ;;  %v6383_v23 = vpop.permute.xlu1 %6382 }
 0x480   : > { %v6578_v39 = vsel %vm6420_vm2, %v6574_v25, %v6305_v37  ;;  %v12615_v25 = vcombine.low %v12613_v51, %v12614_v11  ;;  %v12617_v37 = vld [vmem:[#allocation220_spill] sm:$0xff] }
 0x481   : > { %6634 = vst [vmem:[%s10193_s29 + $0xe8] sm:$0xff] %v6578_v39  ;;  %v12618_v39 = vcombine.low %v12616_v44, %v12617_v37 }
 0x482   : > { %v6596_v5 = vsel %vm6410_vm0, %v12615_v25, %v6373_v1  ;;  %v12619_v1 = vld [vmem:[#allocation39_spill] sm:$0xff] }
 0x483   : > { %v6309_v33 = vpop.permute.xlu0 %6308  ;;  %v6387_v31 = vpop.permute.xlu1 %6386  ;;  %v6583_v19 = vsel %vm6410_vm0, %v12618_v39, %v6323_v41  ;;  %v6600_v59 = vsel %vm6415_vm1, %v6596_v5, %v6389_v52  ;;  %v12621_v8 = vcombine.low %v12619_v1, %v12620_v18 }
 0x484   : > { %v6580_v15 = vsel %vm6420_vm2, %v6576_v58, %v6309_v33  ;;  %v6587_v54 = vsel %vm6415_vm1, %v6583_v19, %v6339_v20 }
 0x485   : > { %6666 = vst [vmem:[%s10193_s29 + $0x1e8] sm:$0xff] %v6580_v15  ;;  %v6593_v41 = vsel %vm6410_vm0, %v12621_v8, %v11073_v24  ;;  %v6599_v24 = vsel %vm6415_vm1, %v6595_v4, %v6387_v31 }
 0x486   : > { %v6597_v52 = vsel %vm6415_vm1, %v6593_v41, %v6383_v23 }
 0x487   : > { %v6353_v12 = vpop.permute.xlu0 %6352  ;;  %v6303_v3 = vpop.permute.xlu1 %6302 }
 0x488   : > { %v6590_v0 = vsel %vm6420_vm2, %v6586_v21, %v6353_v12  ;;  %v6577_v40 = vsel %vm6420_vm2, %v6573_v43, %v6303_v3 }
 0x489   : > { %6635 = vst [vmem:[%s10193_s29 + $0xf0] sm:$0xff] %v6590_v0  ;;  %6618 = vst [vmem:[%s10193_s29 + $0x68] sm:$0xff] %v6577_v40 }
 0x48b   : > { %v6357_v55 = vpop.permute.xlu0 %6356  ;;  %v6307_v26 = vpop.permute.xlu1 %6306 }
 0x48c   : > { %v6592_v49 = vsel %vm6420_vm2, %v6588_v48, %v6357_v55  ;;  %v6579_v29 = vsel %vm6420_vm2, %v6575_v2, %v6307_v26 }
 0x48d   : > { %6667 = vst [vmem:[%s10193_s29 + $0x1f0] sm:$0xff] %v6592_v49  ;;  %6650 = vst [vmem:[%s10193_s29 + $0x168] sm:$0xff] %v6579_v29 }
 0x48f   : > { %v6401_v32 = vpop.permute.xlu0 %6400  ;;  %v6351_v42 = vpop.permute.xlu1 %6350 }
 0x490   : > { %v6602_v62 = vsel %vm6420_vm2, %v6598_v60, %v6401_v32  ;;  %v6589_v9 = vsel %vm6420_vm2, %v6585_v22, %v6351_v42 }
 0x491   : > { %6636 = vst [vmem:[%s10193_s29 + $0xf8] sm:$0xff] %v6602_v62  ;;  %6619 = vst [vmem:[%s10193_s29 + $0x70] sm:$0xff] %v6589_v9 }
 0x493   : > { %v6405_v16 = vpop.permute.xlu0 %6404  ;;  %v6355_v58 = vpop.permute.xlu1 %6354 }
 0x494   : > { %v6604_v33 = vsel %vm6420_vm2, %v6600_v59, %v6405_v16  ;;  %v6591_v15 = vsel %vm6420_vm2, %v6587_v54, %v6355_v58 }
 0x495   : > { %6668 = vst [vmem:[%s10193_s29 + $0x1f8] sm:$0xff] %v6604_v33  ;;  %6651 = vst [vmem:[%s10193_s29 + $0x170] sm:$0xff] %v6591_v15 }
 0x497   : > { %v6399_v36 = vpop.permute.xlu1 %6398 }
 0x498   : > { %v6601_v20 = vsel %vm6420_vm2, %v6597_v52, %v6399_v36 }
 0x499   : > { %6620 = vst [vmem:[%s10193_s29 + $0x78] sm:$0xff] %v6601_v20 }
 0x49b   : > { %v6403_v23 = vpop.permute.xlu1 %6402 }
 0x49c   : > { %v6603_v27 = vsel %vm6420_vm2, %v6599_v24, %v6403_v23 }
 0x49d   : > { %6652 = vst [vmem:[%s10193_s29 + $0x178] sm:$0xff] %v6603_v27 }
 0x49e   : > { %6876 = shalt.err (!%p6873_p2)
}
 0x49f   : > { %s6877_s21 = scalar_lea.hbm %s11165_s11, 8192  ;;  %s6881_s26 = scalar_lea.hbm %s11215_s1, 16384 }
 0x4a0   : > { %p6878_p4 = scmp.ne.s32.totalorder %s11165_s11, %s6877_s21  ;;  %p6882_p9 = scmp.lt.u32.totalorder %s11165_s11, %s11215_s1 }
 0x4a1   : > { %p6883_p1 = scmp.lt.u32.totalorder %s6881_s26, %s6877_s21  ;;  %p6885_p6 = scmp.lt.u32.totalorder %s6877_s21, %s11165_s11 }
 0x4a2   : > { %p6879_p5 = pnand %p6878_p4, %p12625_p11 }
 0x4a3   : > { %p6884_p3 = por %p6883_p1, %p6882_p9 }
 0x4a4   : > { %p6880_p7 = pneg %p6879_p5 }
 0x4a5   : > { %p6886_p12 = por %p6885_p6, %p6884_p3 }
 0x4a7   : > { %p6887_p13 = pnand %p6886_p12, %p6880_p7 }
 0x4a9   : > { %6890 = shalt.err (!%p6887_p13)
}
 0x4aa   : > { %s6940_s25 = smov 2048   ;;  %s6941_s27 = smov 128  }
 0x4ab   : > { %6779 = dma.vmem_to_hbm [thread:$0]  (%p12625_p11), %s11167_s3, 8192, %s11165_s11, %s6670_s10, %s6940_s25, %s6940_s25, %s6941_s27  }
 0x4ac PF: > { %s6699_s28 = sand.u32 1, %s6917_s6   ;;  %p12626_p8 = scmp.ne.s32.totalorder %s11696_s19, 0 }
 0x4ad   : > { %p12627_p10 = scmp.ge.s32.totalorder %s6929_s9, 2  ;;  %s6700_s29 = scalar_lea.sflag [#allocation4], %s6699_s28 }
 0x4af   : > { %p6786_p0 = pnand %p12627_p10, %p12626_p8 }
 0x4b1   : > { %6912 = dma.done.wait (!%p6786_p0), %s6700_s29, 8192  }
 0x4b2   : > { %6914 = vsyncadd (!%p6786_p0), %s6700_s29, 4294959104  ;;  %p14_p2 = scmp.ge.s32.totalorder %s6977_s12, 4   ;;  %s12628_s6 = smov %s6921_s7 }
 0x4b3   : > { %s12629_s7 = smov %s6925_s8  ;;  %s12630_s8 = smov %s6989_s15 }
 0x4b4   : > { %s12631_s9 = smov %s6977_s12  ;;  %16 = sbr.rel (!%p14_p2) target bundleno = 5 (0x5), region = 69 }
 0x4bb   :  { %6705 = vsyncpa [#allocation3], 1 }
 0x4bc   :  { %6707 = vsyncpa [#allocation3 + $0x1], 1 }
 0x4bd   :  { %6708 = vsyncpa [#allocation4], 1 }
 0x4be   :  { %6710 = vsyncpa [#allocation4 + $0x1], 1 }

</bundles_post_ra>
